<compile_context>
chip_gen: v7x
topology: tpu7x:2x2x1
jax: 0.10.0
libtpu: 0.0.40
codegen_flags: <defaults>
</compile_context>

<pallas_src>
import functools

import jax
import jax.numpy as jnp
from jax.experimental import pallas as pl
from jax.experimental.pallas import tpu as pltpu


def _fused_cnn_kernel(x_ref, w1_ref, b1_ref, w2_ref, b2_ref, o_ref,
                      p1_ref, p2_ref, *, k, img_w):
    """Fused conv1 + ReLU + conv2 + ReLU for one block of Nb images.

    x_ref : (1, Nb*H*W)       images, lane-flat (per-image row-major)
    w1_ref: (C1, k*k)         conv1 weight, cols ordered (kh, kw)
    b1_ref: (C1, 1)
    w2_ref: (C2, k*k*C1)      conv2 weight, cols ordered (kh, kw, cin)
    b2_ref: (C2, 1)
    o_ref : (C2, Nb*H*W)      conv2 output, natural W-strided column layout
    p1_ref: (k*k, Nb*H*W)     VMEM scratch: conv1 im2col patches
    p2_ref: (k*k*C1, Nb*H*W)  VMEM scratch: conv2 im2col patches
    """
    c1 = w1_ref.shape[0]
    n_cols = x_ref.shape[1]

    # ---- conv1 taps: lane rolls (XLU) stored straight into scratch rows ----
    # tap(kh,kw)[col] = x[col + kh*W + kw]; valid output columns never read a
    # wrapped/foreign-image value (max needed offset stays inside the image).
    x = x_ref[...]                                            # (1, n_cols)
    for kh in range(k):
        for kw in range(k):
            s = kh * img_w + kw
            idx = kh * k + kw
            tap = x if s == 0 else pltpu.roll(x, shift=n_cols - s, axis=1)
            p1_ref[idx:idx + 1, :] = tap

    # conv1 as a single channel-major MXU matmul + bias + ReLU.
    h = jnp.dot(w1_ref[...], p1_ref[...],
                preferred_element_type=jnp.float32)           # (C1, n_cols)
    h = jnp.maximum(h + b1_ref[...], 0.0)

    # ---- conv2 taps: same roll trick on the un-compacted h ----
    for kh in range(k):
        for kw in range(k):
            s = kh * img_w + kw
            idx = kh * k + kw
            tap = h if s == 0 else pltpu.roll(h, shift=n_cols - s, axis=1)
            p2_ref[idx * c1:(idx + 1) * c1, :] = tap

    # conv2 as a single channel-major MXU matmul + bias + ReLU.
    y = jnp.dot(w2_ref[...], p2_ref[...],
                preferred_element_type=jnp.float32)           # (C2, n_cols)
    y = jnp.maximum(y + b2_ref[...], 0.0)
    o_ref[...] = y.astype(o_ref.dtype)                        # lane-dense store


def cnn_model_forward(x_nchw, params, block_batch=8):
    """Forward pass matching CNNModel: relu(conv2(relu(conv1(x)))), NCHW in/out."""
    w1, b1, w2, b2 = params                    # weights in HWIO
    N, cin, H, W = x_nchw.shape
    assert cin == 1, "CNNModel's conv1 expects a single input channel"
    K = w1.shape[0]
    C1 = w1.shape[-1]
    C2 = w2.shape[-1]
    OH2 = H - 2 * (K - 1)
    OW2 = W - 2 * (K - 1)

    # Batch block size: largest of (block_batch, 8, 4, 2, 1) dividing N.
    # ~0.6 MiB of VMEM scratch per image -> Nb<=8 fits comfortably on all gens.
    nb = 1
    for cand in (block_batch, 8, 4, 2, 1):
        if 0 < cand <= N and N % cand == 0:
            nb = cand
            break
    num_blocks = N // nb
    n_cols = nb * H * W

    # Free metadata reshapes / tiny one-time weight re-layouts (outside kernel).
    x_flat = x_nchw.reshape(num_blocks, 1, n_cols)
    w1_cm = w1.reshape(K * K * cin, C1).T      # (C1, 25),  cols (kh, kw)
    w2_cm = w2.reshape(K * K * C1, C2).T       # (C2, 500), cols (kh, kw, cin)
    b1_cm = b1.reshape(C1, 1)
    b2_cm = b2.reshape(C2, 1)

    out = pl.pallas_call(
        functools.partial(_fused_cnn_kernel, k=K, img_w=W),
        out_shape=jax.ShapeDtypeStruct((num_blocks, C2, n_cols), x_nchw.dtype),
        grid=(num_blocks,),
        in_specs=[
            pl.BlockSpec((None, 1, n_cols), lambda i: (i, 0, 0)),   # x block
            pl.BlockSpec((C1, K * K), lambda i: (0, 0)),            # resident
            pl.BlockSpec((C1, 1), lambda i: (0, 0)),                # resident
            pl.BlockSpec((C2, K * K * C1), lambda i: (0, 0)),       # resident
            pl.BlockSpec((C2, 1), lambda i: (0, 0)),                # resident
        ],
        out_specs=pl.BlockSpec((None, C2, n_cols), lambda i: (i, 0, 0)),
        scratch_shapes=[
            pltpu.VMEM((K * K, n_cols), jnp.float32),        # conv1 patches
            pltpu.VMEM((K * K * C1, n_cols), jnp.float32),   # conv2 patches
        ],
        compiler_params=pltpu.CompilerParams(
            dimension_semantics=("parallel",)),
    )(x_flat, w1_cm, b1_cm, w2_cm, b2_cm)

    # Wrapper-side valid-column compaction + NCHW permute (tiny; fuses into
    # the consumer).  Column layout inside each image block is W-strided.
    out = out.reshape(num_blocks, C2, nb, H, W)[:, :, :, :OH2, :OW2]
    return jnp.transpose(out, (0, 2, 1, 3, 4)).reshape(N, C2, OH2, OW2)


def init_params(key, kernel_size=5):
    """Deterministic Conv2d-style init (uniform in +/- 1/sqrt(fan_in)), HWIO."""
    k1, k2, k3, k4 = jax.random.split(key, 4)

    def conv_init(kw_key, kb_key, cin, cout, k):
        bound = 1.0 / jnp.sqrt(cin * k * k)
        w = jax.random.uniform(kw_key, (k, k, cin, cout), jnp.float32,
                               minval=-bound, maxval=bound)
        b = jax.random.uniform(kb_key, (cout,), jnp.float32,
                               minval=-bound, maxval=bound)
        return w, b

    w1, b1 = conv_init(k1, k2, 1, 20, kernel_size)
    w2, b2 = conv_init(k3, k4, 20, 50, kernel_size)
    return w1, b1, w2, b2


def _reference_forward(x_nchw, params):
    """Pure-JAX reference (lax.conv) for correctness check."""
    w1, b1, w2, b2 = params
    dn = jax.lax.conv_dimension_numbers(x_nchw.shape, w1.shape,
                                        ("NCHW", "HWIO", "NCHW"))
    h = jax.lax.conv_general_dilated(x_nchw, w1, (1, 1), "VALID",
                                     dimension_numbers=dn)
    h = jax.nn.relu(h + b1[None, :, None, None])
    dn2 = jax.lax.conv_dimension_numbers(h.shape, w2.shape,
                                         ("NCHW", "HWIO", "NCHW"))
    y = jax.lax.conv_general_dilated(h, w2, (1, 1), "VALID",
                                     dimension_numbers=dn2)
    return jax.nn.relu(y + b2[None, :, None, None])


if __name__ == "__main__":
    key = jax.random.PRNGKey(0)
    k_x, k_p = jax.random.split(key)

    # NCHW input consistent with Conv2d(1, 20, 5): (batch=2, C=1, 16, 16)
    x = jax.random.normal(k_x, (2, 1, 16, 16), dtype=jnp.float32)
    params = init_params(k_p, kernel_size=5)

    fwd = jax.jit(cnn_model_forward)
    out = jax.block_until_ready(fwd(x, params))
    assert out.shape == (2, 50, 8, 8), out.shape

    ref = jax.block_until_ready(_reference_forward(x, params))
    assert jnp.allclose(out, ref, atol=1e-4, rtol=1e-4), \
        float(jnp.max(jnp.abs(out - ref)))

    print("KERNEL_OK")
</pallas_src>

<mosaic_0001>
module attributes {stable_mosaic.version = 11 : i64} {
  func.func @_fused_cnn_kernel(%arg0: i32, %arg1: memref<1x1x512xf32, #tpu.memory_space<vmem>>, %arg2: memref<20x25xf32, #tpu.memory_space<vmem>>, %arg3: memref<20x1xf32, #tpu.memory_space<vmem>>, %arg4: memref<50x500xf32, #tpu.memory_space<vmem>>, %arg5: memref<50x1xf32, #tpu.memory_space<vmem>>, %arg6: memref<1x50x512xf32, #tpu.memory_space<vmem>>, %arg7: memref<25x512xf32, #tpu.memory_space<vmem>>, %arg8: memref<500x512xf32, #tpu.memory_space<vmem>>) attributes {dimension_semantics = [#tpu.dimension_semantics<parallel>], iteration_bounds = array<i64: 1>, scalar_prefetch = 0 : i64, scratch_operands = 2 : i64, tpu.core_type = #tpu.core_type<tc>, window_params = [{transform_indices = @transform_0, window_bounds = array<i64: 1, 1, 512>}, {pipeline_mode = #tpu.pipeline_mode<synchronous>, transform_indices = @transform_1, window_bounds = array<i64: 20, 25>}, {pipeline_mode = #tpu.pipeline_mode<synchronous>, transform_indices = @transform_2, window_bounds = array<i64: 20, 1>}, {pipeline_mode = #tpu.pipeline_mode<synchronous>, transform_indices = @transform_3, window_bounds = array<i64: 50, 500>}, {pipeline_mode = #tpu.pipeline_mode<synchronous>, transform_indices = @transform_4, window_bounds = array<i64: 50, 1>}, {transform_indices = @transform_5, window_bounds = array<i64: 1, 50, 512>}]} {
    %c0 = arith.constant 0 : index
    %c0_0 = arith.constant 0 : index
    %c0_1 = arith.constant 0 : index
    %0 = vector.load %arg1[%c0, %c0_0, %c0_1] : memref<1x1x512xf32, #tpu.memory_space<vmem>>, vector<1x1x512xf32>
    %1 = vector.shape_cast %0 : vector<1x1x512xf32> to vector<1x512xf32>
    %c0_2 = arith.constant 0 : index
    %c0_3 = arith.constant 0 : index
    %2 = vector.load %arg7[%c0_2, %c0_3] : memref<25x512xf32, #tpu.memory_space<vmem>>, vector<1x512xf32>
    tpu.vector_store %arg7[%c0_2, %c0_3], %1 {strides = array<i32>} : memref<25x512xf32, #tpu.memory_space<vmem>>, vector<1x512xf32>,
    %c511_i32 = arith.constant 511 : i32
    %3 = tpu.dynamic_rotate %1 by %c511_i32 dim 1 : vector<1x512xf32>, i32 -> vector<1x512xf32>
    %c1 = arith.constant 1 : index
    %c0_4 = arith.constant 0 : index
    %4 = vector.load %arg7[%c1, %c0_4] : memref<25x512xf32, #tpu.memory_space<vmem>>, vector<1x512xf32>
    tpu.vector_store %arg7[%c1, %c0_4], %3 {strides = array<i32>} : memref<25x512xf32, #tpu.memory_space<vmem>>, vector<1x512xf32>,
    %c510_i32 = arith.constant 510 : i32
    %5 = tpu.dynamic_rotate %1 by %c510_i32 dim 1 : vector<1x512xf32>, i32 -> vector<1x512xf32>
    %c2 = arith.constant 2 : index
    %c0_5 = arith.constant 0 : index
    %6 = vector.load %arg7[%c2, %c0_5] : memref<25x512xf32, #tpu.memory_space<vmem>>, vector<1x512xf32>
    tpu.vector_store %arg7[%c2, %c0_5], %5 {strides = array<i32>} : memref<25x512xf32, #tpu.memory_space<vmem>>, vector<1x512xf32>,
    %c509_i32 = arith.constant 509 : i32
    %7 = tpu.dynamic_rotate %1 by %c509_i32 dim 1 : vector<1x512xf32>, i32 -> vector<1x512xf32>
    %c3 = arith.constant 3 : index
    %c0_6 = arith.constant 0 : index
    %8 = vector.load %arg7[%c3, %c0_6] : memref<25x512xf32, #tpu.memory_space<vmem>>, vector<1x512xf32>
    tpu.vector_store %arg7[%c3, %c0_6], %7 {strides = array<i32>} : memref<25x512xf32, #tpu.memory_space<vmem>>, vector<1x512xf32>,
    %c508_i32 = arith.constant 508 : i32
    %9 = tpu.dynamic_rotate %1 by %c508_i32 dim 1 : vector<1x512xf32>, i32 -> vector<1x512xf32>
    %c4 = arith.constant 4 : index
    %c0_7 = arith.constant 0 : index
    %10 = vector.load %arg7[%c4, %c0_7] : memref<25x512xf32, #tpu.memory_space<vmem>>, vector<1x512xf32>
    tpu.vector_store %arg7[%c4, %c0_7], %9 {strides = array<i32>} : memref<25x512xf32, #tpu.memory_space<vmem>>, vector<1x512xf32>,
    %c496_i32 = arith.constant 496 : i32
    %11 = tpu.dynamic_rotate %1 by %c496_i32 dim 1 : vector<1x512xf32>, i32 -> vector<1x512xf32>
    %c5 = arith.constant 5 : index
    %c0_8 = arith.constant 0 : index
    %12 = vector.load %arg7[%c5, %c0_8] : memref<25x512xf32, #tpu.memory_space<vmem>>, vector<1x512xf32>
    tpu.vector_store %arg7[%c5, %c0_8], %11 {strides = array<i32>} : memref<25x512xf32, #tpu.memory_space<vmem>>, vector<1x512xf32>,
    %c495_i32 = arith.constant 495 : i32
    %13 = tpu.dynamic_rotate %1 by %c495_i32 dim 1 : vector<1x512xf32>, i32 -> vector<1x512xf32>
    %c6 = arith.constant 6 : index
    %c0_9 = arith.constant 0 : index
    %14 = vector.load %arg7[%c6, %c0_9] : memref<25x512xf32, #tpu.memory_space<vmem>>, vector<1x512xf32>
    tpu.vector_store %arg7[%c6, %c0_9], %13 {strides = array<i32>} : memref<25x512xf32, #tpu.memory_space<vmem>>, vector<1x512xf32>,
    %c494_i32 = arith.constant 494 : i32
    %15 = tpu.dynamic_rotate %1 by %c494_i32 dim 1 : vector<1x512xf32>, i32 -> vector<1x512xf32>
    %c7 = arith.constant 7 : index
    %c0_10 = arith.constant 0 : index
    %16 = vector.load %arg7[%c7, %c0_10] : memref<25x512xf32, #tpu.memory_space<vmem>>, vector<1x512xf32>
    tpu.vector_store %arg7[%c7, %c0_10], %15 {strides = array<i32>} : memref<25x512xf32, #tpu.memory_space<vmem>>, vector<1x512xf32>,
    %c493_i32 = arith.constant 493 : i32
    %17 = tpu.dynamic_rotate %1 by %c493_i32 dim 1 : vector<1x512xf32>, i32 -> vector<1x512xf32>
    %c8 = arith.constant 8 : index
    %c0_11 = arith.constant 0 : index
    %18 = vector.load %arg7[%c8, %c0_11] : memref<25x512xf32, #tpu.memory_space<vmem>>, vector<1x512xf32>
    tpu.vector_store %arg7[%c8, %c0_11], %17 {strides = array<i32>} : memref<25x512xf32, #tpu.memory_space<vmem>>, vector<1x512xf32>,
    %c492_i32 = arith.constant 492 : i32
    %19 = tpu.dynamic_rotate %1 by %c492_i32 dim 1 : vector<1x512xf32>, i32 -> vector<1x512xf32>
    %c9 = arith.constant 9 : index
    %c0_12 = arith.constant 0 : index
    %20 = vector.load %arg7[%c9, %c0_12] : memref<25x512xf32, #tpu.memory_space<vmem>>, vector<1x512xf32>
    tpu.vector_store %arg7[%c9, %c0_12], %19 {strides = array<i32>} : memref<25x512xf32, #tpu.memory_space<vmem>>, vector<1x512xf32>,
    %c480_i32 = arith.constant 480 : i32
    %21 = tpu.dynamic_rotate %1 by %c480_i32 dim 1 : vector<1x512xf32>, i32 -> vector<1x512xf32>
    %c10 = arith.constant 10 : index
    %c0_13 = arith.constant 0 : index
    %22 = vector.load %arg7[%c10, %c0_13] : memref<25x512xf32, #tpu.memory_space<vmem>>, vector<1x512xf32>
    tpu.vector_store %arg7[%c10, %c0_13], %21 {strides = array<i32>} : memref<25x512xf32, #tpu.memory_space<vmem>>, vector<1x512xf32>,
    %c479_i32 = arith.constant 479 : i32
    %23 = tpu.dynamic_rotate %1 by %c479_i32 dim 1 : vector<1x512xf32>, i32 -> vector<1x512xf32>
    %c11 = arith.constant 11 : index
    %c0_14 = arith.constant 0 : index
    %24 = vector.load %arg7[%c11, %c0_14] : memref<25x512xf32, #tpu.memory_space<vmem>>, vector<1x512xf32>
    tpu.vector_store %arg7[%c11, %c0_14], %23 {strides = array<i32>} : memref<25x512xf32, #tpu.memory_space<vmem>>, vector<1x512xf32>,
    %c478_i32 = arith.constant 478 : i32
    %25 = tpu.dynamic_rotate %1 by %c478_i32 dim 1 : vector<1x512xf32>, i32 -> vector<1x512xf32>
    %c12 = arith.constant 12 : index
    %c0_15 = arith.constant 0 : index
    %26 = vector.load %arg7[%c12, %c0_15] : memref<25x512xf32, #tpu.memory_space<vmem>>, vector<1x512xf32>
    tpu.vector_store %arg7[%c12, %c0_15], %25 {strides = array<i32>} : memref<25x512xf32, #tpu.memory_space<vmem>>, vector<1x512xf32>,
    %c477_i32 = arith.constant 477 : i32
    %27 = tpu.dynamic_rotate %1 by %c477_i32 dim 1 : vector<1x512xf32>, i32 -> vector<1x512xf32>
    %c13 = arith.constant 13 : index
    %c0_16 = arith.constant 0 : index
    %28 = vector.load %arg7[%c13, %c0_16] : memref<25x512xf32, #tpu.memory_space<vmem>>, vector<1x512xf32>
    tpu.vector_store %arg7[%c13, %c0_16], %27 {strides = array<i32>} : memref<25x512xf32, #tpu.memory_space<vmem>>, vector<1x512xf32>,
    %c476_i32 = arith.constant 476 : i32
    %29 = tpu.dynamic_rotate %1 by %c476_i32 dim 1 : vector<1x512xf32>, i32 -> vector<1x512xf32>
    %c14 = arith.constant 14 : index
    %c0_17 = arith.constant 0 : index
    %30 = vector.load %arg7[%c14, %c0_17] : memref<25x512xf32, #tpu.memory_space<vmem>>, vector<1x512xf32>
    tpu.vector_store %arg7[%c14, %c0_17], %29 {strides = array<i32>} : memref<25x512xf32, #tpu.memory_space<vmem>>, vector<1x512xf32>,
    %c464_i32 = arith.constant 464 : i32
    %31 = tpu.dynamic_rotate %1 by %c464_i32 dim 1 : vector<1x512xf32>, i32 -> vector<1x512xf32>
    %c15 = arith.constant 15 : index
    %c0_18 = arith.constant 0 : index
    %32 = vector.load %arg7[%c15, %c0_18] : memref<25x512xf32, #tpu.memory_space<vmem>>, vector<1x512xf32>
    tpu.vector_store %arg7[%c15, %c0_18], %31 {strides = array<i32>} : memref<25x512xf32, #tpu.memory_space<vmem>>, vector<1x512xf32>,
    %c463_i32 = arith.constant 463 : i32
    %33 = tpu.dynamic_rotate %1 by %c463_i32 dim 1 : vector<1x512xf32>, i32 -> vector<1x512xf32>
    %c16 = arith.constant 16 : index
    %c0_19 = arith.constant 0 : index
    %34 = vector.load %arg7[%c16, %c0_19] : memref<25x512xf32, #tpu.memory_space<vmem>>, vector<1x512xf32>
    tpu.vector_store %arg7[%c16, %c0_19], %33 {strides = array<i32>} : memref<25x512xf32, #tpu.memory_space<vmem>>, vector<1x512xf32>,
    %c462_i32 = arith.constant 462 : i32
    %35 = tpu.dynamic_rotate %1 by %c462_i32 dim 1 : vector<1x512xf32>, i32 -> vector<1x512xf32>
    %c17 = arith.constant 17 : index
    %c0_20 = arith.constant 0 : index
    %36 = vector.load %arg7[%c17, %c0_20] : memref<25x512xf32, #tpu.memory_space<vmem>>, vector<1x512xf32>
    tpu.vector_store %arg7[%c17, %c0_20], %35 {strides = array<i32>} : memref<25x512xf32, #tpu.memory_space<vmem>>, vector<1x512xf32>,
    %c461_i32 = arith.constant 461 : i32
    %37 = tpu.dynamic_rotate %1 by %c461_i32 dim 1 : vector<1x512xf32>, i32 -> vector<1x512xf32>
    %c18 = arith.constant 18 : index
    %c0_21 = arith.constant 0 : index
    %38 = vector.load %arg7[%c18, %c0_21] : memref<25x512xf32, #tpu.memory_space<vmem>>, vector<1x512xf32>
    tpu.vector_store %arg7[%c18, %c0_21], %37 {strides = array<i32>} : memref<25x512xf32, #tpu.memory_space<vmem>>, vector<1x512xf32>,
    %c460_i32 = arith.constant 460 : i32
    %39 = tpu.dynamic_rotate %1 by %c460_i32 dim 1 : vector<1x512xf32>, i32 -> vector<1x512xf32>
    %c19 = arith.constant 19 : index
    %c0_22 = arith.constant 0 : index
    %40 = vector.load %arg7[%c19, %c0_22] : memref<25x512xf32, #tpu.memory_space<vmem>>, vector<1x512xf32>
    tpu.vector_store %arg7[%c19, %c0_22], %39 {strides = array<i32>} : memref<25x512xf32, #tpu.memory_space<vmem>>, vector<1x512xf32>,
    %c448_i32 = arith.constant 448 : i32
    %41 = tpu.dynamic_rotate %1 by %c448_i32 dim 1 : vector<1x512xf32>, i32 -> vector<1x512xf32>
    %c20 = arith.constant 20 : index
    %c0_23 = arith.constant 0 : index
    %42 = vector.load %arg7[%c20, %c0_23] : memref<25x512xf32, #tpu.memory_space<vmem>>, vector<1x512xf32>
    tpu.vector_store %arg7[%c20, %c0_23], %41 {strides = array<i32>} : memref<25x512xf32, #tpu.memory_space<vmem>>, vector<1x512xf32>,
    %c447_i32 = arith.constant 447 : i32
    %43 = tpu.dynamic_rotate %1 by %c447_i32 dim 1 : vector<1x512xf32>, i32 -> vector<1x512xf32>
    %c21 = arith.constant 21 : index
    %c0_24 = arith.constant 0 : index
    %44 = vector.load %arg7[%c21, %c0_24] : memref<25x512xf32, #tpu.memory_space<vmem>>, vector<1x512xf32>
    tpu.vector_store %arg7[%c21, %c0_24], %43 {strides = array<i32>} : memref<25x512xf32, #tpu.memory_space<vmem>>, vector<1x512xf32>,
    %c446_i32 = arith.constant 446 : i32
    %45 = tpu.dynamic_rotate %1 by %c446_i32 dim 1 : vector<1x512xf32>, i32 -> vector<1x512xf32>
    %c22 = arith.constant 22 : index
    %c0_25 = arith.constant 0 : index
    %46 = vector.load %arg7[%c22, %c0_25] : memref<25x512xf32, #tpu.memory_space<vmem>>, vector<1x512xf32>
    tpu.vector_store %arg7[%c22, %c0_25], %45 {strides = array<i32>} : memref<25x512xf32, #tpu.memory_space<vmem>>, vector<1x512xf32>,
    %c445_i32 = arith.constant 445 : i32
    %47 = tpu.dynamic_rotate %1 by %c445_i32 dim 1 : vector<1x512xf32>, i32 -> vector<1x512xf32>
    %c23 = arith.constant 23 : index
    %c0_26 = arith.constant 0 : index
    %48 = vector.load %arg7[%c23, %c0_26] : memref<25x512xf32, #tpu.memory_space<vmem>>, vector<1x512xf32>
    tpu.vector_store %arg7[%c23, %c0_26], %47 {strides = array<i32>} : memref<25x512xf32, #tpu.memory_space<vmem>>, vector<1x512xf32>,
    %c444_i32 = arith.constant 444 : i32
    %49 = tpu.dynamic_rotate %1 by %c444_i32 dim 1 : vector<1x512xf32>, i32 -> vector<1x512xf32>
    %c24 = arith.constant 24 : index
    %c0_27 = arith.constant 0 : index
    %50 = vector.load %arg7[%c24, %c0_27] : memref<25x512xf32, #tpu.memory_space<vmem>>, vector<1x512xf32>
    tpu.vector_store %arg7[%c24, %c0_27], %49 {strides = array<i32>} : memref<25x512xf32, #tpu.memory_space<vmem>>, vector<1x512xf32>,
    %c0_28 = arith.constant 0 : index
    %c0_29 = arith.constant 0 : index
    %51 = vector.load %arg2[%c0_28, %c0_29] : memref<20x25xf32, #tpu.memory_space<vmem>>, vector<20x25xf32>
    %c0_30 = arith.constant 0 : index
    %c0_31 = arith.constant 0 : index
    %52 = vector.load %arg7[%c0_30, %c0_31] : memref<25x512xf32, #tpu.memory_space<vmem>>, vector<25x512xf32>
    %cst = arith.constant dense<0.000000e+00> : vector<20x512xf32>
    %53 = tpu.matmul %51, %52, %cst {dimension_numbers = #tpu.dot_dimension_numbers<[1], [0], [0], [1], [0, 0, 1, 1], [], []>} : vector<20x25xf32>, vector<25x512xf32>, vector<20x512xf32> -> vector<20x512xf32>
    %c0_32 = arith.constant 0 : index
    %c0_33 = arith.constant 0 : index
    %54 = vector.load %arg3[%c0_32, %c0_33] : memref<20x1xf32, #tpu.memory_space<vmem>>, vector<20x1xf32>
    %55 = vector.broadcast %54 : vector<20x1xf32> to vector<20x512xf32>
    %56 = arith.addf %53, %55 : vector<20x512xf32>
    %cst_34 = arith.constant 0.000000e+00 : f32
    %57 = vector.broadcast %cst_34 : f32 to vector<20x512xf32>
    %58 = arith.maximumf %56, %57 : vector<20x512xf32>
    %c0_35 = arith.constant 0 : index
    %c0_36 = arith.constant 0 : index
    %59 = vector.load %arg8[%c0_35, %c0_36] : memref<500x512xf32, #tpu.memory_space<vmem>>, vector<20x512xf32>
    tpu.vector_store %arg8[%c0_35, %c0_36], %58 {strides = array<i32>} : memref<500x512xf32, #tpu.memory_space<vmem>>, vector<20x512xf32>,
    %c511_i32_37 = arith.constant 511 : i32
    %60 = tpu.dynamic_rotate %58 by %c511_i32_37 dim 1 : vector<20x512xf32>, i32 -> vector<20x512xf32>
    %c20_38 = arith.constant 20 : index
    %c0_39 = arith.constant 0 : index
    %61 = vector.load %arg8[%c20_38, %c0_39] : memref<500x512xf32, #tpu.memory_space<vmem>>, vector<20x512xf32>
    tpu.vector_store %arg8[%c20_38, %c0_39], %60 {strides = array<i32>} : memref<500x512xf32, #tpu.memory_space<vmem>>, vector<20x512xf32>,
    %c510_i32_40 = arith.constant 510 : i32
    %62 = tpu.dynamic_rotate %58 by %c510_i32_40 dim 1 : vector<20x512xf32>, i32 -> vector<20x512xf32>
    %c40 = arith.constant 40 : index
    %c0_41 = arith.constant 0 : index
    %63 = vector.load %arg8[%c40, %c0_41] : memref<500x512xf32, #tpu.memory_space<vmem>>, vector<20x512xf32>
    tpu.vector_store %arg8[%c40, %c0_41], %62 {strides = array<i32>} : memref<500x512xf32, #tpu.memory_space<vmem>>, vector<20x512xf32>,
    %c509_i32_42 = arith.constant 509 : i32
    %64 = tpu.dynamic_rotate %58 by %c509_i32_42 dim 1 : vector<20x512xf32>, i32 -> vector<20x512xf32>
    %c60 = arith.constant 60 : index
    %c0_43 = arith.constant 0 : index
    %65 = vector.load %arg8[%c60, %c0_43] : memref<500x512xf32, #tpu.memory_space<vmem>>, vector<20x512xf32>
    tpu.vector_store %arg8[%c60, %c0_43], %64 {strides = array<i32>} : memref<500x512xf32, #tpu.memory_space<vmem>>, vector<20x512xf32>,
    %c508_i32_44 = arith.constant 508 : i32
    %66 = tpu.dynamic_rotate %58 by %c508_i32_44 dim 1 : vector<20x512xf32>, i32 -> vector<20x512xf32>
    %c80 = arith.constant 80 : index
    %c0_45 = arith.constant 0 : index
    %67 = vector.load %arg8[%c80, %c0_45] : memref<500x512xf32, #tpu.memory_space<vmem>>, vector<20x512xf32>
    tpu.vector_store %arg8[%c80, %c0_45], %66 {strides = array<i32>} : memref<500x512xf32, #tpu.memory_space<vmem>>, vector<20x512xf32>,
    %c496_i32_46 = arith.constant 496 : i32
    %68 = tpu.dynamic_rotate %58 by %c496_i32_46 dim 1 : vector<20x512xf32>, i32 -> vector<20x512xf32>
    %c100 = arith.constant 100 : index
    %c0_47 = arith.constant 0 : index
    %69 = vector.load %arg8[%c100, %c0_47] : memref<500x512xf32, #tpu.memory_space<vmem>>, vector<20x512xf32>
    tpu.vector_store %arg8[%c100, %c0_47], %68 {strides = array<i32>} : memref<500x512xf32, #tpu.memory_space<vmem>>, vector<20x512xf32>,
    %c495_i32_48 = arith.constant 495 : i32
    %70 = tpu.dynamic_rotate %58 by %c495_i32_48 dim 1 : vector<20x512xf32>, i32 -> vector<20x512xf32>
    %c120 = arith.constant 120 : index
    %c0_49 = arith.constant 0 : index
    %71 = vector.load %arg8[%c120, %c0_49] : memref<500x512xf32, #tpu.memory_space<vmem>>, vector<20x512xf32>
    tpu.vector_store %arg8[%c120, %c0_49], %70 {strides = array<i32>} : memref<500x512xf32, #tpu.memory_space<vmem>>, vector<20x512xf32>,
    %c494_i32_50 = arith.constant 494 : i32
    %72 = tpu.dynamic_rotate %58 by %c494_i32_50 dim 1 : vector<20x512xf32>, i32 -> vector<20x512xf32>
    %c140 = arith.constant 140 : index
    %c0_51 = arith.constant 0 : index
    %73 = vector.load %arg8[%c140, %c0_51] : memref<500x512xf32, #tpu.memory_space<vmem>>, vector<20x512xf32>
    tpu.vector_store %arg8[%c140, %c0_51], %72 {strides = array<i32>} : memref<500x512xf32, #tpu.memory_space<vmem>>, vector<20x512xf32>,
    %c493_i32_52 = arith.constant 493 : i32
    %74 = tpu.dynamic_rotate %58 by %c493_i32_52 dim 1 : vector<20x512xf32>, i32 -> vector<20x512xf32>
    %c160 = arith.constant 160 : index
    %c0_53 = arith.constant 0 : index
    %75 = vector.load %arg8[%c160, %c0_53] : memref<500x512xf32, #tpu.memory_space<vmem>>, vector<20x512xf32>
    tpu.vector_store %arg8[%c160, %c0_53], %74 {strides = array<i32>} : memref<500x512xf32, #tpu.memory_space<vmem>>, vector<20x512xf32>,
    %c492_i32_54 = arith.constant 492 : i32
    %76 = tpu.dynamic_rotate %58 by %c492_i32_54 dim 1 : vector<20x512xf32>, i32 -> vector<20x512xf32>
    %c180 = arith.constant 180 : index
    %c0_55 = arith.constant 0 : index
    %77 = vector.load %arg8[%c180, %c0_55] : memref<500x512xf32, #tpu.memory_space<vmem>>, vector<20x512xf32>
    tpu.vector_store %arg8[%c180, %c0_55], %76 {strides = array<i32>} : memref<500x512xf32, #tpu.memory_space<vmem>>, vector<20x512xf32>,
    %c480_i32_56 = arith.constant 480 : i32
    %78 = tpu.dynamic_rotate %58 by %c480_i32_56 dim 1 : vector<20x512xf32>, i32 -> vector<20x512xf32>
    %c200 = arith.constant 200 : index
    %c0_57 = arith.constant 0 : index
    %79 = vector.load %arg8[%c200, %c0_57] : memref<500x512xf32, #tpu.memory_space<vmem>>, vector<20x512xf32>
    tpu.vector_store %arg8[%c200, %c0_57], %78 {strides = array<i32>} : memref<500x512xf32, #tpu.memory_space<vmem>>, vector<20x512xf32>,
    %c479_i32_58 = arith.constant 479 : i32
    %80 = tpu.dynamic_rotate %58 by %c479_i32_58 dim 1 : vector<20x512xf32>, i32 -> vector<20x512xf32>
    %c220 = arith.constant 220 : index
    %c0_59 = arith.constant 0 : index
    %81 = vector.load %arg8[%c220, %c0_59] : memref<500x512xf32, #tpu.memory_space<vmem>>, vector<20x512xf32>
    tpu.vector_store %arg8[%c220, %c0_59], %80 {strides = array<i32>} : memref<500x512xf32, #tpu.memory_space<vmem>>, vector<20x512xf32>,
    %c478_i32_60 = arith.constant 478 : i32
    %82 = tpu.dynamic_rotate %58 by %c478_i32_60 dim 1 : vector<20x512xf32>, i32 -> vector<20x512xf32>
    %c240 = arith.constant 240 : index
    %c0_61 = arith.constant 0 : index
    %83 = vector.load %arg8[%c240, %c0_61] : memref<500x512xf32, #tpu.memory_space<vmem>>, vector<20x512xf32>
    tpu.vector_store %arg8[%c240, %c0_61], %82 {strides = array<i32>} : memref<500x512xf32, #tpu.memory_space<vmem>>, vector<20x512xf32>,
    %c477_i32_62 = arith.constant 477 : i32
    %84 = tpu.dynamic_rotate %58 by %c477_i32_62 dim 1 : vector<20x512xf32>, i32 -> vector<20x512xf32>
    %c260 = arith.constant 260 : index
    %c0_63 = arith.constant 0 : index
    %85 = vector.load %arg8[%c260, %c0_63] : memref<500x512xf32, #tpu.memory_space<vmem>>, vector<20x512xf32>
    tpu.vector_store %arg8[%c260, %c0_63], %84 {strides = array<i32>} : memref<500x512xf32, #tpu.memory_space<vmem>>, vector<20x512xf32>,
    %c476_i32_64 = arith.constant 476 : i32
    %86 = tpu.dynamic_rotate %58 by %c476_i32_64 dim 1 : vector<20x512xf32>, i32 -> vector<20x512xf32>
    %c280 = arith.constant 280 : index
    %c0_65 = arith.constant 0 : index
    %87 = vector.load %arg8[%c280, %c0_65] : memref<500x512xf32, #tpu.memory_space<vmem>>, vector<20x512xf32>
    tpu.vector_store %arg8[%c280, %c0_65], %86 {strides = array<i32>} : memref<500x512xf32, #tpu.memory_space<vmem>>, vector<20x512xf32>,
    %c464_i32_66 = arith.constant 464 : i32
    %88 = tpu.dynamic_rotate %58 by %c464_i32_66 dim 1 : vector<20x512xf32>, i32 -> vector<20x512xf32>
    %c300 = arith.constant 300 : index
    %c0_67 = arith.constant 0 : index
    %89 = vector.load %arg8[%c300, %c0_67] : memref<500x512xf32, #tpu.memory_space<vmem>>, vector<20x512xf32>
    tpu.vector_store %arg8[%c300, %c0_67], %88 {strides = array<i32>} : memref<500x512xf32, #tpu.memory_space<vmem>>, vector<20x512xf32>,
    %c463_i32_68 = arith.constant 463 : i32
    %90 = tpu.dynamic_rotate %58 by %c463_i32_68 dim 1 : vector<20x512xf32>, i32 -> vector<20x512xf32>
    %c320 = arith.constant 320 : index
    %c0_69 = arith.constant 0 : index
    %91 = vector.load %arg8[%c320, %c0_69] : memref<500x512xf32, #tpu.memory_space<vmem>>, vector<20x512xf32>
    tpu.vector_store %arg8[%c320, %c0_69], %90 {strides = array<i32>} : memref<500x512xf32, #tpu.memory_space<vmem>>, vector<20x512xf32>,
    %c462_i32_70 = arith.constant 462 : i32
    %92 = tpu.dynamic_rotate %58 by %c462_i32_70 dim 1 : vector<20x512xf32>, i32 -> vector<20x512xf32>
    %c340 = arith.constant 340 : index
    %c0_71 = arith.constant 0 : index
    %93 = vector.load %arg8[%c340, %c0_71] : memref<500x512xf32, #tpu.memory_space<vmem>>, vector<20x512xf32>
    tpu.vector_store %arg8[%c340, %c0_71], %92 {strides = array<i32>} : memref<500x512xf32, #tpu.memory_space<vmem>>, vector<20x512xf32>,
    %c461_i32_72 = arith.constant 461 : i32
    %94 = tpu.dynamic_rotate %58 by %c461_i32_72 dim 1 : vector<20x512xf32>, i32 -> vector<20x512xf32>
    %c360 = arith.constant 360 : index
    %c0_73 = arith.constant 0 : index
    %95 = vector.load %arg8[%c360, %c0_73] : memref<500x512xf32, #tpu.memory_space<vmem>>, vector<20x512xf32>
    tpu.vector_store %arg8[%c360, %c0_73], %94 {strides = array<i32>} : memref<500x512xf32, #tpu.memory_space<vmem>>, vector<20x512xf32>,
    %c460_i32_74 = arith.constant 460 : i32
    %96 = tpu.dynamic_rotate %58 by %c460_i32_74 dim 1 : vector<20x512xf32>, i32 -> vector<20x512xf32>
    %c380 = arith.constant 380 : index
    %c0_75 = arith.constant 0 : index
    %97 = vector.load %arg8[%c380, %c0_75] : memref<500x512xf32, #tpu.memory_space<vmem>>, vector<20x512xf32>
    tpu.vector_store %arg8[%c380, %c0_75], %96 {strides = array<i32>} : memref<500x512xf32, #tpu.memory_space<vmem>>, vector<20x512xf32>,
    %c448_i32_76 = arith.constant 448 : i32
    %98 = tpu.dynamic_rotate %58 by %c448_i32_76 dim 1 : vector<20x512xf32>, i32 -> vector<20x512xf32>
    %c400 = arith.constant 400 : index
    %c0_77 = arith.constant 0 : index
    %99 = vector.load %arg8[%c400, %c0_77] : memref<500x512xf32, #tpu.memory_space<vmem>>, vector<20x512xf32>
    tpu.vector_store %arg8[%c400, %c0_77], %98 {strides = array<i32>} : memref<500x512xf32, #tpu.memory_space<vmem>>, vector<20x512xf32>,
    %c447_i32_78 = arith.constant 447 : i32
    %100 = tpu.dynamic_rotate %58 by %c447_i32_78 dim 1 : vector<20x512xf32>, i32 -> vector<20x512xf32>
    %c420 = arith.constant 420 : index
    %c0_79 = arith.constant 0 : index
    %101 = vector.load %arg8[%c420, %c0_79] : memref<500x512xf32, #tpu.memory_space<vmem>>, vector<20x512xf32>
    tpu.vector_store %arg8[%c420, %c0_79], %100 {strides = array<i32>} : memref<500x512xf32, #tpu.memory_space<vmem>>, vector<20x512xf32>,
    %c446_i32_80 = arith.constant 446 : i32
    %102 = tpu.dynamic_rotate %58 by %c446_i32_80 dim 1 : vector<20x512xf32>, i32 -> vector<20x512xf32>
    %c440 = arith.constant 440 : index
    %c0_81 = arith.constant 0 : index
    %103 = vector.load %arg8[%c440, %c0_81] : memref<500x512xf32, #tpu.memory_space<vmem>>, vector<20x512xf32>
    tpu.vector_store %arg8[%c440, %c0_81], %102 {strides = array<i32>} : memref<500x512xf32, #tpu.memory_space<vmem>>, vector<20x512xf32>,
    %c445_i32_82 = arith.constant 445 : i32
    %104 = tpu.dynamic_rotate %58 by %c445_i32_82 dim 1 : vector<20x512xf32>, i32 -> vector<20x512xf32>
    %c460 = arith.constant 460 : index
    %c0_83 = arith.constant 0 : index
    %105 = vector.load %arg8[%c460, %c0_83] : memref<500x512xf32, #tpu.memory_space<vmem>>, vector<20x512xf32>
    tpu.vector_store %arg8[%c460, %c0_83], %104 {strides = array<i32>} : memref<500x512xf32, #tpu.memory_space<vmem>>, vector<20x512xf32>,
    %c444_i32_84 = arith.constant 444 : i32
    %106 = tpu.dynamic_rotate %58 by %c444_i32_84 dim 1 : vector<20x512xf32>, i32 -> vector<20x512xf32>
    %c480 = arith.constant 480 : index
    %c0_85 = arith.constant 0 : index
    %107 = vector.load %arg8[%c480, %c0_85] : memref<500x512xf32, #tpu.memory_space<vmem>>, vector<20x512xf32>
    tpu.vector_store %arg8[%c480, %c0_85], %106 {strides = array<i32>} : memref<500x512xf32, #tpu.memory_space<vmem>>, vector<20x512xf32>,
    %c0_86 = arith.constant 0 : index
    %c0_87 = arith.constant 0 : index
    %108 = vector.load %arg4[%c0_86, %c0_87] : memref<50x500xf32, #tpu.memory_space<vmem>>, vector<50x500xf32>
    %c0_88 = arith.constant 0 : index
    %c0_89 = arith.constant 0 : index
    %109 = vector.load %arg8[%c0_88, %c0_89] : memref<500x512xf32, #tpu.memory_space<vmem>>, vector<500x512xf32>
    %cst_90 = arith.constant dense<0.000000e+00> : vector<50x512xf32>
    %110 = tpu.matmul %108, %109, %cst_90 {dimension_numbers = #tpu.dot_dimension_numbers<[1], [0], [0], [1], [0, 0, 1, 1], [], []>} : vector<50x500xf32>, vector<500x512xf32>, vector<50x512xf32> -> vector<50x512xf32>
    %c0_91 = arith.constant 0 : index
    %c0_92 = arith.constant 0 : index
    %111 = vector.load %arg5[%c0_91, %c0_92] : memref<50x1xf32, #tpu.memory_space<vmem>>, vector<50x1xf32>
    %112 = vector.broadcast %111 : vector<50x1xf32> to vector<50x512xf32>
    %113 = arith.addf %110, %112 : vector<50x512xf32>
    %cst_93 = arith.constant 0.000000e+00 : f32
    %114 = vector.broadcast %cst_93 : f32 to vector<50x512xf32>
    %115 = arith.maximumf %113, %114 : vector<50x512xf32>
    %c0_94 = arith.constant 0 : index
    %c0_95 = arith.constant 0 : index
    %c0_96 = arith.constant 0 : index
    %116 = vector.load %arg6[%c0_94, %c0_95, %c0_96] : memref<1x50x512xf32, #tpu.memory_space<vmem>>, vector<1x50x512xf32>
    %117 = vector.shape_cast %116 : vector<1x50x512xf32> to vector<50x512xf32>
    %118 = vector.shape_cast %115 : vector<50x512xf32> to vector<1x50x512xf32>
    tpu.vector_store %arg6[%c0_94, %c0_95, %c0_96], %118 {strides = array<i32>} : memref<1x50x512xf32, #tpu.memory_space<vmem>>, vector<1x50x512xf32>,
    return
  }
  func.func @transform_0(%arg0: i32) -> (i32, i32, i32) {
    %c0_i32 = arith.constant 0 : i32
    %c0_i32_0 = arith.constant 0 : i32
    %c0_i32_1 = arith.constant 0 : i32
    return %arg0, %c0_i32, %c0_i32_0 : i32, i32, i32
  }
  func.func @transform_1(%arg0: i32) -> (i32, i32) {
    %c0_i32 = arith.constant 0 : i32
    %c0_i32_0 = arith.constant 0 : i32
    %c0_i32_1 = arith.constant 0 : i32
    return %c0_i32, %c0_i32_0 : i32, i32
  }
  func.func @transform_2(%arg0: i32) -> (i32, i32) {
    %c0_i32 = arith.constant 0 : i32
    %c0_i32_0 = arith.constant 0 : i32
    %c0_i32_1 = arith.constant 0 : i32
    return %c0_i32, %c0_i32_0 : i32, i32
  }
  func.func @transform_3(%arg0: i32) -> (i32, i32) {
    %c0_i32 = arith.constant 0 : i32
    %c0_i32_0 = arith.constant 0 : i32
    %c0_i32_1 = arith.constant 0 : i32
    return %c0_i32, %c0_i32_0 : i32, i32
  }
  func.func @transform_4(%arg0: i32) -> (i32, i32) {
    %c0_i32 = arith.constant 0 : i32
    %c0_i32_0 = arith.constant 0 : i32
    %c0_i32_1 = arith.constant 0 : i32
    return %c0_i32, %c0_i32_0 : i32, i32
  }
  func.func @transform_5(%arg0: i32) -> (i32, i32, i32) {
    %c0_i32 = arith.constant 0 : i32
    %c0_i32_0 = arith.constant 0 : i32
    %c0_i32_1 = arith.constant 0 : i32
    return %arg0, %c0_i32, %c0_i32_0 : i32, i32, i32
  }
}

</mosaic_0001>

<bundles_post_ra>
// kernel: cnn_model_forward.1
= control target key start
LH: loop header
LB: loop body
LE: loop exit
PB: predicated region body
PF: predicated region fallthrough
CT: control target
= control target key end

     0   :  { %v21_v0 = vlaneseq  ;;  %s4304_s20 = smov 126   ;;  %s4305_s21 = smov 125   ;;  %v4317_v12 = vmov 1966171168   ;;  %s6951_s0 = inlined_call_operand.vmem [shape: f32[1,1,512], index: 0, kind: input, shape index: {}]   ;;  %s6952_s2 = inlined_call_operand.vmem [shape: f32[20,1], index: 2, kind: input, shape index: {}]   ;;  %s6953_s1 = inlined_call_operand.vmem [shape: f32[20,25], index: 1, kind: input, shape index: {}]   ;;  %s6954_s3 = inlined_call_operand.vmem [shape: f32[50,500], index: 3, kind: input, shape index: {}]   ;;  %s6955_s4 = inlined_call_operand.vmem [shape: f32[50,1], index: 4, kind: input, shape index: {}]   ;;  %s6956_s5 = inlined_call_operand.vmem [shape: f32[1,50,512], index: 5, kind: output, shape index: {}]  }
   0x1   :  { %v20_v1 = vld [vmem:[%s6951_s0] sm:$0xf]  ;;  %s4303_s0 = smov 127   ;;  %s4306_s22 = smov 124   ;;  %v70_v13 = vunpack.c.l.s4 %v4317_v12 }
   0x2   :  { %v4365_v2 = vshrl.u32 %v21_v0, 7  ;;  %vm4368_vm0 = vcmp.lt.s32.totalorder %v21_v0, 512  ;;  %s4307_s23 = smov 112   ;;  %s4308_s24 = smov 111   ;;  %v4499_v14 = vand.u32 127, %v21_v0  ;;  %v1130_v3 = vld [vmem:[%s6953_s1] sm:$0xff] }
   0x3   :  { %25 = vst.msk [vmem:[#allocation2] ss:$8 sm:$0xf] %vm4368_vm0, %v20_v1  ;;  %s4309_s25 = smov 110   ;;  %s4310_s26 = smov 109   ;;  %v71_v15 = vunpack.c.0.s8 %v70_v13 }
   0x4   :  { %v38_v4 = vsub.s32 2, %v4365_v2  ;;  %v30_v5 = vsub.s32 0, %v4365_v2  ;;  %v42_v6 = vsub.s32 3, %v4365_v2  ;;  %v34_v7 = vsub.s32 1, %v4365_v2  ;;  %s4311_s27 = smov 108   ;;  %s4312_s28 = smov 96  }
   0x5   :  { %s4313_s29 = smov 95   ;;  %s4314_s30 = smov 94   ;;  %vm58_vm1 = vcmp.lt.s32.totalorder %v4499_v14, 127  ;;  %v4511_v18 = vsub.s32 %v71_v15, %v4365_v2  ;;  %vm103_vm2 = vcmp.lt.s32.totalorder %v4499_v14, 126  ;;  %vm148_vm3 = vcmp.lt.s32.totalorder %v4499_v14, 125 }
   0x6   :  { %v4378_v8 = vrot.slane %v20_v1, %v38_v4  ;;  %v4380_v9 = vrot.slane %v20_v1, %v30_v5  ;;  %v4386_v10 = vrot.slane %v20_v1, %v42_v6  ;;  %v4388_v11 = vrot.slane %v20_v1, %v34_v7  ;;  %s4315_s6 = smov 93   ;;  %s4316_s7 = smov 92  }
   0x7   :  { %s4318_s8 = smov 80   ;;  %s4319_s9 = smov 79   ;;  %vm193_vm4 = vcmp.lt.s32.totalorder %v4499_v14, 124  ;;  %vm238_vm5 = vcmp.lt.s32.totalorder %v4499_v14, 112  ;;  %vm283_vm6 = vcmp.lt.s32.totalorder %v4499_v14, 111  ;;  %vm328_vm7 = vcmp.lt.s32.totalorder %v4499_v14, 110 }
   0x8   :  { %52 = vrot.lane.b32.xlu1 %v4378_v8, %s4303_s0  ;;  %48 = vrot.lane.b32.xlu0 %v4380_v9, %s4303_s0  ;;  %s4320_s10 = smov 78   ;;  %s4321_s11 = smov 77   ;;  %vm373_vm8 = vcmp.lt.s32.totalorder %v4499_v14, 109  ;;  %vm418_vm9 = vcmp.lt.s32.totalorder %v4499_v14, 108  ;;  %vm463_vm10 = vcmp.lt.s32.totalorder %v4499_v14, 96  ;;  %vm508_vm11 = vcmp.lt.s32.totalorder %v4499_v14, 95 }
   0x9   :  { %s4322_s12 = smov 76   ;;  %s4323_s13 = smov 64   ;;  %vm6976_vm12 = vcmp.lt.s32.totalorder %v4499_v14, 94  ;;  %vm6975_vm13 = vcmp.lt.s32.totalorder %v4499_v14, 93  ;;  %vm6965_vm14 = vcmp.lt.s32.totalorder %v4499_v14, 92  ;;  %vm6966_vm15 = vcmp.lt.s32.totalorder %v4499_v14, 80 }
   0xa   :  { %s6963_s14 = smov 63   ;;  %s6961_s15 = smov 62  }
   0xb   :  { %s6959_s16 = smov 61   ;;  %s6957_s17 = smov 60  }
   0xc   :  { %54 = vrot.lane.b32.xlu1 %v4386_v10, %s4303_s0  ;;  %50 = vrot.lane.b32.xlu0 %v4388_v11, %s4303_s0 }
  0x10   :  { %97 = vrot.lane.b32.xlu1 %v4388_v11, %s4304_s20  ;;  %95 = vrot.lane.b32.xlu0 %v4380_v9, %s4304_s20 }
  0x14   :  { %101 = vrot.lane.b32.xlu1 %v4386_v10, %s4304_s20  ;;  %99 = vrot.lane.b32.xlu0 %v4378_v8, %s4304_s20 }
  0x18   :  { %142 = vrot.lane.b32.xlu1 %v4388_v11, %s4305_s21  ;;  %140 = vrot.lane.b32.xlu0 %v4380_v9, %s4305_s21 }
  0x1c   :  { %146 = vrot.lane.b32.xlu1 %v4386_v10, %s4305_s21  ;;  %144 = vrot.lane.b32.xlu0 %v4378_v8, %s4305_s21 }
  0x20   :  { %187 = vrot.lane.b32.xlu1 %v4388_v11, %s4306_s22  ;;  %185 = vrot.lane.b32.xlu0 %v4380_v9, %s4306_s22 }
  0x24   :  { %191 = vrot.lane.b32.xlu1 %v4386_v10, %s4306_s22  ;;  %189 = vrot.lane.b32.xlu0 %v4378_v8, %s4306_s22 }
  0x28   :  { %232 = vrot.lane.b32.xlu1 %v4388_v11, %s4307_s23  ;;  %230 = vrot.lane.b32.xlu0 %v4380_v9, %s4307_s23 }
  0x2c   :  { %236 = vrot.lane.b32.xlu1 %v4386_v10, %s4307_s23  ;;  %234 = vrot.lane.b32.xlu0 %v4378_v8, %s4307_s23 }
  0x30   :  { %277 = vrot.lane.b32.xlu1 %v4388_v11, %s4308_s24  ;;  %275 = vrot.lane.b32.xlu0 %v4380_v9, %s4308_s24 }
  0x34   :  { %281 = vrot.lane.b32.xlu1 %v4386_v10, %s4308_s24  ;;  %279 = vrot.lane.b32.xlu0 %v4378_v8, %s4308_s24 }
  0x38   :  { %322 = vrot.lane.b32.xlu1 %v4388_v11, %s4309_s25  ;;  %320 = vrot.lane.b32.xlu0 %v4380_v9, %s4309_s25 }
  0x3c   :  { %326 = vrot.lane.b32.xlu1 %v4386_v10, %s4309_s25  ;;  %324 = vrot.lane.b32.xlu0 %v4378_v8, %s4309_s25 }
  0x40   :  { %367 = vrot.lane.b32.xlu1 %v4388_v11, %s4310_s26  ;;  %365 = vrot.lane.b32.xlu0 %v4380_v9, %s4310_s26 }
  0x44   :  { %371 = vrot.lane.b32.xlu1 %v4386_v10, %s4310_s26  ;;  %369 = vrot.lane.b32.xlu0 %v4378_v8, %s4310_s26 }
  0x48   :  { %412 = vrot.lane.b32.xlu1 %v4388_v11, %s4311_s27  ;;  %410 = vrot.lane.b32.xlu0 %v4380_v9, %s4311_s27 }
  0x4c   :  { %416 = vrot.lane.b32.xlu1 %v4386_v10, %s4311_s27  ;;  %414 = vrot.lane.b32.xlu0 %v4378_v8, %s4311_s27 }
  0x50   :  { %457 = vrot.lane.b32.xlu1 %v4388_v11, %s4312_s28  ;;  %455 = vrot.lane.b32.xlu0 %v4380_v9, %s4312_s28 }
  0x54   :  { %461 = vrot.lane.b32.xlu1 %v4386_v10, %s4312_s28  ;;  %459 = vrot.lane.b32.xlu0 %v4378_v8, %s4312_s28 }
  0x58   :  { %502 = vrot.lane.b32.xlu1 %v4388_v11, %s4313_s29  ;;  %500 = vrot.lane.b32.xlu0 %v4380_v9, %s4313_s29 }
  0x5c   :  { %506 = vrot.lane.b32.xlu1 %v4386_v10, %s4313_s29  ;;  %504 = vrot.lane.b32.xlu0 %v4378_v8, %s4313_s29 }
  0x60   :  { %547 = vrot.lane.b32.xlu1 %v4388_v11, %s4314_s30  ;;  %545 = vrot.lane.b32.xlu0 %v4380_v9, %s4314_s30 }
  0x64   :  { %551 = vrot.lane.b32.xlu1 %v4386_v10, %s4314_s30  ;;  %549 = vrot.lane.b32.xlu0 %v4378_v8, %s4314_s30 }
  0x68   :  { %592 = vrot.lane.b32.xlu1 %v4388_v11, %s4315_s6  ;;  %590 = vrot.lane.b32.xlu0 %v4380_v9, %s4315_s6 }
  0x6c   :  { %596 = vrot.lane.b32.xlu1 %v4386_v10, %s4315_s6  ;;  %594 = vrot.lane.b32.xlu0 %v4378_v8, %s4315_s6 }
  0x70   :  { %637 = vrot.lane.b32.xlu1 %v4388_v11, %s4316_s7  ;;  %635 = vrot.lane.b32.xlu0 %v4380_v9, %s4316_s7 }
  0x74   :  { %641 = vrot.lane.b32.xlu1 %v4386_v10, %s4316_s7  ;;  %639 = vrot.lane.b32.xlu0 %v4378_v8, %s4316_s7 }
  0x78   :  { %682 = vrot.lane.b32.xlu1 %v4388_v11, %s4318_s8  ;;  %680 = vrot.lane.b32.xlu0 %v4380_v9, %s4318_s8 }
  0x7a   :  { %v53_v16 = vpop.permute.xlu1 %52  ;;  %v49_v17 = vpop.permute.xlu0 %48 }
  0x7c   :  { %686 = vrot.lane.b32.xlu1 %v4386_v10, %s4318_s8  ;;  %684 = vrot.lane.b32.xlu0 %v4378_v8, %s4318_s8 }
  0x7e   :  { %v55_v19 = vpop.permute.xlu1 %54  ;;  %v51_v20 = vpop.permute.xlu0 %50 }
  0x7f   :  { %v59_v21 = vsel %vm58_vm1, %v53_v16, %v55_v19  ;;  %v62_v22 = vsel %vm58_vm1, %v55_v19, %v49_v17  ;;  %v60_v23 = vsel %vm58_vm1, %v51_v20, %v53_v16  ;;  %v61_v24 = vsel %vm58_vm1, %v49_v17, %v51_v20 }
  0x80   :  { %v68_v25 = vcombine.low %v59_v21, %v62_v22  ;;  %v67_v26 = vcombine.low %v61_v24, %v60_v23  ;;  %727 = vrot.lane.b32.xlu1 %v4388_v11, %s4319_s9  ;;  %725 = vrot.lane.b32.xlu0 %v4380_v9, %s4319_s9 }
  0x82   :  { %v82_v27 = vrot.slane %v68_v25, %v4511_v18  ;;  %v75_v28 = vrot.slane %v67_v26, %v4511_v18  ;;  %v98_v29 = vpop.permute.xlu1 %97  ;;  %v96_v30 = vpop.permute.xlu0 %95 }
  0x83   :  { %v106_v35 = vsel %vm103_vm2, %v96_v30, %v98_v29 }
  0x84   :  { %v83_v31 = vcombine.low %v75_v28, %v82_v27  ;;  %731 = vrot.lane.b32.xlu1 %v4386_v10, %s4319_s9  ;;  %729 = vrot.lane.b32.xlu0 %v4378_v8, %s4319_s9 }
  0x86   :  { %v90_v32 = vrot.slane %v83_v31, %v4511_v18  ;;  %v102_v33 = vpop.permute.xlu1 %101  ;;  %v100_v34 = vpop.permute.xlu0 %99 }
  0x87   :  { %v107_v36 = vsel %vm103_vm2, %v102_v33, %v96_v30  ;;  %v104_v37 = vsel %vm103_vm2, %v100_v34, %v102_v33  ;;  %v105_v38 = vsel %vm103_vm2, %v98_v29, %v100_v34 }
  0x88   :  { %93 = vst.msk [vmem:[#allocation2 + $0x1] ss:$8 sm:$0xf] %vm4368_vm0, %v90_v32  ;;  %v112_v39 = vcombine.low %v106_v35, %v105_v38  ;;  %v113_v40 = vcombine.low %v104_v37, %v107_v36  ;;  %772 = vrot.lane.b32.xlu1 %v4388_v11, %s4320_s10  ;;  %770 = vrot.lane.b32.xlu0 %v4380_v9, %s4320_s10 }
  0x8a   :  { %v120_v41 = vrot.slane %v112_v39, %v4511_v18  ;;  %v127_v42 = vrot.slane %v113_v40, %v4511_v18  ;;  %v143_v43 = vpop.permute.xlu1 %142  ;;  %v141_v44 = vpop.permute.xlu0 %140 }
  0x8b   :  { %v151_v49 = vsel %vm148_vm3, %v141_v44, %v143_v43 }
  0x8c   :  { %v128_v45 = vcombine.low %v120_v41, %v127_v42  ;;  %776 = vrot.lane.b32.xlu1 %v4386_v10, %s4320_s10  ;;  %774 = vrot.lane.b32.xlu0 %v4378_v8, %s4320_s10 }
  0x8e   :  { %v135_v46 = vrot.slane %v128_v45, %v4511_v18  ;;  %v147_v47 = vpop.permute.xlu1 %146  ;;  %v145_v48 = vpop.permute.xlu0 %144 }
  0x8f   :  { %v152_v50 = vsel %vm148_vm3, %v147_v47, %v141_v44  ;;  %v149_v51 = vsel %vm148_vm3, %v145_v48, %v147_v47  ;;  %v150_v52 = vsel %vm148_vm3, %v143_v43, %v145_v48 }
  0x90   :  { %138 = vst.msk [vmem:[#allocation2 + $0x2] ss:$8 sm:$0xf] %vm4368_vm0, %v135_v46  ;;  %v157_v53 = vcombine.low %v151_v49, %v150_v52  ;;  %v158_v54 = vcombine.low %v149_v51, %v152_v50  ;;  %817 = vrot.lane.b32.xlu1 %v4388_v11, %s4321_s11  ;;  %815 = vrot.lane.b32.xlu0 %v4380_v9, %s4321_s11 }
  0x92   :  { %v165_v55 = vrot.slane %v157_v53, %v4511_v18  ;;  %v172_v56 = vrot.slane %v158_v54, %v4511_v18  ;;  %v188_v57 = vpop.permute.xlu1 %187  ;;  %v186_v58 = vpop.permute.xlu0 %185 }
  0x93   :  { %v196_v63 = vsel %vm193_vm4, %v186_v58, %v188_v57 }
  0x94   :  { %v173_v59 = vcombine.low %v165_v55, %v172_v56  ;;  %821 = vrot.lane.b32.xlu1 %v4386_v10, %s4321_s11  ;;  %819 = vrot.lane.b32.xlu0 %v4378_v8, %s4321_s11 }
  0x96   :  { %v180_v60 = vrot.slane %v173_v59, %v4511_v18  ;;  %v192_v61 = vpop.permute.xlu1 %191  ;;  %v190_v62 = vpop.permute.xlu0 %189 }
  0x97   :  { %v197_v0 = vsel %vm193_vm4, %v192_v61, %v186_v58  ;;  %v194_v1 = vsel %vm193_vm4, %v190_v62, %v192_v61  ;;  %v195_v2 = vsel %vm193_vm4, %v188_v57, %v190_v62 }
  0x98   :  { %183 = vst.msk [vmem:[#allocation2 + $0x3] ss:$8 sm:$0xf] %vm4368_vm0, %v180_v60  ;;  %v202_v4 = vcombine.low %v196_v63, %v195_v2  ;;  %v203_v5 = vcombine.low %v194_v1, %v197_v0  ;;  %862 = vrot.lane.b32.xlu1 %v4388_v11, %s4322_s12  ;;  %860 = vrot.lane.b32.xlu0 %v4380_v9, %s4322_s12 }
  0x9a   :  { %v210_v6 = vrot.slane %v202_v4, %v4511_v18  ;;  %v217_v7 = vrot.slane %v203_v5, %v4511_v18  ;;  %v233_v12 = vpop.permute.xlu1 %232  ;;  %v231_v13 = vpop.permute.xlu0 %230 }
  0x9b   :  { %v241_v20 = vsel %vm238_vm5, %v231_v13, %v233_v12 }
  0x9c   :  { %v218_v15 = vcombine.low %v210_v6, %v217_v7  ;;  %866 = vrot.lane.b32.xlu1 %v4386_v10, %s4322_s12  ;;  %864 = vrot.lane.b32.xlu0 %v4378_v8, %s4322_s12 }
  0x9e   :  { %v225_v16 = vrot.slane %v218_v15, %v4511_v18  ;;  %v237_v17 = vpop.permute.xlu1 %236  ;;  %v235_v19 = vpop.permute.xlu0 %234 }
  0x9f   :  { %v242_v21 = vsel %vm238_vm5, %v237_v17, %v231_v13  ;;  %v239_v22 = vsel %vm238_vm5, %v235_v19, %v237_v17  ;;  %v240_v23 = vsel %vm238_vm5, %v233_v12, %v235_v19 }
  0xa0   :  { %228 = vst.msk [vmem:[#allocation2 + $0x4] ss:$8 sm:$0xf] %vm4368_vm0, %v225_v16  ;;  %v247_v24 = vcombine.low %v241_v20, %v240_v23  ;;  %v248_v25 = vcombine.low %v239_v22, %v242_v21  ;;  %907 = vrot.lane.b32.xlu1 %v4388_v11, %s4323_s13  ;;  %905 = vrot.lane.b32.xlu0 %v4380_v9, %s4323_s13 }
  0xa2   :  { %v255_v26 = vrot.slane %v247_v24, %v4511_v18  ;;  %v262_v27 = vrot.slane %v248_v25, %v4511_v18  ;;  %v278_v28 = vpop.permute.xlu1 %277  ;;  %v276_v29 = vpop.permute.xlu0 %275 }
  0xa3   :  { %v286_v34 = vsel %vm283_vm6, %v276_v29, %v278_v28 }
  0xa4   :  { %v263_v30 = vcombine.low %v255_v26, %v262_v27  ;;  %911 = vrot.lane.b32.xlu1 %v4386_v10, %s4323_s13  ;;  %909 = vrot.lane.b32.xlu0 %v4378_v8, %s4323_s13 }
  0xa6   :  { %v270_v31 = vrot.slane %v263_v30, %v4511_v18  ;;  %v282_v32 = vpop.permute.xlu1 %281  ;;  %v280_v33 = vpop.permute.xlu0 %279 }
  0xa7   :  { %v287_v35 = vsel %vm283_vm6, %v282_v32, %v276_v29  ;;  %v284_v36 = vsel %vm283_vm6, %v280_v33, %v282_v32  ;;  %v285_v37 = vsel %vm283_vm6, %v278_v28, %v280_v33 }
  0xa8   :  { %273 = vst.msk [vmem:[#allocation2 + $0x5] ss:$8 sm:$0xf] %vm4368_vm0, %v270_v31  ;;  %v292_v38 = vcombine.low %v286_v34, %v285_v37  ;;  %v293_v39 = vcombine.low %v284_v36, %v287_v35  ;;  %952 = vrot.lane.b32.xlu1 %v4388_v11, %s6963_s14  ;;  %950 = vrot.lane.b32.xlu0 %v4380_v9, %s6963_s14 }
  0xaa   :  { %v300_v40 = vrot.slane %v292_v38, %v4511_v18  ;;  %v307_v41 = vrot.slane %v293_v39, %v4511_v18  ;;  %v323_v42 = vpop.permute.xlu1 %322  ;;  %v321_v43 = vpop.permute.xlu0 %320 }
  0xab   :  { %v331_v48 = vsel %vm328_vm7, %v321_v43, %v323_v42 }
  0xac   :  { %v308_v44 = vcombine.low %v300_v40, %v307_v41  ;;  %956 = vrot.lane.b32.xlu1 %v4386_v10, %s6963_s14  ;;  %954 = vrot.lane.b32.xlu0 %v4378_v8, %s6963_s14  ;;  %v4328_v40 = vmov 0.0  }
  0xad   :  { %1254 = vmatprep.mubr.f32.mxu0 %v4328_v40  ;;  %1337 = vmatprep.mubr.f32.mxu1 %v4328_v40 }
  0xae   :  { %v315_v45 = vrot.slane %v308_v44, %v4511_v18  ;;  %v327_v46 = vpop.permute.xlu1 %326  ;;  %v325_v47 = vpop.permute.xlu0 %324 }
  0xaf   :  { %v332_v49 = vsel %vm328_vm7, %v327_v46, %v321_v43  ;;  %v329_v50 = vsel %vm328_vm7, %v325_v47, %v327_v46  ;;  %v330_v51 = vsel %vm328_vm7, %v323_v42, %v325_v47 }
  0xb0   :  { %318 = vst.msk [vmem:[#allocation2 + $0x6] ss:$8 sm:$0xf] %vm4368_vm0, %v315_v45  ;;  %v337_v52 = vcombine.low %v331_v48, %v330_v51  ;;  %v338_v53 = vcombine.low %v329_v50, %v332_v49  ;;  %997 = vrot.lane.b32.xlu1 %v4388_v11, %s6961_s15  ;;  %995 = vrot.lane.b32.xlu0 %v4380_v9, %s6961_s15 }
  0xb2   :  { %v345_v54 = vrot.slane %v337_v52, %v4511_v18  ;;  %v352_v55 = vrot.slane %v338_v53, %v4511_v18  ;;  %v368_v56 = vpop.permute.xlu1 %367  ;;  %v366_v57 = vpop.permute.xlu0 %365 }
  0xb3   :  { %v376_v62 = vsel %vm373_vm8, %v366_v57, %v368_v56 }
  0xb4   :  { %v353_v58 = vcombine.low %v345_v54, %v352_v55  ;;  %1001 = vrot.lane.b32.xlu1 %v4386_v10, %s6961_s15  ;;  %999 = vrot.lane.b32.xlu0 %v4378_v8, %s6961_s15 }
  0xb6   :  { %v360_v59 = vrot.slane %v353_v58, %v4511_v18  ;;  %v372_v60 = vpop.permute.xlu1 %371  ;;  %v370_v61 = vpop.permute.xlu0 %369 }
  0xb7   :  { %v377_v63 = vsel %vm373_vm8, %v372_v60, %v366_v57  ;;  %v374_v0 = vsel %vm373_vm8, %v370_v61, %v372_v60  ;;  %v375_v1 = vsel %vm373_vm8, %v368_v56, %v370_v61 }
  0xb8   :  { %363 = vst.msk [vmem:[#allocation2 + $0x7] ss:$8 sm:$0xf] %vm4368_vm0, %v360_v59  ;;  %v382_v2 = vcombine.low %v376_v62, %v375_v1  ;;  %v383_v4 = vcombine.low %v374_v0, %v377_v63  ;;  %1042 = vrot.lane.b32.xlu1 %v4388_v11, %s6959_s16  ;;  %1040 = vrot.lane.b32.xlu0 %v4380_v9, %s6959_s16  ;;  %v4329_v62 = vmov 0   ;;  %v1149_v63 = vld [vmem:[%s6952_s2] sm:$0xff]  ;;  %v1150_v0 = vld [vmem:[%s6952_s2 + $0x8] sm:$0xff] }
  0xb9   :  { %4285 = vset.pattern.permute.xlu0 %v4329_v62  ;;  %4286 = vset.pattern.permute.xlu1 %v4329_v62 }
  0xba   :  { %v390_v5 = vrot.slane %v382_v2, %v4511_v18  ;;  %v397_v6 = vrot.slane %v383_v4, %v4511_v18  ;;  %v413_v7 = vpop.permute.xlu1 %412  ;;  %v411_v12 = vpop.permute.xlu0 %410  ;;  %v1151_v4 = vld [vmem:[%s6952_s2 + $0x10] sm:$0xf] }
  0xbb   :  { %v421_v19 = vsel %vm418_vm9, %v411_v12, %v413_v7 }
  0xbc   :  { %v398_v13 = vcombine.low %v390_v5, %v397_v6  ;;  %1046 = vrot.lane.b32.xlu1 %v4386_v10, %s6959_s16  ;;  %1044 = vrot.lane.b32.xlu0 %v4378_v8, %s6959_s16 }
  0xbe   :  { %v405_v15 = vrot.slane %v398_v13, %v4511_v18  ;;  %v417_v16 = vpop.permute.xlu1 %416  ;;  %v415_v17 = vpop.permute.xlu0 %414 }
  0xbf   :  { %v422_v20 = vsel %vm418_vm9, %v417_v16, %v411_v12  ;;  %v419_v21 = vsel %vm418_vm9, %v415_v17, %v417_v16  ;;  %v420_v22 = vsel %vm418_vm9, %v413_v7, %v415_v17 }
  0xc0   :  { %408 = vst.msk [vmem:[#allocation2 + $0x20] ss:$8 sm:$0xf] %vm4368_vm0, %v405_v15  ;;  %v427_v23 = vcombine.low %v421_v19, %v420_v22  ;;  %v428_v24 = vcombine.low %v419_v21, %v422_v20  ;;  %1087 = vrot.lane.b32.xlu1 %v4388_v11, %s6957_s17  ;;  %1085 = vrot.lane.b32.xlu0 %v4380_v9, %s6957_s17 }
  0xc2   :  { %v435_v25 = vrot.slane %v427_v23, %v4511_v18  ;;  %v442_v26 = vrot.slane %v428_v24, %v4511_v18  ;;  %v458_v27 = vpop.permute.xlu1 %457  ;;  %v456_v28 = vpop.permute.xlu0 %455 }
  0xc3   :  { %v466_v9 = vsel %vm463_vm10, %v456_v28, %v458_v27 }
  0xc4   :  { %v443_v29 = vcombine.low %v435_v25, %v442_v26  ;;  %1091 = vrot.lane.b32.xlu1 %v4386_v10, %s6957_s17  ;;  %1089 = vrot.lane.b32.xlu0 %v4378_v8, %s6957_s17 }
  0xc6   :  { %v450_v11 = vrot.slane %v443_v29, %v4511_v18  ;;  %v462_v30 = vpop.permute.xlu1 %461  ;;  %v460_v31 = vpop.permute.xlu0 %459 }
  0xc7   :  { %v467_v32 = vsel %vm463_vm10, %v462_v30, %v456_v28  ;;  %v464_v33 = vsel %vm463_vm10, %v460_v31, %v462_v30  ;;  %v465_v34 = vsel %vm463_vm10, %v458_v27, %v460_v31 }
  0xc8   :  { %453 = vst.msk [vmem:[#allocation2 + $0x21] ss:$8 sm:$0xf] %vm4368_vm0, %v450_v11  ;;  %v472_v8 = vcombine.low %v466_v9, %v465_v34  ;;  %v473_v10 = vcombine.low %v464_v33, %v467_v32  ;;  %1154 = vperm.xlu0 %4285, %v1149_v63   ;;  %1159 = vperm.xlu1 %4286, %v1150_v0  }
  0xca   :  { %v480_v35 = vrot.slane %v472_v8, %v4511_v18  ;;  %v487_v36 = vrot.slane %v473_v10, %v4511_v18  ;;  %v503_v37 = vpop.permute.xlu1 %502  ;;  %v501_v38 = vpop.permute.xlu0 %500 }
  0xcb   :  { %v511_v44 = vsel %vm508_vm11, %v501_v38, %v503_v37 }
  0xcc   :  { %v488_v39 = vcombine.low %v480_v35, %v487_v36  ;;  %1164 = vperm.xlu1 %4286, %v1151_v4  }
  0xce   :  { %v495_v41 = vrot.slane %v488_v39, %v4511_v18  ;;  %v507_v42 = vpop.permute.xlu1 %506  ;;  %v505_v43 = vpop.permute.xlu0 %504 }
  0xcf   :  { %v512_v45 = vsel %vm508_vm11, %v507_v42, %v501_v38  ;;  %v509_v46 = vsel %vm508_vm11, %v505_v43, %v507_v42  ;;  %v510_v47 = vsel %vm508_vm11, %v503_v37, %v505_v43 }
  0xd0   :  { %498 = vst.msk [vmem:[#allocation2 + $0x22] ss:$8 sm:$0xf] %vm4368_vm0, %v495_v41  ;;  %v517_v48 = vcombine.low %v511_v44, %v510_v47  ;;  %v518_v49 = vcombine.low %v509_v46, %v512_v45 }
  0xd2   :  { %v525_v50 = vrot.slane %v517_v48, %v4511_v18  ;;  %v532_v51 = vrot.slane %v518_v49, %v4511_v18  ;;  %v548_v52 = vpop.permute.xlu1 %547  ;;  %v546_v53 = vpop.permute.xlu0 %545 }
  0xd3   :  { %v556_v56 = vsel %vm6976_vm12, %v546_v53, %v548_v52 }
  0xd4   :  { %v533_v54 = vcombine.low %v525_v50, %v532_v51 }
  0xd6   :  { %v540_v55 = vrot.slane %v533_v54, %v4511_v18  ;;  %v552_v57 = vpop.permute.xlu1 %551  ;;  %v550_v58 = vpop.permute.xlu0 %549 }
  0xd7   :  { %v557_v59 = vsel %vm6976_vm12, %v552_v57, %v546_v53  ;;  %v554_v60 = vsel %vm6976_vm12, %v550_v58, %v552_v57  ;;  %v555_v61 = vsel %vm6976_vm12, %v548_v52, %v550_v58 }
  0xd8   :  { %543 = vst.msk [vmem:[#allocation2 + $0x23] ss:$8 sm:$0xf] %vm4368_vm0, %v540_v55  ;;  %v562_v1 = vcombine.low %v556_v56, %v555_v61  ;;  %v563_v2 = vcombine.low %v554_v60, %v557_v59 }
  0xda   :  { %v570_v5 = vrot.slane %v562_v1, %v4511_v18  ;;  %v577_v6 = vrot.slane %v563_v2, %v4511_v18  ;;  %v593_v7 = vpop.permute.xlu1 %592  ;;  %v591_v12 = vpop.permute.xlu0 %590 }
  0xdb   :  { %v601_v19 = vsel %vm6975_vm13, %v591_v12, %v593_v7 }
  0xdc   :  { %v578_v13 = vcombine.low %v570_v5, %v577_v6 }
  0xde   :  { %v585_v15 = vrot.slane %v578_v13, %v4511_v18  ;;  %v597_v16 = vpop.permute.xlu1 %596  ;;  %v595_v17 = vpop.permute.xlu0 %594  ;;  %v1134_v13 = vld [vmem:[#allocation2 + $0x8] sm:$0xff] }
  0xdf   :  { %v602_v20 = vsel %vm6975_vm13, %v597_v16, %v591_v12  ;;  %v599_v21 = vsel %vm6975_vm13, %v595_v17, %v597_v16  ;;  %v600_v22 = vsel %vm6975_vm13, %v593_v7, %v595_v17  ;;  %vm4330_vm13 = vmmov 1  }
  0xe0   :  { %588 = vst.msk [vmem:[#allocation2 + $0x24] ss:$8 sm:$0xf] %vm4368_vm0, %v585_v15  ;;  %v607_v23 = vcombine.low %v601_v19, %v600_v22  ;;  %v608_v24 = vcombine.low %v599_v21, %v602_v20  ;;  %v1136_v15 = vld [vmem:[#allocation2 + $0x18] sm:$0xff] }
  0xe2   :  { %v615_v25 = vrot.slane %v607_v23, %v4511_v18  ;;  %v622_v26 = vrot.slane %v608_v24, %v4511_v18  ;;  %v638_v27 = vpop.permute.xlu1 %637  ;;  %v636_v28 = vpop.permute.xlu0 %635 }
  0xe3   :  { %v646_v9 = vsel %vm6965_vm14, %v636_v28, %v638_v27 }
  0xe4   :  { %v623_v29 = vcombine.low %v615_v25, %v622_v26 }
  0xe6   :  { %v630_v11 = vrot.slane %v623_v29, %v4511_v18  ;;  %v642_v30 = vpop.permute.xlu1 %641  ;;  %v640_v31 = vpop.permute.xlu0 %639  ;;  %v1135_v29 = vld [vmem:[#allocation2 + $0x10] sm:$0xff] }
  0xe7   :  { %v647_v32 = vsel %vm6965_vm14, %v642_v30, %v636_v28  ;;  %v644_v33 = vsel %vm6965_vm14, %v640_v31, %v642_v30  ;;  %v645_v34 = vsel %vm6965_vm14, %v638_v27, %v640_v31  ;;  %vm6968_vm14 = vcmp.lt.s32.totalorder %v4499_v14, 79  ;;  %v1133_v28 = vld [vmem:[#allocation2] sm:$0xff] }
  0xe8   :  { %633 = vst.msk [vmem:[#allocation2 + $0x25] ss:$8 sm:$0xf] %vm4368_vm0, %v630_v11  ;;  %v652_v8 = vcombine.low %v646_v9, %v645_v34  ;;  %v653_v10 = vcombine.low %v644_v33, %v647_v32 }
  0xea   :  { %v660_v35 = vrot.slane %v652_v8, %v4511_v18  ;;  %v667_v36 = vrot.slane %v653_v10, %v4511_v18  ;;  %v683_v37 = vpop.permute.xlu1 %682  ;;  %v681_v38 = vpop.permute.xlu0 %680 }
  0xeb   :  { %v691_v44 = vsel %vm6966_vm15, %v681_v38, %v683_v37 }
  0xec   :  { %v668_v39 = vcombine.low %v660_v35, %v667_v36 }
  0xee   :  { %v675_v41 = vrot.slane %v668_v39, %v4511_v18  ;;  %v687_v42 = vpop.permute.xlu1 %686  ;;  %v685_v43 = vpop.permute.xlu0 %684 }
  0xef   :  { %v692_v45 = vsel %vm6966_vm15, %v687_v42, %v681_v38  ;;  %v689_v46 = vsel %vm6966_vm15, %v685_v43, %v687_v42  ;;  %v690_v47 = vsel %vm6966_vm15, %v683_v37, %v685_v43  ;;  %vm6967_vm15 = vcmp.lt.s32.totalorder %v4499_v14, 78 }
  0xf0   :  { %678 = vst.msk [vmem:[#allocation2 + $0x26] ss:$8 sm:$0xf] %vm4368_vm0, %v675_v41  ;;  %v697_v48 = vcombine.low %v691_v44, %v690_v47  ;;  %v698_v49 = vcombine.low %v689_v46, %v692_v45 }
  0xf2   :  { %v705_v50 = vrot.slane %v697_v48, %v4511_v18  ;;  %v712_v51 = vrot.slane %v698_v49, %v4511_v18  ;;  %v728_v52 = vpop.permute.xlu1 %727  ;;  %v726_v53 = vpop.permute.xlu0 %725 }
  0xf3   :  { %v736_v58 = vsel %vm6968_vm14, %v726_v53, %v728_v52 }
  0xf4   :  { %v713_v54 = vcombine.low %v705_v50, %v712_v51 }
  0xf6   :  { %v720_v55 = vrot.slane %v713_v54, %v4511_v18  ;;  %v732_v56 = vpop.permute.xlu1 %731  ;;  %v730_v57 = vpop.permute.xlu0 %729 }
  0xf7   :  { %v737_v59 = vsel %vm6968_vm14, %v732_v56, %v726_v53  ;;  %v734_v60 = vsel %vm6968_vm14, %v730_v57, %v732_v56  ;;  %v735_v61 = vsel %vm6968_vm14, %v728_v52, %v730_v57  ;;  %vm6970_vm14 = vcmp.lt.s32.totalorder %v4499_v14, 76 }
  0xf8   :  { %723 = vst.msk [vmem:[#allocation2 + $0x27] ss:$8 sm:$0xf] %vm4368_vm0, %v720_v55  ;;  %v742_v62 = vcombine.low %v736_v58, %v735_v61  ;;  %v743_v63 = vcombine.low %v734_v60, %v737_v59 }
  0xfa   :  { %v750_v0 = vrot.slane %v742_v62, %v4511_v18  ;;  %v757_v1 = vrot.slane %v743_v63, %v4511_v18  ;;  %v773_v2 = vpop.permute.xlu1 %772  ;;  %v771_v4 = vpop.permute.xlu0 %770 }
  0xfb   :  { %v781_v16 = vsel %vm6967_vm15, %v771_v4, %v773_v2 }
  0xfc   :  { %v758_v5 = vcombine.low %v750_v0, %v757_v1 }
  0xfe   :  { %v765_v6 = vrot.slane %v758_v5, %v4511_v18  ;;  %v777_v7 = vpop.permute.xlu1 %776  ;;  %v775_v12 = vpop.permute.xlu0 %774 }
  0xff   :  { %v782_v17 = vsel %vm6967_vm15, %v777_v7, %v771_v4  ;;  %v779_v19 = vsel %vm6967_vm15, %v775_v12, %v777_v7  ;;  %v780_v20 = vsel %vm6967_vm15, %v773_v2, %v775_v12  ;;  %v1138_v21 = vld [vmem:[#allocation2 + $0x28] sm:$0xff]  ;;  %v1140_v22 = vld [vmem:[#allocation2 + $0x38] sm:$0xff]  ;;  %v1137_v23 = vld [vmem:[#allocation2 + $0x20] sm:$0xff]  ;;  %vm6969_vm15 = vcmp.lt.s32.totalorder %v4499_v14, 77 }
 0x100   :  { %768 = vst.msk [vmem:[#allocation2 + $0x40] ss:$8 sm:$0xf] %vm4368_vm0, %v765_v6  ;;  %v787_v24 = vcombine.low %v781_v16, %v780_v20  ;;  %v788_v25 = vcombine.low %v779_v19, %v782_v17  ;;  %v3933_v26 = vpack.c.bf16 %v1138_v21, %v1134_v13  ;;  %v3943_v27 = vpack.c.bf16 %v1140_v22, %v1136_v15  ;;  %v1139_v11 = vld [vmem:[#allocation2 + $0x30] sm:$0xff] }
 0x101   :  { %v3935_v30 = vpack.c.bf16 %v1137_v23, %v1133_v28  ;;  %v3945_v31 = vpack.c.bf16 %v1139_v11, %v1135_v29 }
 0x102   :  { %v795_v9 = vrot.slane %v787_v24, %v4511_v18  ;;  %v802_v32 = vrot.slane %v788_v25, %v4511_v18  ;;  %v818_v33 = vpop.permute.xlu1 %817  ;;  %v816_v34 = vpop.permute.xlu0 %815  ;;  %3934 = vmatprep.subr.bf16.mxu0 %v3933_v26  ;;  %3944 = vmatprep.subr.bf16.mxu1 %v3943_v27 }
 0x103   :  { %3936 = vmatpush1.bf16.msra.mxu0 %v3935_v30  ;;  %3946 = vmatpush1.bf16.msra.mxu1 %v3945_v31  ;;  %v826_v37 = vsel %vm6969_vm15, %v816_v34, %v818_v33 }
 0x104   :  { %v803_v8 = vcombine.low %v795_v9, %v802_v32 }
 0x106   :  { %v810_v10 = vrot.slane %v803_v8, %v4511_v18  ;;  %v822_v35 = vpop.permute.xlu1 %821  ;;  %v820_v36 = vpop.permute.xlu0 %819 }
 0x107   :  { %v827_v38 = vsel %vm6969_vm15, %v822_v35, %v816_v34  ;;  %v824_v39 = vsel %vm6969_vm15, %v820_v36, %v822_v35  ;;  %v825_v41 = vsel %vm6969_vm15, %v818_v33, %v820_v36  ;;  %vm6971_vm15 = vcmp.lt.s32.totalorder %v4499_v14, 64 }
 0x108   :  { %813 = vst.msk [vmem:[#allocation2 + $0x41] ss:$8 sm:$0xf] %vm4368_vm0, %v810_v10  ;;  %v832_v42 = vcombine.low %v826_v37, %v825_v41  ;;  %v833_v43 = vcombine.low %v824_v39, %v827_v38 }
 0x10a   :  { %v840_v44 = vrot.slane %v832_v42, %v4511_v18  ;;  %v847_v45 = vrot.slane %v833_v43, %v4511_v18  ;;  %v863_v46 = vpop.permute.xlu1 %862  ;;  %v861_v47 = vpop.permute.xlu0 %860 }
 0x10b   :  { %v871_v52 = vsel %vm6970_vm14, %v861_v47, %v863_v46 }
 0x10c   :  { %v848_v48 = vcombine.low %v840_v44, %v847_v45 }
 0x10e   :  { %v855_v49 = vrot.slane %v848_v48, %v4511_v18  ;;  %v867_v50 = vpop.permute.xlu1 %866  ;;  %v865_v51 = vpop.permute.xlu0 %864 }
 0x10f   :  { %v872_v53 = vsel %vm6970_vm14, %v867_v50, %v861_v47  ;;  %v869_v54 = vsel %vm6970_vm14, %v865_v51, %v867_v50  ;;  %v870_v55 = vsel %vm6970_vm14, %v863_v46, %v865_v51  ;;  %vm6972_vm14 = vcmp.lt.s32.totalorder %v4499_v14, 63 }
 0x110   :  { %858 = vst.msk [vmem:[#allocation2 + $0x42] ss:$8 sm:$0xf] %vm4368_vm0, %v855_v49  ;;  %v877_v56 = vcombine.low %v871_v52, %v870_v55  ;;  %v878_v57 = vcombine.low %v869_v54, %v872_v53 }
 0x112   :  { %v885_v58 = vrot.slane %v877_v56, %v4511_v18  ;;  %v892_v59 = vrot.slane %v878_v57, %v4511_v18  ;;  %v908_v60 = vpop.permute.xlu1 %907  ;;  %v906_v61 = vpop.permute.xlu0 %905 }
 0x113   :  { %v916_v2 = vsel %vm6971_vm15, %v906_v61, %v908_v60 }
 0x114   :  { %v893_v62 = vcombine.low %v885_v58, %v892_v59 }
 0x116   :  { %v900_v63 = vrot.slane %v893_v62, %v4511_v18  ;;  %v912_v0 = vpop.permute.xlu1 %911  ;;  %v910_v1 = vpop.permute.xlu0 %909 }
 0x117   :  { %v917_v4 = vsel %vm6971_vm15, %v912_v0, %v906_v61  ;;  %v914_v5 = vsel %vm6971_vm15, %v910_v1, %v912_v0  ;;  %v915_v6 = vsel %vm6971_vm15, %v908_v60, %v910_v1  ;;  %vm6973_vm15 = vcmp.lt.s32.totalorder %v4499_v14, 62 }
 0x118   :  { %903 = vst.msk [vmem:[#allocation2 + $0x43] ss:$8 sm:$0xf] %vm4368_vm0, %v900_v63  ;;  %v922_v7 = vcombine.low %v916_v2, %v915_v6  ;;  %v923_v12 = vcombine.low %v914_v5, %v917_v4 }
 0x11a   :  { %v930_v13 = vrot.slane %v922_v7, %v4511_v18  ;;  %v937_v15 = vrot.slane %v923_v12, %v4511_v18  ;;  %v953_v16 = vpop.permute.xlu1 %952  ;;  %v951_v17 = vpop.permute.xlu0 %950 }
 0x11b   :  { %v961_v23 = vsel %vm6972_vm14, %v951_v17, %v953_v16 }
 0x11c   :  { %v938_v19 = vcombine.low %v930_v13, %v937_v15 }
 0x11e   :  { %v945_v20 = vrot.slane %v938_v19, %v4511_v18  ;;  %v957_v21 = vpop.permute.xlu1 %956  ;;  %v955_v22 = vpop.permute.xlu0 %954 }
 0x11f   :  { %v962_v24 = vsel %vm6972_vm14, %v957_v21, %v951_v17  ;;  %v959_v25 = vsel %vm6972_vm14, %v955_v22, %v957_v21  ;;  %v960_v26 = vsel %vm6972_vm14, %v953_v16, %v955_v22  ;;  %vm6974_vm14 = vcmp.lt.s32.totalorder %v4499_v14, 61 }
 0x120   :  { %948 = vst.msk [vmem:[#allocation2 + $0x44] ss:$8 sm:$0xf] %vm4368_vm0, %v945_v20  ;;  %v967_v27 = vcombine.low %v961_v23, %v960_v26  ;;  %v968_v28 = vcombine.low %v959_v25, %v962_v24 }
 0x122   :  { %v975_v29 = vrot.slane %v967_v27, %v4511_v18  ;;  %v982_v11 = vrot.slane %v968_v28, %v4511_v18  ;;  %v998_v30 = vpop.permute.xlu1 %997  ;;  %v996_v31 = vpop.permute.xlu0 %995  ;;  %v1131_v27 = vld [vmem:[%s6953_s1 + $0x8] sm:$0xff]  ;;  %v1132_v28 = vld [vmem:[%s6953_s1 + $0x10] sm:$0xf] }
 0x123   :  { %v1006_v8 = vsel %vm6973_vm15, %v996_v31, %v998_v30 }
 0x124   :  { %v983_v9 = vcombine.low %v975_v29, %v982_v11 }
 0x126   :  { %v990_v32 = vrot.slane %v983_v9, %v4511_v18  ;;  %v1002_v33 = vpop.permute.xlu1 %1001  ;;  %v1000_v34 = vpop.permute.xlu0 %999 }
 0x127   :  { %v1007_v10 = vsel %vm6973_vm15, %v1002_v33, %v996_v31  ;;  %v1004_v35 = vsel %vm6973_vm15, %v1000_v34, %v1002_v33  ;;  %v1005_v36 = vsel %vm6973_vm15, %v998_v30, %v1000_v34  ;;  %vm1093_vm15 = vcmp.lt.s32.totalorder %v4499_v14, 60 }
 0x128   :  { %993 = vst.msk [vmem:[#allocation2 + $0x45] ss:$8 sm:$0xf] %vm4368_vm0, %v990_v32  ;;  %v1012_v37 = vcombine.low %v1006_v8, %v1005_v36  ;;  %v1013_v38 = vcombine.low %v1004_v35, %v1007_v10 }
 0x12a   :  { %v1020_v39 = vrot.slane %v1012_v37, %v4511_v18  ;;  %v1027_v41 = vrot.slane %v1013_v38, %v4511_v18  ;;  %v1043_v42 = vpop.permute.xlu1 %1042  ;;  %v1041_v43 = vpop.permute.xlu0 %1040 }
 0x12b   :  { %v1051_v48 = vsel %vm6974_vm14, %v1041_v43, %v1043_v42 }
 0x12c   :  { %v1028_v44 = vcombine.low %v1020_v39, %v1027_v41 }
 0x12e   :  { %v1035_v45 = vrot.slane %v1028_v44, %v4511_v18  ;;  %v1047_v46 = vpop.permute.xlu1 %1046  ;;  %v1045_v47 = vpop.permute.xlu0 %1044 }
 0x12f   :  { %v1052_v49 = vsel %vm6974_vm14, %v1047_v46, %v1041_v43  ;;  %v1049_v50 = vsel %vm6974_vm14, %v1045_v47, %v1047_v46  ;;  %v1050_v51 = vsel %vm6974_vm14, %v1043_v42, %v1045_v47  ;;  %vm1177_vm14 = vcmask 1040384  }
 0x130   :  { %1038 = vst.msk [vmem:[#allocation2 + $0x46] ss:$8 sm:$0xf] %vm4368_vm0, %v1035_v45  ;;  %v1057_v52 = vcombine.low %v1051_v48, %v1050_v51  ;;  %v1058_v53 = vcombine.low %v1049_v50, %v1052_v49  ;;  %vm4931_vm12 = vmpackc.low %vm1177_vm14, %vm4330_vm13 }
 0x132   :  { %v1065_v54 = vrot.slane %v1057_v52, %v4511_v18  ;;  %v1072_v55 = vrot.slane %v1058_v53, %v4511_v18  ;;  %v1088_v56 = vpop.permute.xlu1 %1087  ;;  %v1086_v57 = vpop.permute.xlu0 %1085 }
 0x133   :  { %v1096_v62 = vsel %vm1093_vm15, %v1086_v57, %v1088_v56 }
 0x134   :  { %v1073_v58 = vcombine.low %v1065_v54, %v1072_v55 }
 0x136   :  { %v1080_v59 = vrot.slane %v1073_v58, %v4511_v18  ;;  %v1092_v60 = vpop.permute.xlu1 %1091  ;;  %v1090_v61 = vpop.permute.xlu0 %1089 }
 0x137   :  { %v1097_v63 = vsel %vm1093_vm15, %v1092_v60, %v1086_v57  ;;  %v1094_v0 = vsel %vm1093_vm15, %v1090_v61, %v1092_v60  ;;  %v1095_v1 = vsel %vm1093_vm15, %v1088_v56, %v1090_v61 }
 0x138   :  { %1083 = vst.msk [vmem:[#allocation2 + $0x47] ss:$8 sm:$0xf] %vm4368_vm0, %v1080_v59  ;;  %v1102_v2 = vcombine.low %v1096_v62, %v1095_v1  ;;  %v1103_v4 = vcombine.low %v1094_v0, %v1097_v63 }
 0x13a   :  { %v1110_v5 = vrot.slane %v1102_v2, %v4511_v18  ;;  %v1117_v6 = vrot.slane %v1103_v4, %v4511_v18 }
 0x13c   :  { %v1118_v7 = vcombine.low %v1110_v5, %v1117_v6 }
 0x13e   :  { %v1125_v12 = vrot.slane %v1118_v7, %v4511_v18 }
 0x13f   :  { %v1142_v15 = vld [vmem:[#allocation2 + $0x48] sm:$0xff]  ;;  %v1144_v16 = vld [vmem:[#allocation2 + $0x58] sm:$0xff]  ;;  %v1141_v17 = vld [vmem:[#allocation2 + $0x40] sm:$0xff] }
 0x140   :  { %1128 = vst.msk [vmem:[#allocation2 + $0x60] ss:$8 sm:$0xf] %vm4368_vm0, %v1125_v12  ;;  %v1143_v25 = vld [vmem:[#allocation2 + $0x50] sm:$0xff]  ;;  %vm1167_vm0 = vcmask 203776  }
 0x147   :  { %v1146_v19 = vld [vmem:[#allocation2 + $0x68] sm:$0x1]  ;;  %v1148_v20 = vld [vmem:[#allocation2 + $0x78] sm:$0x1]  ;;  %v1145_v21 = vld [vmem:[#allocation2 + $0x60] sm:$0x1]  ;;  %v1155_v29 = vpop.permute.xlu0 %1154  ;;  %v1160_v10 = vpop.permute.xlu1 %1159 }
 0x148   :  { %v3937_v22 = vpack.c.bf16 %v1146_v19, %v1142_v15  ;;  %v3947_v23 = vpack.c.bf16 %v1148_v20, %v1144_v16  ;;  %v3940_v24 = vpack.c.bf16 %v1145_v21, %v1141_v17  ;;  %v1147_v18 = vld [vmem:[#allocation2 + $0x70] sm:$0x1] }
 0x149   :  { %v3950_v26 = vpack.c.bf16 %v1147_v18, %v1143_v25 }
 0x14a   :  { %3939 = vmatprep.subr.msk.bf16.mxu0 %vm4931_vm12, %v3937_v22  ;;  %3949 = vmatprep.subr.msk.bf16.mxu1 %vm4931_vm12, %v3947_v23 }
 0x14b   :  { %3942 = vmatpush1.bf16.msk.msra.mxu0 %vm4931_vm12, %v3940_v24  ;;  %3952 = vmatpush1.bf16.msk.msra.mxu1 %vm4931_vm12, %v3950_v26  ;;  %v1165_v47 = vpop.permute.xlu1 %1164  ;;  %vm1428_vm12 = vcmask 1043456  }
 0x14e   :  { %3907 = vmatmul.mubr.msk.f32.vlgmr.msra.gmra.mrb[0].mxu0 %vm1167_vm0, %v1130_v3  ;;  %3912 = vmatmul.mubr.msk.f32.vlgmr.msra.gmra.mrb[0].mxu1 %vm1167_vm0, %v1130_v3 }
 0x14f   :  { %1260 = vmatprep.mubr.f32.mxu0 %v4328_v40  ;;  %1343 = vmatprep.mubr.f32.mxu1 %v4328_v40 }
 0x152   :  { %3908 = vmatmul.mubr.msk.f32.gmra.mrb[2].mxu0 %vm1167_vm0, %v1131_v27  ;;  %3913 = vmatmul.mubr.msk.f32.gmra.mrb[2].mxu1 %vm1167_vm0, %v1131_v27 }
 0x153   :  { %1266 = vmatprep.mubr.f32.mxu0 %v4328_v40  ;;  %1349 = vmatprep.mubr.f32.mxu1 %v4328_v40 }
 0x156   :  { %3909 = vmatmul.mubr.msk.f32.gmra.mrb[4].mxu0 %vm1167_vm0, %v1132_v28  ;;  %3914 = vmatmul.mubr.msk.f32.gmra.mrb[4].mxu1 %vm1167_vm0, %v1132_v28 }
 0x221   :  { %v1256_v11 = vpop.f32.mrb[0].mxu0  ;;  %v1339_v30 = vpop.f32.mrb[0].mxu1 }
 0x222   :  { %v1257_v31 = vadd.f32 %v1256_v11, %v1155_v29  ;;  %v1340_v9 = vadd.f32 %v1339_v30, %v1155_v29  ;;  %v1258_v32 = vpop.f32.mrb[1].mxu0  ;;  %v1341_v33 = vpop.f32.mrb[1].mxu1 }
 0x223   :  { %v1259_v34 = vadd.f32 %v1258_v32, %v1155_v29  ;;  %v1342_v8 = vadd.f32 %v1341_v33, %v1155_v29 }
 0x224   :  { %v4956_v35 = vmax.f32 %v1257_v31, 0.0  ;;  %v4958_v36 = vmax.f32 %v1340_v9, 0.0 }
 0x225   :  { %v4960_v40 = vmax.f32 %v1259_v34, 0.0  ;;  %v4962_v37 = vmax.f32 %v1342_v8, 0.0  ;;  %v1262_v38 = vpop.f32.mrb[2].mxu0  ;;  %v1345_v39 = vpop.f32.mrb[2].mxu1 }
 0x226   :  { %1368 = vst [vmem:[#allocation3] sm:$0xff] %v4956_v35  ;;  %1370 = vst [vmem:[#allocation3 + $0x10] sm:$0xff] %v4958_v36  ;;  %v1263_v41 = vadd.f32 %v1262_v38, %v1160_v10  ;;  %v1346_v42 = vadd.f32 %v1345_v39, %v1160_v10  ;;  %v1264_v43 = vpop.f32.mrb[3].mxu0  ;;  %v1347_v44 = vpop.f32.mrb[3].mxu1  ;;  %1380 = vrot.lane.b32.xlu0 %v4956_v35, %s4303_s0 }
 0x227   :  { %1369 = vst [vmem:[#allocation3 + $0x8] sm:$0xff] %v4960_v40  ;;  %1371 = vst [vmem:[#allocation3 + $0x18] sm:$0xff] %v4962_v37  ;;  %v1265_v45 = vadd.f32 %v1264_v43, %v1160_v10  ;;  %v1348_v46 = vadd.f32 %v1347_v44, %v1160_v10  ;;  %1386 = vrot.lane.b32.xlu1 %v4960_v40, %s4303_s0 }
 0x228   :  { %v4972_v48 = vmax.f32 %v1263_v41, 0.0  ;;  %v4974_v49 = vmax.f32 %v1346_v42, 0.0 }
 0x229   :  { %v4976_v50 = vmax.f32 %v1265_v45, 0.0  ;;  %v4978_v51 = vmax.f32 %v1348_v46, 0.0  ;;  %v1268_v52 = vpop.f32.mrb[4].mxu0  ;;  %v1351_v53 = vpop.f32.mrb[4].mxu1 }
 0x22a   :  { %1372 = vst [vmem:[#allocation3 + $0x20] sm:$0xff] %v4972_v48  ;;  %1374 = vst [vmem:[#allocation3 + $0x30] sm:$0xff] %v4974_v49  ;;  %1392 = vrot.lane.b32.xlu0 %v4958_v36, %s4303_s0  ;;  %v1269_v54 = vadd.f32 %v1268_v52, %v1165_v47  ;;  %v1352_v55 = vadd.f32 %v1351_v53, %v1165_v47  ;;  %v1270_v56 = vpop.f32.mrb[5].mxu0  ;;  %v1353_v57 = vpop.f32.mrb[5].mxu1  ;;  %v4079_v62 = vpack.c.bf16 %v4974_v49, %v4958_v36 }
 0x22b   :  { %1373 = vst [vmem:[#allocation3 + $0x28] sm:$0xff] %v4976_v50  ;;  %1375 = vst [vmem:[#allocation3 + $0x38] sm:$0xff] %v4978_v51  ;;  %1398 = vrot.lane.b32.xlu1 %v4962_v37, %s4303_s0  ;;  %v3953_v58 = vpack.c.bf16 %v4976_v50, %v4960_v40  ;;  %v4077_v59 = vpack.c.bf16 %v4978_v51, %v4962_v37  ;;  %v1271_v60 = vadd.f32 %v1270_v56, %v1165_v47 }
 0x22c   :  { %v1354_v61 = vadd.f32 %v1353_v57, %v1165_v47  ;;  %v4994_v63 = vmax.f32 %v1269_v54, 0.0  ;;  %v4996_v0 = vmax.f32 %v1352_v55, 0.0  ;;  %v3955_v1 = vpack.c.bf16 %v4972_v48, %v4956_v35 }
 0x22d   :  { %3954 = vmatprep.subr.bf16.mxu0 %v3953_v58  ;;  %4078 = vmatprep.subr.bf16.mxu1 %v4077_v59  ;;  %v5000_v2 = vmax.f32 %v1271_v60, 0.0 }
 0x22e   :  { %v5002_v4 = vmax.f32 %v1354_v61, 0.0  ;;  %1473 = vrot.lane.b32.xlu0 %v4956_v35, %s4304_s20  ;;  %4080 = vmatpush1.bf16.msra.mxu1 %v4079_v62  ;;  %1376 = vst [vmem:[#allocation3 + $0x40] sm:$0xf] %v4994_v63  ;;  %1378 = vst [vmem:[#allocation3 + $0x50] sm:$0xf] %v4996_v0 }
 0x22f   :  { %1479 = vrot.lane.b32.xlu1 %v4960_v40, %s4304_s20  ;;  %3956 = vmatpush1.bf16.msra.mxu0 %v3955_v1  ;;  %1377 = vst [vmem:[#allocation3 + $0x48] sm:$0xf] %v5000_v2 }
 0x230   :  { %1379 = vst [vmem:[#allocation3 + $0x58] sm:$0xf] %v5002_v4 }
 0x232   :  { %1485 = vrot.lane.b32.xlu0 %v4958_v36, %s4304_s20 }
 0x233   :  { %1491 = vrot.lane.b32.xlu1 %v4962_v37, %s4304_s20 }
 0x236   :  { %1521 = vrot.lane.b32.xlu0 %v4956_v35, %s4305_s21 }
 0x237   :  { %1527 = vrot.lane.b32.xlu1 %v4960_v40, %s4305_s21 }
 0x23a   :  { %1533 = vrot.lane.b32.xlu0 %v4958_v36, %s4305_s21 }
 0x23b   :  { %1539 = vrot.lane.b32.xlu1 %v4962_v37, %s4305_s21 }
 0x23e   :  { %1613 = vrot.lane.b32.xlu0 %v4956_v35, %s4306_s22 }
 0x23f   :  { %1619 = vrot.lane.b32.xlu1 %v4960_v40, %s4306_s22 }
 0x242   :  { %1625 = vrot.lane.b32.xlu0 %v4958_v36, %s4306_s22 }
 0x243   :  { %1631 = vrot.lane.b32.xlu1 %v4962_v37, %s4306_s22 }
 0x246   :  { %1661 = vrot.lane.b32.xlu0 %v4956_v35, %s4307_s23 }
 0x247   :  { %1667 = vrot.lane.b32.xlu1 %v4960_v40, %s4307_s23 }
 0x24a   :  { %1673 = vrot.lane.b32.xlu0 %v4958_v36, %s4307_s23 }
 0x24b   :  { %1679 = vrot.lane.b32.xlu1 %v4962_v37, %s4307_s23 }
 0x24e   :  { %1753 = vrot.lane.b32.xlu0 %v4956_v35, %s4308_s24 }
 0x24f   :  { %1759 = vrot.lane.b32.xlu1 %v4960_v40, %s4308_s24 }
 0x252   :  { %1765 = vrot.lane.b32.xlu0 %v4958_v36, %s4308_s24 }
 0x253   :  { %1771 = vrot.lane.b32.xlu1 %v4962_v37, %s4308_s24 }
 0x256   :  { %1801 = vrot.lane.b32.xlu0 %v4956_v35, %s4309_s25 }
 0x257   :  { %1807 = vrot.lane.b32.xlu1 %v4960_v40, %s4309_s25 }
 0x25a   :  { %1813 = vrot.lane.b32.xlu0 %v4958_v36, %s4309_s25 }
 0x25b   :  { %1819 = vrot.lane.b32.xlu1 %v4962_v37, %s4309_s25 }
 0x25e   :  { %1893 = vrot.lane.b32.xlu0 %v4956_v35, %s4310_s26 }
 0x25f   :  { %1899 = vrot.lane.b32.xlu1 %v4960_v40, %s4310_s26 }
 0x262   :  { %1388 = vrot.lane.b32.xlu0 %v4976_v50, %s4303_s0 }
 0x263   :  { %1382 = vrot.lane.b32.xlu1 %v4972_v48, %s4303_s0 }
 0x266   :  { %1400 = vrot.lane.b32.xlu0 %v4978_v51, %s4303_s0 }
 0x267   :  { %1394 = vrot.lane.b32.xlu1 %v4974_v49, %s4303_s0 }
 0x26a   :  { %1481 = vrot.lane.b32.xlu0 %v4976_v50, %s4304_s20 }
 0x26b   :  { %1475 = vrot.lane.b32.xlu1 %v4972_v48, %s4304_s20 }
 0x26e   :  { %1493 = vrot.lane.b32.xlu0 %v4978_v51, %s4304_s20 }
 0x26f   :  { %1487 = vrot.lane.b32.xlu1 %v4974_v49, %s4304_s20 }
 0x272   :  { %1529 = vrot.lane.b32.xlu0 %v4976_v50, %s4305_s21 }
 0x273   :  { %1523 = vrot.lane.b32.xlu1 %v4972_v48, %s4305_s21 }
 0x276   :  { %1541 = vrot.lane.b32.xlu0 %v4978_v51, %s4305_s21 }
 0x277   :  { %1535 = vrot.lane.b32.xlu1 %v4974_v49, %s4305_s21 }
 0x27a   :  { %1621 = vrot.lane.b32.xlu0 %v4976_v50, %s4306_s22 }
 0x27b   :  { %1615 = vrot.lane.b32.xlu1 %v4972_v48, %s4306_s22 }
 0x27e   :  { %1633 = vrot.lane.b32.xlu0 %v4978_v51, %s4306_s22 }
 0x27f   :  { %1627 = vrot.lane.b32.xlu1 %v4974_v49, %s4306_s22 }
 0x282   :  { %1669 = vrot.lane.b32.xlu0 %v4976_v50, %s4307_s23 }
 0x283   :  { %1663 = vrot.lane.b32.xlu1 %v4972_v48, %s4307_s23 }
 0x286   :  { %1681 = vrot.lane.b32.xlu0 %v4978_v51, %s4307_s23 }
 0x287   :  { %1675 = vrot.lane.b32.xlu1 %v4974_v49, %s4307_s23 }
 0x28a   :  { %1761 = vrot.lane.b32.xlu0 %v4976_v50, %s4308_s24 }
 0x28b   :  { %1755 = vrot.lane.b32.xlu1 %v4972_v48, %s4308_s24 }
 0x28e   :  { %1773 = vrot.lane.b32.xlu0 %v4978_v51, %s4308_s24 }
 0x28f   :  { %1767 = vrot.lane.b32.xlu1 %v4974_v49, %s4308_s24 }
 0x292   :  { %1809 = vrot.lane.b32.xlu0 %v4976_v50, %s4309_s25 }
 0x293   :  { %1803 = vrot.lane.b32.xlu1 %v4972_v48, %s4309_s25 }
 0x296   :  { %1821 = vrot.lane.b32.xlu0 %v4978_v51, %s4309_s25 }
 0x297   :  { %1815 = vrot.lane.b32.xlu1 %v4974_v49, %s4309_s25 }
 0x298   :  { %v1381_v5 = vpop.permute.xlu0 %1380 }
 0x299   :  { %v1387_v6 = vpop.permute.xlu1 %1386 }
 0x29a   :  { %v5118_v7 = vsel %vm58_vm1, %v1381_v5, %v1387_v6  ;;  %1384 = vrot.lane.b32.xlu0 %v4994_v63, %s4303_s0 }
 0x29b   :  { %v1429_v12 = vrot.slane %v5118_v7, 4  ;;  %1895 = vrot.lane.b32.xlu1 %v4972_v48, %s4310_s26 }
 0x29c   :  { %v1393_v13 = vpop.permute.xlu0 %1392 }
 0x29d   :  { %1461 = vst [vmem:[#allocation3 + $0x40] sm:$0xf0] %v1429_v12  ;;  %v5129_v15 = vsel %vm58_vm1, %v1387_v6, %v1393_v13  ;;  %v1399_v16 = vpop.permute.xlu1 %1398 }
 0x29e   :  { %v1430_v17 = vrot.slane %v5129_v15, 4  ;;  %v5134_v19 = vsel %vm58_vm1, %v1393_v13, %v1399_v16  ;;  %v5138_v20 = vsel %vm58_vm1, %v1399_v16, %v1381_v5  ;;  %1396 = vrot.lane.b32.xlu0 %v4996_v0, %s4303_s0 }
 0x29f   :  { %v1431_v21 = vrot.slane %v5134_v19, 4  ;;  %v1432_v22 = vrot.slane %v5138_v20, 4  ;;  %1390 = vrot.lane.b32.xlu1 %v5000_v2, %s4303_s0 }
 0x2a0   :  { %1462 = vst [vmem:[#allocation3 + $0x48] sm:$0xf0] %v1430_v17  ;;  %v1474_v23 = vpop.permute.xlu0 %1473 }
 0x2a1   :  { %1463 = vst [vmem:[#allocation3 + $0x50] sm:$0xf0] %v1431_v21  ;;  %1464 = vst [vmem:[#allocation3 + $0x58] sm:$0xf0] %v1432_v22  ;;  %v1480_v24 = vpop.permute.xlu1 %1479 }
 0x2a2   :  { %v5154_v25 = vsel %vm103_vm2, %v1474_v23, %v1480_v24  ;;  %1477 = vrot.lane.b32.xlu0 %v4994_v63, %s4304_s20 }
 0x2a3   :  { %1402 = vrot.lane.b32.xlu1 %v5002_v4, %s4303_s0 }
 0x2a4   :  { %v1486_v18 = vpop.permute.xlu0 %1485 }
 0x2a5   :  { %v5162_v26 = vsel %vm103_vm2, %v1480_v24, %v1486_v18  ;;  %v1492_v3 = vpop.permute.xlu1 %1491 }
 0x2a6   :  { %v5166_v27 = vsel %vm103_vm2, %v1486_v18, %v1492_v3  ;;  %v5170_v28 = vsel %vm103_vm2, %v1492_v3, %v1474_v23  ;;  %1489 = vrot.lane.b32.xlu0 %v4996_v0, %s4304_s20 }
 0x2a7   :  { %1483 = vrot.lane.b32.xlu1 %v5000_v2, %s4304_s20  ;;  %v3098_v20 = vld [vmem:[#allocation3 + $0x48] sm:$0xff] }
 0x2a8   :  { %v1522_v29 = vpop.permute.xlu0 %1521 }
 0x2a9   :  { %v1528_v11 = vpop.permute.xlu1 %1527 }
 0x2aa   :  { %v5178_v30 = vsel %vm148_vm3, %v1522_v29, %v1528_v11  ;;  %1525 = vrot.lane.b32.xlu0 %v4994_v63, %s4305_s21 }
 0x2ab   :  { %v1569_v31 = vrot.slane %v5178_v30, 4  ;;  %1495 = vrot.lane.b32.xlu1 %v5002_v4, %s4304_s20 }
 0x2ac   :  { %v1534_v9 = vpop.permute.xlu0 %1533 }
 0x2ad   :  { %1601 = vst [vmem:[#allocation3 + $0xe0] sm:$0xf0] %v1569_v31  ;;  %v5189_v32 = vsel %vm148_vm3, %v1528_v11, %v1534_v9  ;;  %v1540_v33 = vpop.permute.xlu1 %1539 }
 0x2ae   :  { %v6987_v34 = vrot.slane %v5189_v32, 4  ;;  %v5194_v8 = vsel %vm148_vm3, %v1534_v9, %v1540_v33  ;;  %v5198_v10 = vsel %vm148_vm3, %v1540_v33, %v1522_v29  ;;  %1537 = vrot.lane.b32.xlu0 %v4996_v0, %s4305_s21 }
 0x2af   :  { %v6986_v38 = vrot.slane %v5194_v8, 4  ;;  %v1572_v39 = vrot.slane %v5198_v10, 4  ;;  %1531 = vrot.lane.b32.xlu1 %v5000_v2, %s4305_s21 }
 0x2b0   :  { %1602 = vst [vmem:[#allocation3 + $0xe8] sm:$0xf0] %v6987_v34  ;;  %v1614_v41 = vpop.permute.xlu0 %1613  ;;  %v3099_v34 = vld [vmem:[#allocation3 + $0x50] sm:$0xff] }
 0x2b1   :  { %1603 = vst [vmem:[#allocation3 + $0xf0] sm:$0xf0] %v6986_v38  ;;  %1604 = vst [vmem:[#allocation3 + $0xf8] sm:$0xf0] %v1572_v39  ;;  %v1620_v42 = vpop.permute.xlu1 %1619 }
 0x2b2   :  { %v5214_v43 = vsel %vm193_vm4, %v1614_v41, %v1620_v42  ;;  %1617 = vrot.lane.b32.xlu0 %v4994_v63, %s4306_s22 }
 0x2b3   :  { %1543 = vrot.lane.b32.xlu1 %v5002_v4, %s4305_s21 }
 0x2b4   :  { %v1626_v44 = vpop.permute.xlu0 %1625 }
 0x2b5   :  { %v5222_v45 = vsel %vm193_vm4, %v1620_v42, %v1626_v44  ;;  %v1632_v46 = vpop.permute.xlu1 %1631 }
 0x2b6   :  { %v5226_v47 = vsel %vm193_vm4, %v1626_v44, %v1632_v46  ;;  %v5230_v52 = vsel %vm193_vm4, %v1632_v46, %v1614_v41  ;;  %1629 = vrot.lane.b32.xlu0 %v4996_v0, %s4306_s22 }
 0x2b7   :  { %1623 = vrot.lane.b32.xlu1 %v5000_v2, %s4306_s22 }
 0x2b8   :  { %v1662_v53 = vpop.permute.xlu0 %1661 }
 0x2b9   :  { %v1668_v54 = vpop.permute.xlu1 %1667 }
 0x2ba   :  { %v5238_v55 = vsel %vm238_vm5, %v1662_v53, %v1668_v54  ;;  %1665 = vrot.lane.b32.xlu0 %v4994_v63, %s4307_s23 }
 0x2bb   :  { %v6985_v56 = vrot.slane %v5238_v55, 4  ;;  %1635 = vrot.lane.b32.xlu1 %v5002_v4, %s4306_s22  ;;  %s7120_s22 = smov 63  }
 0x2bc   :  { %v1674_v57 = vpop.permute.xlu0 %1673 }
 0x2bd   :  { %1741 = vst [vmem:[#allocation3 + $0x180] sm:$0xf0] %v6985_v56  ;;  %v5249_v58 = vsel %vm238_vm5, %v1668_v54, %v1674_v57  ;;  %v1680_v59 = vpop.permute.xlu1 %1679 }
 0x2be   :  { %v6982_v60 = vrot.slane %v5249_v58, 4  ;;  %v5254_v61 = vsel %vm238_vm5, %v1674_v57, %v1680_v59  ;;  %v5258_v62 = vsel %vm238_vm5, %v1680_v59, %v1662_v53  ;;  %1677 = vrot.lane.b32.xlu0 %v4996_v0, %s4307_s23 }
 0x2bf   :  { %v6981_v1 = vrot.slane %v5254_v61, 4  ;;  %v6983_v5 = vrot.slane %v5258_v62, 4  ;;  %1671 = vrot.lane.b32.xlu1 %v5000_v2, %s4307_s23 }
 0x2c0   :  { %1742 = vst [vmem:[#allocation3 + $0x188] sm:$0xf0] %v6982_v60  ;;  %v1754_v6 = vpop.permute.xlu0 %1753 }
 0x2c1   :  { %1743 = vst [vmem:[#allocation3 + $0x190] sm:$0xf0] %v6981_v1  ;;  %1744 = vst [vmem:[#allocation3 + $0x198] sm:$0xf0] %v6983_v5  ;;  %v1760_v13 = vpop.permute.xlu1 %1759 }
 0x2c2   :  { %v5274_v16 = vsel %vm283_vm6, %v1754_v6, %v1760_v13  ;;  %1757 = vrot.lane.b32.xlu0 %v4994_v63, %s4308_s24 }
 0x2c3   :  { %7013 = vst [vmem:[#allocation4_spill] sm:$0xff] %v5274_v16  ;;  %1683 = vrot.lane.b32.xlu1 %v5002_v4, %s4307_s23  ;;  %s7137_s23 = smov 62  }
 0x2c4   :  { %v1766_v23 = vpop.permute.xlu0 %1765 }
 0x2c5   :  { %v5282_v24 = vsel %vm283_vm6, %v1760_v13, %v1766_v23  ;;  %v1772_v18 = vpop.permute.xlu1 %1771 }
 0x2c6   :  { %v5286_v3 = vsel %vm283_vm6, %v1766_v23, %v1772_v18  ;;  %v5290_v29 = vsel %vm283_vm6, %v1772_v18, %v1754_v6  ;;  %1769 = vrot.lane.b32.xlu0 %v4996_v0, %s4308_s24 }
 0x2c7   :  { %7014 = vst [vmem:[#allocation5_spill] sm:$0xff] %v5286_v3  ;;  %7015 = vst [vmem:[#allocation6_spill] sm:$0xff] %v5290_v29  ;;  %1763 = vrot.lane.b32.xlu1 %v5000_v2, %s4308_s24  ;;  %v7026_v29 = vrot.slane %v5254_v61, 4 }
 0x2c8   :  { %v1802_v11 = vpop.permute.xlu0 %1801 }
 0x2c9   :  { %v1808_v9 = vpop.permute.xlu1 %1807 }
 0x2ca   :  { %v5298_v33 = vsel %vm328_vm7, %v1802_v11, %v1808_v9  ;;  %1805 = vrot.lane.b32.xlu0 %v4994_v63, %s4309_s25 }
 0x2cb   :  { %v6980_v41 = vrot.slane %v5298_v33, 4  ;;  %1775 = vrot.lane.b32.xlu1 %v5002_v4, %s4308_s24  ;;  %s7142_s24 = smov 61  }
 0x2cc   :  { %v1814_v42 = vpop.permute.xlu0 %1813 }
 0x2cd   :  { %1881 = vst [vmem:[#allocation3 + $0x220] sm:$0xf0] %v6980_v41  ;;  %v5309_v44 = vsel %vm328_vm7, %v1808_v9, %v1814_v42  ;;  %v1820_v46 = vpop.permute.xlu1 %1819 }
 0x2ce   :  { %v6978_v53 = vrot.slane %v5309_v44, 4  ;;  %v5314_v54 = vsel %vm328_vm7, %v1814_v42, %v1820_v46  ;;  %v5318_v57 = vsel %vm328_vm7, %v1820_v46, %v1802_v11  ;;  %1817 = vrot.lane.b32.xlu0 %v4996_v0, %s4309_s25 }
 0x2cf   :  { %v6977_v59 = vrot.slane %v5314_v54, 4  ;;  %v6979_v6 = vrot.slane %v5318_v57, 4  ;;  %1811 = vrot.lane.b32.xlu1 %v5000_v2, %s4309_s25 }
 0x2d0   :  { %1882 = vst [vmem:[#allocation3 + $0x228] sm:$0xf0] %v6978_v53  ;;  %v5328_v13 = vpop.permute.xlu0 %1893 }
 0x2d1   :  { %7016 = vst [vmem:[#allocation7_spill] sm:$0xff] %v5328_v13  ;;  %1883 = vst [vmem:[#allocation3 + $0x230] sm:$0xf0] %v6977_v59  ;;  %v5334_v23 = vpop.permute.xlu1 %1899 }
 0x2d2   :  { %1884 = vst [vmem:[#allocation3 + $0x238] sm:$0xf0] %v6979_v6  ;;  %7017 = vst [vmem:[#allocation8_spill] sm:$0xff] %v5334_v23  ;;  %v5340_v18 = vsel %vm373_vm8, %v5328_v13, %v5334_v23  ;;  %1897 = vrot.lane.b32.xlu0 %v4994_v63, %s4310_s26 }
 0x2d3   :  { %7018 = vst [vmem:[#allocation9_spill] sm:$0xff] %v5340_v18  ;;  %1823 = vrot.lane.b32.xlu1 %v5002_v4, %s4309_s25 }
 0x2d4   :  { %v1389_v11 = vpop.permute.xlu0 %1388 }
 0x2d5   :  { %v1383_v9 = vpop.permute.xlu1 %1382 }
 0x2d6   :  { %v5348_v42 = vsel %vm58_vm1, %v1383_v9, %v1389_v11  ;;  %1901 = vrot.lane.b32.xlu0 %v4976_v50, %s4310_s26 }
 0x2d7   :  { %v6984_v46 = vrot.slane %v5348_v42, 4  ;;  %1903 = vrot.lane.b32.xlu1 %v5000_v2, %s4310_s26 }
 0x2d8   :  { %v1401_v59 = vpop.permute.xlu0 %1400 }
 0x2d9   :  { %v1434_v53 = vsel %vm1428_vm12, %v1429_v12, %v6984_v46  ;;  %v5362_v6 = vsel %vm58_vm1, %v1401_v59, %v1383_v9  ;;  %v1395_v41 = vpop.permute.xlu1 %1394  ;;  %v3100_v46 = vld [vmem:[#allocation3 + $0x58] sm:$0xff] }
 0x2da   :  { %v6988_v1 = vrot.slane %v5362_v6, 4  ;;  %v5367_v60 = vsel %vm58_vm1, %v1395_v41, %v1401_v59  ;;  %v5371_v5 = vsel %vm58_vm1, %v1389_v11, %v1395_v41  ;;  %1905 = vrot.lane.b32.xlu0 %v4958_v36, %s4310_s26 }
 0x2db   :  { %v6994_v7 = vrot.slane %v5371_v5, 4  ;;  %v6989_v12 = vrot.slane %v5367_v60, 4  ;;  %1907 = vrot.lane.b32.xlu1 %v4974_v49, %s4310_s26 }
 0x2dc   :  { %v1440_v59 = vsel %vm1428_vm12, %v1432_v22, %v6988_v1  ;;  %v1482_v9 = vpop.permute.xlu0 %1481 }
 0x2dd   :  { %v1436_v41 = vsel %vm1428_vm12, %v1430_v17, %v6994_v7  ;;  %v1438_v11 = vsel %vm1428_vm12, %v1431_v21, %v6989_v12  ;;  %v1476_v56 = vpop.permute.xlu1 %1475  ;;  %v4081_v38 = vpack.c.bf16 %v1440_v59, %v3100_v46  ;;  %v3097_v17 = vld [vmem:[#allocation3 + $0x40] sm:$0xff] }
 0x2de   :  { %v5396_v22 = vsel %vm103_vm2, %v1476_v56, %v1482_v9  ;;  %1909 = vrot.lane.b32.xlu0 %v4996_v0, %s4310_s26  ;;  %v4083_v15 = vpack.c.bf16 %v1438_v11, %v3099_v34  ;;  %v3957_v1 = vpack.c.bf16 %v1436_v41, %v3098_v20  ;;  %v3959_v19 = vpack.c.bf16 %v1434_v53, %v3097_v17 }
 0x2df   :  { %1911 = vrot.lane.b32.xlu1 %v4962_v37, %s4310_s26  ;;  %4082 = vmatprep.subr.bf16.mxu1 %v4081_v38 }
 0x2e0   :  { %v1494_v21 = vpop.permute.xlu0 %1493  ;;  %4084 = vmatpush1.bf16.msra.mxu1 %v4083_v15  ;;  %3958 = vmatprep.subr.bf16.mxu0 %v3957_v1 }
 0x2e1   :  { %v5404_v46 = vsel %vm103_vm2, %v1494_v21, %v1476_v56  ;;  %v1488_v59 = vpop.permute.xlu1 %1487  ;;  %3960 = vmatpush1.bf16.msra.mxu0 %v3959_v19 }
 0x2e2   :  { %v5408_v12 = vsel %vm103_vm2, %v1488_v59, %v1494_v21  ;;  %v5412_v34 = vsel %vm103_vm2, %v1482_v9, %v1488_v59  ;;  %1913 = vrot.lane.b32.xlu0 %v4978_v51, %s4310_s26 }
 0x2e3   :  { %1915 = vrot.lane.b32.xlu1 %v5002_v4, %s4310_s26 }
 0x2e4   :  { %v1530_v38 = vpop.permute.xlu0 %1529 }
 0x2e5   :  { %v1524_v1 = vpop.permute.xlu1 %1523 }
 0x2e6   :  { %v5420_v56 = vsel %vm148_vm3, %v1524_v1, %v1530_v38  ;;  %1941 = vrot.lane.b32.xlu0 %v4956_v35, %s4311_s27 }
 0x2e7   :  { %v6990_v53 = vrot.slane %v5420_v56, 4  ;;  %1943 = vrot.lane.b32.xlu1 %v4972_v48, %s4311_s27 }
 0x2e8   :  { %v1542_v9 = vpop.permute.xlu0 %1541 }
 0x2e9   :  { %v5432_v41 = vsel %vm1428_vm12, %v1569_v31, %v6990_v53  ;;  %v5436_v11 = vsel %vm148_vm3, %v1542_v9, %v1524_v1  ;;  %v1536_v20 = vpop.permute.xlu1 %1535 }
 0x2ea   :  { %v6991_v15 = vrot.slane %v5436_v11, 4  ;;  %v5441_v17 = vsel %vm148_vm3, %v1536_v20, %v1542_v9  ;;  %v5445_v19 = vsel %vm148_vm3, %v1530_v38, %v1536_v20  ;;  %1945 = vrot.lane.b32.xlu0 %v4994_v63, %s4311_s27  ;;  %v7019_v38 = vrot.slane %v5189_v32, 4 }
 0x2eb   :  { %v6993_v30 = vrot.slane %v5445_v19, 4  ;;  %v6992_v31 = vrot.slane %v5441_v17, 4  ;;  %1947 = vrot.lane.b32.xlu1 %v4960_v40, %s4311_s27  ;;  %v7020_v9 = vrot.slane %v5194_v8, 4 }
 0x2ec   :  { %v5458_v21 = vsel %vm1428_vm12, %v1572_v39, %v6991_v15  ;;  %v1622_v59 = vpop.permute.xlu0 %1621 }
 0x2ed   :  { %v5465_v1 = vsel %vm1428_vm12, %v7019_v38, %v6993_v30  ;;  %v5472_v20 = vsel %vm1428_vm12, %v7020_v9, %v6992_v31  ;;  %v1616_v53 = vpop.permute.xlu1 %1615 }
 0x2ee   :  { %v5476_v10 = vsel %vm193_vm4, %v1616_v53, %v1622_v59  ;;  %1949 = vrot.lane.b32.xlu0 %v4976_v50, %s4311_s27 }
 0x2ef   :  { %1951 = vrot.lane.b32.xlu1 %v5000_v2, %s4311_s27 }
 0x2f0   :  { %v1634_v32 = vpop.permute.xlu0 %1633 }
 0x2f1   :  { %v5484_v39 = vsel %vm193_vm4, %v1634_v32, %v1616_v53  ;;  %v1628_v8 = vpop.permute.xlu1 %1627 }
 0x2f2   :  { %v5488_v38 = vsel %vm193_vm4, %v1628_v8, %v1634_v32  ;;  %v5492_v9 = vsel %vm193_vm4, %v1622_v59, %v1628_v8  ;;  %1953 = vrot.lane.b32.xlu0 %v4958_v36, %s4311_s27  ;;  %v7021_v8 = vrot.slane %v5238_v55, 4 }
 0x2f3   :  { %1955 = vrot.lane.b32.xlu1 %v4974_v49, %s4311_s27 }
 0x2f4   :  { %v1670_v15 = vpop.permute.xlu0 %1669 }
 0x2f5   :  { %v1664_v31 = vpop.permute.xlu1 %1663 }
 0x2f6   :  { %v5500_v53 = vsel %vm238_vm5, %v1664_v31, %v1670_v15  ;;  %1957 = vrot.lane.b32.xlu0 %v4996_v0, %s4311_s27 }
 0x2f7   :  { %v6997_v32 = vrot.slane %v5500_v53, 4  ;;  %1959 = vrot.lane.b32.xlu1 %v4962_v37, %s4311_s27 }
 0x2f8   :  { %v1682_v59 = vpop.permute.xlu0 %1681 }
 0x2f9   :  { %v5512_v30 = vsel %vm1428_vm12, %v7021_v8, %v6997_v32  ;;  %v5516_v7 = vsel %vm238_vm5, %v1682_v59, %v1664_v31  ;;  %v1676_v13 = vpop.permute.xlu1 %1675  ;;  %v7024_v31 = vrot.slane %v5258_v62, 4 }
 0x2fa   :  { %7022 = vst [vmem:[#allocation10_spill] sm:$0xff] %v5516_v7  ;;  %v6999_v18 = vrot.slane %v5516_v7, 4  ;;  %v5521_v23 = vsel %vm238_vm5, %v1676_v13, %v1682_v59  ;;  %v5525_v3 = vsel %vm238_vm5, %v1670_v15, %v1676_v13  ;;  %1961 = vrot.lane.b32.xlu0 %v4978_v51, %s4311_s27  ;;  %v7025_v13 = vrot.slane %v5249_v58, 4 }
 0x2fb   :  { %7023 = vst [vmem:[#allocation11_spill] sm:$0xff] %v5521_v23  ;;  %v7001_v55 = vrot.slane %v5525_v3, 4  ;;  %v7000_v8 = vrot.slane %v5521_v23, 4  ;;  %1963 = vrot.lane.b32.xlu1 %v5002_v4, %s4311_s27 }
 0x2fc   :  { %v5538_v59 = vsel %vm1428_vm12, %v7024_v31, %v6999_v18  ;;  %v1762_v32 = vpop.permute.xlu0 %1761 }
 0x2fd   :  { %v5545_v15 = vsel %vm1428_vm12, %v7025_v13, %v7001_v55  ;;  %v5552_v16 = vsel %vm1428_vm12, %v7026_v29, %v7000_v8  ;;  %v1756_v7 = vpop.permute.xlu1 %1755 }
 0x2fe   :  { %v5556_v62 = vsel %vm283_vm6, %v1756_v7, %v1762_v32  ;;  %2033 = vrot.lane.b32.xlu0 %v4956_v35, %s4312_s28 }
 0x2ff   :  { %7027 = vst [vmem:[#allocation12_spill] sm:$0xff] %v5556_v62  ;;  %2039 = vrot.lane.b32.xlu1 %v4960_v40, %s4312_s28 }
 0x300   :  { %v1774_v58 = vpop.permute.xlu0 %1773 }
 0x301   :  { %v5564_v31 = vsel %vm283_vm6, %v1774_v58, %v1756_v7  ;;  %v1768_v61 = vpop.permute.xlu1 %1767 }
 0x302   :  { %7028 = vst [vmem:[#allocation13_spill] sm:$0xff] %v5564_v31  ;;  %v5568_v29 = vsel %vm283_vm6, %v1768_v61, %v1774_v58  ;;  %v5572_v13 = vsel %vm283_vm6, %v1762_v32, %v1768_v61  ;;  %2045 = vrot.lane.b32.xlu0 %v4958_v36, %s4312_s28  ;;  %v7031_v61 = vrot.slane %v5298_v33, 4 }
 0x303   :  { %7029 = vst [vmem:[#allocation14_spill] sm:$0xff] %v5568_v29  ;;  %7030 = vst [vmem:[#allocation15_spill] sm:$0xff] %v5572_v13  ;;  %2051 = vrot.lane.b32.xlu1 %v4962_v37, %s4312_s28 }
 0x304   :  { %v1810_v18 = vpop.permute.xlu0 %1809 }
 0x305   :  { %v1804_v8 = vpop.permute.xlu1 %1803 }
 0x306   :  { %v5580_v7 = vsel %vm328_vm7, %v1804_v8, %v1810_v18  ;;  %2081 = vrot.lane.b32.xlu0 %v4956_v35, %s4313_s29 }
 0x307   :  { %v7003_v58 = vrot.slane %v5580_v7, 4  ;;  %2087 = vrot.lane.b32.xlu1 %v4960_v40, %s4313_s29 }
 0x308   :  { %v1822_v32 = vpop.permute.xlu0 %1821 }
 0x309   :  { %v5592_v55 = vsel %vm1428_vm12, %v7031_v61, %v7003_v58  ;;  %v5596_v29 = vsel %vm328_vm7, %v1822_v32, %v1804_v8  ;;  %v1816_v31 = vpop.permute.xlu1 %1815  ;;  %v7034_v8 = vrot.slane %v5318_v57, 4 }
 0x30a   :  { %7032 = vst [vmem:[#allocation16_spill] sm:$0xff] %v5592_v55  ;;  %7033 = vst [vmem:[#allocation17_spill] sm:$0xff] %v5596_v29  ;;  %v7004_v62 = vrot.slane %v5596_v29, 4  ;;  %v5601_v13 = vsel %vm328_vm7, %v1816_v31, %v1822_v32  ;;  %v5605_v23 = vsel %vm328_vm7, %v1810_v18, %v1816_v31  ;;  %2093 = vrot.lane.b32.xlu0 %v4958_v36, %s4313_s29  ;;  %v7036_v18 = vrot.slane %v5309_v44, 4 }
 0x30b   :  { %v7006_v33 = vrot.slane %v5605_v23, 4  ;;  %v7005_v61 = vrot.slane %v5601_v13, 4  ;;  %2099 = vrot.lane.b32.xlu1 %v4962_v37, %s4313_s29  ;;  %v7037_v31 = vrot.slane %v5314_v54, 4 }
 0x30c   :  { %v5618_v32 = vsel %vm1428_vm12, %v7034_v8, %v7004_v62  ;;  %v1385_v58 = vpop.permute.xlu0 %1384 }
 0x30d   :  { %7035 = vst [vmem:[#allocation18_spill] sm:$0xff] %v5618_v32  ;;  %v5625_v36 = vsel %vm1428_vm12, %v7036_v18, %v7006_v33  ;;  %v5632_v37 = vsel %vm1428_vm12, %v7037_v31, %v7005_v61  ;;  %v5634_v55 = vpop.permute.xlu1 %1895  ;;  %v7040_v61 = vrot.slane %v5348_v42, 4 }
 0x30e   :  { %7038 = vst [vmem:[#allocation19_spill] sm:$0xff] %v5632_v37  ;;  %7039 = vst [vmem:[#allocation20_spill] sm:$0xff] %v5634_v55  ;;  %2035 = vrot.lane.b32.xlu0 %v4972_v48, %s4312_s28  ;;  %v7041_v37 = vrot.slane %v5371_v5, 4 }
 0x30f   :  { %2037 = vrot.lane.b32.xlu1 %v4994_v63, %s4312_s28 }
 0x310   :  { %v1397_v57 = vpop.permute.xlu0 %1396 }
 0x311   :  { %v1391_v44 = vpop.permute.xlu1 %1390 }
 0x312   :  { %v1409_v8 = vsel %vm58_vm1, %v1391_v44, %v1397_v57  ;;  %v1412_v18 = vsel %vm58_vm1, %v1385_v58, %v1391_v44  ;;  %2041 = vrot.lane.b32.xlu0 %v4976_v50, %s4312_s28 }
 0x313   :  { %v1441_v54 = vrot.slane %v1412_v18, 4  ;;  %v1443_v31 = vrot.slane %v1409_v8, 4  ;;  %2043 = vrot.lane.b32.xlu1 %v5000_v2, %s4312_s28 }
 0x314   :  { %v1478_v62 = vpop.permute.xlu0 %1477 }
 0x315   :  { %v1442_v33 = vsel %vm1428_vm12, %v7040_v61, %v1441_v54  ;;  %v1444_v32 = vsel %vm1428_vm12, %v7041_v37, %v1443_v31  ;;  %v1403_v55 = vpop.permute.xlu1 %1402  ;;  %v7042_v37 = vrot.slane %v5367_v60, 4 }
 0x316   :  { %v1406_v44 = vsel %vm58_vm1, %v1397_v57, %v1403_v55  ;;  %v1415_v18 = vsel %vm58_vm1, %v1403_v55, %v1385_v58  ;;  %2047 = vrot.lane.b32.xlu0 %v4974_v49, %s4312_s28  ;;  %v3961_v8 = vpack.c.bf16 %v5162_v26, %v1444_v32  ;;  %v3963_v42 = vpack.c.bf16 %v5154_v25, %v1442_v33 }
 0x317   :  { %v1445_v29 = vrot.slane %v1406_v44, 4  ;;  %v1447_v61 = vrot.slane %v1415_v18, 4  ;;  %2049 = vrot.lane.b32.xlu1 %v4996_v0, %s4312_s28  ;;  %v7043_v55 = vrot.slane %v5362_v6, 4  ;;  %vm7073_vm1 = vcmp.lt.s32.totalorder %v4499_v14, 94 }
 0x318   :  { %v1490_v5 = vpop.permute.xlu0 %1489  ;;  %3962 = vmatprep.subr.bf16.mxu0 %v3961_v8 }
 0x319   :  { %v1446_v57 = vsel %vm1428_vm12, %v7042_v37, %v1445_v29  ;;  %v1448_v58 = vsel %vm1428_vm12, %v7043_v55, %v1447_v61  ;;  %v1484_v54 = vpop.permute.xlu1 %1483  ;;  %3964 = vmatpush1.bf16.msra.mxu0 %v3963_v42  ;;  %v7044_v55 = vrot.slane %v5420_v56, 4 }
 0x31a   :  { %v1502_v25 = vsel %vm103_vm2, %v1484_v54, %v1490_v5  ;;  %v1505_v26 = vsel %vm103_vm2, %v1478_v62, %v1484_v54  ;;  %2053 = vrot.lane.b32.xlu0 %v4978_v51, %s4312_s28  ;;  %v4085_v33 = vpack.c.bf16 %v5170_v28, %v1448_v58  ;;  %v4087_v60 = vpack.c.bf16 %v5166_v27, %v1446_v57 }
 0x31b   :  { %1517 = vst [vmem:[#allocation3 + $0xe0] sm:$0xf] %v1505_v26  ;;  %1518 = vst [vmem:[#allocation3 + $0xe8] sm:$0xf] %v1502_v25  ;;  %2055 = vrot.lane.b32.xlu1 %v5002_v4, %s4312_s28  ;;  %v7045_v54 = vrot.slane %v5445_v19, 4 }
 0x31c   :  { %v1526_v6 = vpop.permute.xlu0 %1525  ;;  %4086 = vmatprep.subr.bf16.mxu1 %v4085_v33 }
 0x31d   :  { %v1496_v29 = vpop.permute.xlu1 %1495  ;;  %4088 = vmatpush1.bf16.msra.mxu1 %v4087_v60 }
 0x31e   :  { %v1499_v32 = vsel %vm103_vm2, %v1490_v5, %v1496_v29  ;;  %v1508_v31 = vsel %vm103_vm2, %v1496_v29, %v1478_v62  ;;  %2083 = vrot.lane.b32.xlu0 %v4972_v48, %s4313_s29  ;;  %vm7074_vm2 = vmmov %vm7073_vm1 }
 0x31f   :  { %1519 = vst [vmem:[#allocation3 + $0xf0] sm:$0xf] %v1499_v32  ;;  %1520 = vst [vmem:[#allocation3 + $0xf8] sm:$0xf] %v1508_v31  ;;  %2085 = vrot.lane.b32.xlu1 %v4994_v63, %s4313_s29 }
 0x320   :  { %v1538_v27 = vpop.permute.xlu0 %1537 }
 0x321   :  { %v1532_v28 = vpop.permute.xlu1 %1531 }
 0x322   :  { %v1550_v44 = vsel %vm148_vm3, %v1532_v28, %v1538_v27  ;;  %v1553_v18 = vsel %vm148_vm3, %v1526_v6, %v1532_v28  ;;  %2089 = vrot.lane.b32.xlu0 %v4976_v50, %s4313_s29  ;;  %v3118_v62 = vld [vmem:[#allocation3 + $0xe8] sm:$0xff]  ;;  %v3117_v8 = vld [vmem:[#allocation3 + $0xe0] sm:$0xff]  ;;  %v7047_v28 = vrot.slane %v5436_v11, 4 }
 0x323   :  { %v1581_v42 = vrot.slane %v1553_v18, 4  ;;  %v1583_v61 = vrot.slane %v1550_v44, 4  ;;  %2091 = vrot.lane.b32.xlu1 %v5000_v2, %s4313_s29  ;;  %v3965_v5 = vpack.c.bf16 %v3118_v62, %v5412_v34  ;;  %v3967_v37 = vpack.c.bf16 %v3117_v8, %v5396_v22 }
 0x324   :  { %v1618_v57 = vpop.permute.xlu0 %1617  ;;  %v3973_v62 = vpack.c.bf16 %v5492_v9, %v5222_v45  ;;  %v3975_v9 = vpack.c.bf16 %v5476_v10, %v5214_v43  ;;  %v4097_v8 = vpack.c.bf16 %v5484_v39, %v5230_v52 }
 0x325   :  { %v1582_v58 = vsel %vm1428_vm12, %v7044_v55, %v1581_v42  ;;  %v1584_v25 = vsel %vm1428_vm12, %v7045_v54, %v1583_v61  ;;  %v1544_v26 = vpop.permute.xlu1 %1543  ;;  %3966 = vmatprep.subr.bf16.mxu0 %v3965_v5  ;;  %v7049_v55 = vrot.slane %v5525_v3, 4 }
 0x326   :  { %v1547_v33 = vsel %vm148_vm3, %v1538_v27, %v1544_v26  ;;  %v1556_v60 = vsel %vm148_vm3, %v1544_v26, %v1526_v6  ;;  %2095 = vrot.lane.b32.xlu0 %v4974_v49, %s4313_s29  ;;  %3968 = vmatpush1.bf16.msra.mxu0 %v3967_v37  ;;  %v3120_v22 = vld [vmem:[#allocation3 + $0xf8] sm:$0xff]  ;;  %v3119_v34 = vld [vmem:[#allocation3 + $0xf0] sm:$0xff]  ;;  %v3969_v56 = vpack.c.bf16 %v1584_v25, %v5465_v1  ;;  %v7046_v6 = vrot.slane %v5441_v17, 4  ;;  %vm7075_vm3 = vmmov %vm7073_vm1 }
 0x327   :  { %v1585_v29 = vrot.slane %v1547_v33, 4  ;;  %v1587_v19 = vrot.slane %v1556_v60, 4  ;;  %2097 = vrot.lane.b32.xlu1 %v4996_v0, %s4313_s29  ;;  %v4089_v32 = vpack.c.bf16 %v3120_v22, %v5404_v46  ;;  %v4091_v31 = vpack.c.bf16 %v3119_v34, %v5408_v12  ;;  %v5773_v33 = vld [vmem:[#allocation3 + $0x30] sm:$0xff] }
 0x328   :  { %v1630_v27 = vpop.permute.xlu0 %1629  ;;  %3970 = vmatprep.subr.bf16.mxu0 %v3969_v56  ;;  %v3971_v18 = vpack.c.bf16 %v1582_v58, %v5432_v41  ;;  %v7048_v37 = vrot.slane %v5500_v53, 4  ;;  %v7050_v56 = vld [vmem:[#allocation11_spill] sm:$0xff] }
 0x329   :  { %v1586_v49 = vsel %vm1428_vm12, %v7046_v6, %v1585_v29  ;;  %v1588_v44 = vsel %vm1428_vm12, %v7047_v28, %v1587_v19  ;;  %v1624_v1 = vpop.permute.xlu1 %1623  ;;  %4090 = vmatprep.subr.bf16.mxu1 %v4089_v32  ;;  %v7051_v29 = vrot.slane %v7050_v56, 4  ;;  %v7052_v32 = vld [vmem:[#allocation10_spill] sm:$0xff]  ;;  %v7054_v6 = vld [vmem:[#allocation4_spill] sm:$0xff]  ;;  %v7063_v56 = vrot.slane %v5601_v13, 4 }
 0x32a   :  { %v1642_v12 = vsel %vm193_vm4, %v1624_v1, %v1630_v27  ;;  %v1645_v46 = vsel %vm193_vm4, %v1618_v57, %v1624_v1  ;;  %2101 = vrot.lane.b32.xlu0 %v4978_v51, %s4313_s29  ;;  %4092 = vmatpush1.bf16.msra.mxu1 %v4091_v31  ;;  %v4093_v11 = vpack.c.bf16 %v1588_v44, %v5458_v21  ;;  %v7053_v31 = vrot.slane %v7052_v32, 4  ;;  %v7055_v44 = vld [vmem:[#allocation6_spill] sm:$0xff] }
 0x32b   :  { %1657 = vst [vmem:[#allocation3 + $0x180] sm:$0xf] %v1645_v46  ;;  %1658 = vst [vmem:[#allocation3 + $0x188] sm:$0xf] %v1642_v12  ;;  %2103 = vrot.lane.b32.xlu1 %v5002_v4, %s4313_s29  ;;  %3972 = vmatpush1.bf16.msra.mxu0 %v3971_v18  ;;  %v4095_v45 = vpack.c.bf16 %v1586_v49, %v5472_v20  ;;  %v4099_v20 = vpack.c.bf16 %v5488_v38, %v5226_v47  ;;  %v5795_v18 = vld [vmem:[#allocation3 + $0x38] sm:$0xff]  ;;  %v7056_v12 = vld [vmem:[#allocation5_spill] sm:$0xff] }
 0x32c   :  { %v1666_v41 = vpop.permute.xlu0 %1665  ;;  %3974 = vmatprep.subr.bf16.mxu0 %v3973_v62  ;;  %4094 = vmatprep.subr.bf16.mxu1 %v4093_v11  ;;  %v7068_v13 = vld [vmem:[#allocation18_spill] sm:$0xff] }
 0x32d   :  { %v1636_v17 = vpop.permute.xlu1 %1635 }
 0x32e   :  { %v1639_v51 = vsel %vm193_vm4, %v1630_v27, %v1636_v17  ;;  %v1648_v21 = vsel %vm193_vm4, %v1636_v17, %v1618_v57  ;;  %2173 = vrot.lane.b32.xlu0 %v4956_v35, %s4314_s30  ;;  %4096 = vmatpush1.bf16.msra.mxu1 %v4095_v45  ;;  %v5804_v17 = vld [vmem:[#allocation3] sm:$0xff]  ;;  %vm7076_vm4 = vmmov %vm7073_vm1 }
 0x32f   :  { %1659 = vst [vmem:[#allocation3 + $0x190] sm:$0xf] %v1639_v51  ;;  %1660 = vst [vmem:[#allocation3 + $0x198] sm:$0xf] %v1648_v21  ;;  %2175 = vrot.lane.b32.xlu1 %v4972_v48, %s4314_s30  ;;  %3976 = vmatpush1.bf16.msra.mxu0 %v3975_v9  ;;  %v5808_v9 = vld [vmem:[#allocation3 + $0x20] sm:$0xff] }
 0x330   :  { %v1678_v43 = vpop.permute.xlu0 %1677  ;;  %4098 = vmatprep.subr.bf16.mxu1 %v4097_v8 }
 0x331   :  { %v1672_v10 = vpop.permute.xlu1 %1671 }
 0x332   :  { %v1690_v42 = vsel %vm238_vm5, %v1672_v10, %v1678_v43  ;;  %v1693_v35 = vsel %vm238_vm5, %v1666_v41, %v1672_v10  ;;  %2179 = vrot.lane.b32.xlu0 %v4960_v40, %s4314_s30  ;;  %v3138_v52 = vld [vmem:[#allocation3 + $0x188] sm:$0xff]  ;;  %v3137_v39 = vld [vmem:[#allocation3 + $0x180] sm:$0xff]  ;;  %4100 = vmatpush1.bf16.msra.mxu1 %v4099_v20 }
 0x333   :  { %v1721_v48 = vrot.slane %v1693_v35, 4  ;;  %v1723_v61 = vrot.slane %v1690_v42, 4  ;;  %2181 = vrot.lane.b32.xlu1 %v4976_v50, %s4314_s30  ;;  %v3977_v47 = vpack.c.bf16 %v5545_v15, %v3138_v52  ;;  %v3979_v38 = vpack.c.bf16 %v5512_v30, %v3137_v39  ;;  %v5768_v15 = vld [vmem:[#allocation3 + $0x10] sm:$0xff]  ;;  %v5816_v20 = vld [vmem:[#allocation3 + $0x8] sm:$0xff] }
 0x334   :  { %v1758_v5 = vpop.permute.xlu0 %1757  ;;  %v5820_v39 = vld [vmem:[#allocation3 + $0x28] sm:$0xff] }
 0x335   :  { %v1722_v57 = vsel %vm1428_vm12, %v7048_v37, %v1721_v48  ;;  %v1724_v40 = vsel %vm1428_vm12, %v7049_v55, %v1723_v61  ;;  %v1684_v58 = vpop.permute.xlu1 %1683  ;;  %3978 = vmatprep.subr.bf16.mxu0 %v3977_v47  ;;  %v7057_v48 = vld [vmem:[#allocation15_spill] sm:$0xff]  ;;  %v7058_v47 = vld [vmem:[#allocation12_spill] sm:$0xff]  ;;  %v7059_v37 = vrot.slane %v5580_v7, 4  ;;  %v7060_v55 = vrot.slane %v5605_v23, 4 }
 0x336   :  { %v1687_v54 = vsel %vm238_vm5, %v1678_v43, %v1684_v58  ;;  %v1696_v50 = vsel %vm238_vm5, %v1684_v58, %v1666_v41  ;;  %2185 = vrot.lane.b32.xlu0 %v5768_v15, %s4314_s30  ;;  %3980 = vmatpush1.bf16.msra.mxu0 %v3979_v38  ;;  %v3140_v30 = vld [vmem:[#allocation3 + $0x198] sm:$0xff]  ;;  %v3139_v53 = vld [vmem:[#allocation3 + $0x190] sm:$0xff]  ;;  %v3981_v3 = vpack.c.bf16 %v5282_v24, %v1724_v40  ;;  %vm7077_vm5 = vmmov %vm7073_vm1 }
 0x337   :  { %v1725_v25 = vrot.slane %v1687_v54, 4  ;;  %v1727_v26 = vrot.slane %v1696_v50, 4  ;;  %2187 = vrot.lane.b32.xlu1 %v5773_v33, %s4314_s30  ;;  %v4101_v60 = vpack.c.bf16 %v5538_v59, %v3140_v30  ;;  %v4103_v22 = vpack.c.bf16 %v5552_v16, %v3139_v53  ;;  %v5790_v59 = vld [vmem:[#allocation3 + $0x18] sm:$0xff] }
 0x338   :  { %v1770_v34 = vpop.permute.xlu0 %1769  ;;  %3982 = vmatprep.subr.bf16.mxu0 %v3981_v3  ;;  %v3983_v49 = vpack.c.bf16 %v7054_v6, %v1722_v57  ;;  %v7067_v6 = vld [vmem:[#allocation16_spill] sm:$0xff] }
 0x339   :  { %v1726_v19 = vsel %vm1428_vm12, %v7051_v29, %v1725_v25  ;;  %v1728_v24 = vsel %vm1428_vm12, %v7053_v31, %v1727_v26  ;;  %v1764_v27 = vpop.permute.xlu1 %1763  ;;  %4102 = vmatprep.subr.bf16.mxu1 %v4101_v60  ;;  %v7061_v25 = vld [vmem:[#allocation13_spill] sm:$0xff]  ;;  %v7062_v60 = vld [vmem:[#allocation14_spill] sm:$0xff] }
 0x33a   :  { %v1782_v28 = vsel %vm283_vm6, %v1764_v27, %v1770_v34  ;;  %v1785_v16 = vsel %vm283_vm6, %v1758_v5, %v1764_v27  ;;  %2191 = vrot.lane.b32.xlu0 %v5790_v59, %s4314_s30  ;;  %4104 = vmatpush1.bf16.msra.mxu1 %v4103_v22  ;;  %v4105_v1 = vpack.c.bf16 %v7055_v44, %v1728_v24 }
 0x33b   :  { %1797 = vst [vmem:[#allocation3 + $0x220] sm:$0xf] %v1785_v16  ;;  %1798 = vst [vmem:[#allocation3 + $0x228] sm:$0xf] %v1782_v28  ;;  %2193 = vrot.lane.b32.xlu1 %v5795_v18, %s4314_s30  ;;  %3984 = vmatpush1.bf16.msra.mxu0 %v3983_v49  ;;  %v4107_v46 = vpack.c.bf16 %v7056_v12, %v1726_v19  ;;  %v7064_v19 = vld [vmem:[#allocation17_spill] sm:$0xff]  ;;  %v7070_v12 = vld [vmem:[#allocation8_spill] sm:$0xff] }
 0x33c   :  { %v1806_v62 = vpop.permute.xlu0 %1805  ;;  %4106 = vmatprep.subr.bf16.mxu1 %v4105_v1  ;;  %v7065_v32 = vrot.slane %v7064_v19, 4  ;;  %v7069_v1 = vld [vmem:[#allocation19_spill] sm:$0xff] }
 0x33d   :  { %v1776_v11 = vpop.permute.xlu1 %1775 }
 0x33e   :  { %v1779_v41 = vsel %vm283_vm6, %v1770_v34, %v1776_v11  ;;  %v1788_v45 = vsel %vm283_vm6, %v1776_v11, %v1758_v5  ;;  %2221 = vrot.lane.b32.xlu0 %v5804_v17, %s4315_s6  ;;  %4108 = vmatpush1.bf16.msra.mxu1 %v4107_v46  ;;  %vm7078_vm6 = vmmov %vm7073_vm1 }
 0x33f   :  { %1799 = vst [vmem:[#allocation3 + $0x230] sm:$0xf] %v1779_v41  ;;  %1800 = vst [vmem:[#allocation3 + $0x238] sm:$0xf] %v1788_v45  ;;  %2223 = vrot.lane.b32.xlu1 %v5808_v9, %s4315_s6 }
 0x340   :  { %v1818_v51 = vpop.permute.xlu0 %1817 }
 0x341   :  { %v1812_v21 = vpop.permute.xlu1 %1811 }
 0x342   :  { %v1830_v8 = vsel %vm328_vm7, %v1812_v21, %v1818_v51  ;;  %v1833_v43 = vsel %vm328_vm7, %v1806_v62, %v1812_v21  ;;  %2227 = vrot.lane.b32.xlu0 %v5816_v20, %s4315_s6  ;;  %v3158_v10 = vld [vmem:[#allocation3 + $0x228] sm:$0xff]  ;;  %v3157_v42 = vld [vmem:[#allocation3 + $0x220] sm:$0xff] }
 0x343   :  { %v1861_v35 = vrot.slane %v1833_v43, 4  ;;  %v1863_v52 = vrot.slane %v1830_v8, 4  ;;  %2229 = vrot.lane.b32.xlu1 %v5820_v39, %s4315_s6  ;;  %v3985_v61 = vpack.c.bf16 %v3158_v10, %v7057_v48  ;;  %v3987_v38 = vpack.c.bf16 %v3157_v42, %v7058_v47  ;;  %v7071_v21 = vld [vmem:[#allocation9_spill] sm:$0xff] }
 0x344   :  { %v5826_v5 = vpop.permute.xlu0 %1897  ;;  %v3062_v42 = vld [vmem:[%s6954_s3 + $0x8] sm:$0xff] }
 0x345   :  { %v1862_v57 = vsel %vm1428_vm12, %v7059_v37, %v1861_v35  ;;  %v1864_v40 = vsel %vm1428_vm12, %v7060_v55, %v1863_v52  ;;  %v1824_v58 = vpop.permute.xlu1 %1823  ;;  %3986 = vmatprep.subr.bf16.mxu0 %v3985_v61  ;;  %v7072_v52 = vld [vmem:[#allocation7_spill] sm:$0xff]  ;;  %3481 = vmatprep.mubr.f32.mxu0 %v3062_v42 }
 0x346   :  { %v1827_v54 = vsel %vm328_vm7, %v1818_v51, %v1824_v58  ;;  %v1836_v50 = vsel %vm328_vm7, %v1824_v58, %v1806_v62  ;;  %2233 = vrot.lane.b32.xlu0 %v5768_v15, %s4315_s6  ;;  %3988 = vmatpush1.bf16.msra.mxu0 %v3987_v38  ;;  %v3160_v30 = vld [vmem:[#allocation3 + $0x238] sm:$0xff]  ;;  %v3159_v7 = vld [vmem:[#allocation3 + $0x230] sm:$0xff]  ;;  %v3989_v53 = vpack.c.bf16 %v1864_v40, %v5625_v36  ;;  %v7066_v36 = vld [vmem:[#allocation20_spill] sm:$0xff] }
 0x347   :  { %v1865_v3 = vrot.slane %v1827_v54, 4  ;;  %v1867_v23 = vrot.slane %v1836_v50, 4  ;;  %2235 = vrot.lane.b32.xlu1 %v5773_v33, %s4315_s6  ;;  %v4109_v26 = vpack.c.bf16 %v3160_v30, %v7061_v25  ;;  %v4111_v22 = vpack.c.bf16 %v3159_v7, %v7062_v60  ;;  %3695 = vmatprep.mubr.f32.mxu1 %v3062_v42  ;;  %vm7079_vm7 = vmmov %vm7073_vm1 }
 0x348   :  { %v1902_v34 = vpop.permute.xlu0 %1901  ;;  %3990 = vmatprep.subr.bf16.mxu0 %v3989_v53  ;;  %v3991_v49 = vpack.c.bf16 %v1862_v57, %v7067_v6 }
 0x349   :  { %v1866_v29 = vsel %vm1428_vm12, %v7063_v56, %v1865_v3  ;;  %v1868_v31 = vsel %vm1428_vm12, %v7065_v32, %v1867_v23  ;;  %v1924_v24 = vsel %vm373_vm8, %v7066_v36, %v1902_v34  ;;  %v1904_v27 = vpop.permute.xlu1 %1903  ;;  %4110 = vmatprep.subr.bf16.mxu1 %v4109_v26 }
 0x34a   :  { %v1925_v28 = vsel %vm373_vm8, %v5826_v5, %v1904_v27  ;;  %2239 = vrot.lane.b32.xlu0 %v5790_v59, %s4315_s6  ;;  %4112 = vmatpush1.bf16.msra.mxu1 %v4111_v22  ;;  %v4113_v16 = vpack.c.bf16 %v1868_v31, %v7068_v13  ;;  %v4115_v62 = vpack.c.bf16 %v1866_v29, %v7069_v1 }
 0x34b   :  { %1937 = vst [vmem:[#allocation3 + $0x2c0] sm:$0xf] %v1925_v28  ;;  %2241 = vrot.lane.b32.xlu1 %v5795_v18, %s4315_s6  ;;  %3992 = vmatpush1.bf16.msra.mxu0 %v3991_v49  ;;  %v3995_v8 = vpack.c.bf16 %v1924_v24, %v7071_v21 }
 0x34c   :  { %v1906_v44 = vpop.permute.xlu0 %1905  ;;  %4114 = vmatprep.subr.bf16.mxu1 %v4113_v16 }
 0x34d   :  { %v1920_v46 = vsel %vm373_vm8, %v7070_v12, %v1906_v44  ;;  %v1908_v11 = vpop.permute.xlu1 %1907 }
 0x34e   :  { %v1921_v41 = vsel %vm373_vm8, %v1902_v34, %v1908_v11  ;;  %2177 = vrot.lane.b32.xlu0 %v4994_v63, %s4314_s30  ;;  %4116 = vmatpush1.bf16.msra.mxu1 %v4115_v62 }
 0x34f   :  { %2183 = vrot.lane.b32.xlu1 %v5000_v2, %s4314_s30  ;;  %v3993_v45 = vpack.c.bf16 %v1921_v41, %v1920_v46 }
 0x350   :  { %v1910_v51 = vpop.permute.xlu0 %1909 }
 0x351   :  { %v1922_v43 = vsel %vm373_vm8, %v1904_v27, %v1910_v51  ;;  %v1912_v10 = vpop.permute.xlu1 %1911  ;;  %3994 = vmatprep.subr.bf16.mxu0 %v3993_v45 }
 0x352   :  { %1938 = vst [vmem:[#allocation3 + $0x2c8] sm:$0xf] %v1922_v43  ;;  %v1917_v35 = vsel %vm373_vm8, %v1906_v44, %v1912_v10  ;;  %v1926_v48 = vsel %vm373_vm8, %v1912_v10, %v7072_v52  ;;  %2189 = vrot.lane.b32.xlu0 %v4996_v0, %s4314_s30  ;;  %3996 = vmatpush1.bf16.msra.mxu0 %v3995_v8 }
 0x353   :  { %2195 = vrot.lane.b32.xlu1 %v5002_v4, %s4314_s30 }
 0x354   :  { %v1914_v61 = vpop.permute.xlu0 %1913 }
 0x355   :  { %v1918_v47 = vsel %vm373_vm8, %v1908_v11, %v1914_v61  ;;  %v1927_v38 = vsel %vm373_vm8, %v1914_v61, %v7066_v36  ;;  %v1916_v37 = vpop.permute.xlu1 %1915 }
 0x356   :  { %v1919_v57 = vsel %vm373_vm8, %v1910_v51, %v1916_v37  ;;  %v1928_v55 = vsel %vm373_vm8, %v1916_v37, %v5826_v5  ;;  %2225 = vrot.lane.b32.xlu0 %v4994_v63, %s4315_s6  ;;  %v4117_v40 = vpack.c.bf16 %v1927_v38, %v1926_v48  ;;  %v4119_v58 = vpack.c.bf16 %v1918_v47, %v1917_v35  ;;  %vm7080_vm8 = vmmov %vm7073_vm1 }
 0x357   :  { %1939 = vst [vmem:[#allocation3 + $0x2d0] sm:$0xf] %v1919_v57  ;;  %1940 = vst [vmem:[#allocation3 + $0x2d8] sm:$0xf] %v1928_v55  ;;  %2231 = vrot.lane.b32.xlu1 %v5000_v2, %s4315_s6 }
 0x358   :  { %v1942_v54 = vpop.permute.xlu0 %1941  ;;  %4118 = vmatprep.subr.bf16.mxu1 %v4117_v40 }
 0x359   :  { %v1944_v50 = vpop.permute.xlu1 %1943  ;;  %4120 = vmatpush1.bf16.msra.mxu1 %v4119_v58 }
 0x35a   :  { %2237 = vrot.lane.b32.xlu0 %v4996_v0, %s4315_s6 }
 0x35b   :  { %2243 = vrot.lane.b32.xlu1 %v5002_v4, %s4315_s6 }
 0x35c   :  { %v1946_v5 = vpop.permute.xlu0 %1945 }
 0x35d   :  { %v1948_v30 = vpop.permute.xlu1 %1947 }
 0x35e   :  { %v1971_v7 = vsel %vm418_vm9, %v1942_v54, %v1948_v30  ;;  %2313 = vrot.lane.b32.xlu0 %v5804_v17, %s4316_s7 }
 0x35f   :  { %v1989_v53 = vrot.slane %v1971_v7, 4  ;;  %2319 = vrot.lane.b32.xlu1 %v5816_v20, %s4316_s7 }
 0x360   :  { %v1950_v3 = vpop.permute.xlu0 %1949 }
 0x361   :  { %2021 = vst [vmem:[#allocation3 + $0x2c0] sm:$0xf0] %v1989_v53  ;;  %v1972_v23 = vsel %vm418_vm9, %v1944_v50, %v1950_v3  ;;  %v1952_v25 = vpop.permute.xlu1 %1951 }
 0x362   :  { %v1993_v26 = vrot.slane %v1972_v23, 4  ;;  %v1973_v60 = vsel %vm418_vm9, %v1946_v5, %v1952_v25  ;;  %2325 = vrot.lane.b32.xlu0 %v5768_v15, %s4316_s7 }
 0x363   :  { %v2001_v22 = vrot.slane %v1973_v60, 4  ;;  %2331 = vrot.lane.b32.xlu1 %v5790_v59, %s4316_s7 }
 0x364   :  { %v1994_v34 = vsel %vm1428_vm12, %v1989_v53, %v1993_v26  ;;  %v1954_v56 = vpop.permute.xlu0 %1953 }
 0x365   :  { %v5922_v29 = vsel %vm1428_vm12, %v1993_v26, %v2001_v22  ;;  %v1968_v19 = vsel %vm418_vm9, %v1948_v30, %v1954_v56  ;;  %v1956_v32 = vpop.permute.xlu1 %1955 }
 0x366   :  { %v1990_v31 = vrot.slane %v1968_v19, 4  ;;  %v1969_v36 = vsel %vm418_vm9, %v1950_v3, %v1956_v32  ;;  %2361 = vrot.lane.b32.xlu0 %v5804_v17, %s4318_s8 }
 0x367   :  { %v1995_v24 = vrot.slane %v1969_v36, 4  ;;  %2367 = vrot.lane.b32.xlu1 %v5816_v20, %s4318_s8 }
 0x368   :  { %2022 = vst [vmem:[#allocation3 + $0x2c8] sm:$0xf0] %v1990_v31  ;;  %v1958_v27 = vpop.permute.xlu0 %1957  ;;  %v3177_v10 = vld [vmem:[#allocation3 + $0x2c0] sm:$0xff] }
 0x369   :  { %v1996_v6 = vsel %vm1428_vm12, %v1990_v31, %v1995_v24  ;;  %v1970_v49 = vsel %vm418_vm9, %v1952_v25, %v1958_v27  ;;  %v1960_v28 = vpop.permute.xlu1 %1959  ;;  %v3999_v40 = vpack.c.bf16 %v1994_v34, %v3177_v10 }
 0x36a   :  { %v2003_v13 = vrot.slane %v1970_v49, 4  ;;  %v1965_v16 = vsel %vm418_vm9, %v1954_v56, %v1960_v28  ;;  %v1974_v44 = vsel %vm418_vm9, %v1960_v28, %v1942_v54  ;;  %2373 = vrot.lane.b32.xlu0 %v5768_v15, %s4318_s8 }
 0x36b   :  { %v1991_v1 = vrot.slane %v1965_v16, 4  ;;  %v1992_v62 = vrot.slane %v1974_v44, 4  ;;  %2379 = vrot.lane.b32.xlu1 %v5790_v59, %s4318_s8 }
 0x36c   :  { %v2004_v12 = vsel %vm1428_vm12, %v1995_v24, %v2003_v13  ;;  %v1962_v46 = vpop.permute.xlu0 %1961 }
 0x36d   :  { %2023 = vst [vmem:[#allocation3 + $0x2d0] sm:$0xf0] %v1991_v1  ;;  %2024 = vst [vmem:[#allocation3 + $0x2d8] sm:$0xf0] %v1992_v62  ;;  %v1966_v11 = vsel %vm418_vm9, %v1956_v32, %v1962_v46  ;;  %v1975_v41 = vsel %vm418_vm9, %v1962_v46, %v1944_v50  ;;  %v1964_v45 = vpop.permute.xlu1 %1963 }
 0x36e   :  { %v1997_v51 = vrot.slane %v1966_v11, 4  ;;  %v1999_v21 = vrot.slane %v1975_v41, 4  ;;  %v1967_v8 = vsel %vm418_vm9, %v1958_v27, %v1964_v45  ;;  %v1976_v43 = vsel %vm418_vm9, %v1964_v45, %v1946_v5  ;;  %2315 = vrot.lane.b32.xlu0 %v5808_v9, %s4316_s7 }
 0x36f   :  { %v2005_v42 = vrot.slane %v1967_v8, 4  ;;  %v2007_v35 = vrot.slane %v1976_v43, 4  ;;  %2317 = vrot.lane.b32.xlu1 %v4994_v63, %s4316_s7  ;;  %v3178_v52 = vld [vmem:[#allocation3 + $0x2c8] sm:$0xff]  ;;  %vm7081_vm9 = vcmp.lt.s32.totalorder %v4499_v14, 93 }
 0x370   :  { %v1998_v48 = vsel %vm1428_vm12, %v1991_v1, %v1997_v51  ;;  %v2000_v61 = vsel %vm1428_vm12, %v1992_v62, %v1999_v21  ;;  %v2034_v47 = vpop.permute.xlu0 %2033  ;;  %v3997_v38 = vpack.c.bf16 %v1996_v6, %v3178_v52  ;;  %vm7084_vm13 = vmmov %vm7081_vm9 }
 0x371   :  { %v2006_v37 = vsel %vm1428_vm12, %v1997_v51, %v2005_v42  ;;  %v2008_v57 = vsel %vm1428_vm12, %v1999_v21, %v2007_v35  ;;  %v2040_v55 = vpop.permute.xlu1 %2039  ;;  %vm7085_vm14 = vmmov %vm7081_vm9 }
 0x372   :  { %v2063_v58 = vsel %vm463_vm10, %v2034_v47, %v2040_v55  ;;  %2321 = vrot.lane.b32.xlu0 %v5820_v39, %s4316_s7  ;;  %3998 = vmatprep.subr.bf16.mxu0 %v3997_v38  ;;  %vm7086_vm0 = vmmov %vm7081_vm9 }
 0x373   :  { %2323 = vrot.lane.b32.xlu1 %v5000_v2, %s4316_s7  ;;  %4000 = vmatpush1.bf16.msra.mxu0 %v3999_v40  ;;  %v4003_v60 = vpack.c.bf16 %v2063_v58, %v5922_v29 }
 0x374   :  { %v2046_v54 = vpop.permute.xlu0 %2045  ;;  %v3180_v50 = vld [vmem:[#allocation3 + $0x2d8] sm:$0xff]  ;;  %v3179_v5 = vld [vmem:[#allocation3 + $0x2d0] sm:$0xff] }
 0x375   :  { %v2060_v30 = vsel %vm463_vm10, %v2040_v55, %v2046_v54  ;;  %v2052_v7 = vpop.permute.xlu1 %2051  ;;  %v4121_v53 = vpack.c.bf16 %v2000_v61, %v3180_v50  ;;  %v4123_v3 = vpack.c.bf16 %v1998_v48, %v3179_v5 }
 0x376   :  { %v2057_v23 = vsel %vm463_vm10, %v2046_v54, %v2052_v7  ;;  %v2066_v25 = vsel %vm463_vm10, %v2052_v7, %v2034_v47  ;;  %2327 = vrot.lane.b32.xlu0 %v5773_v33, %s4316_s7  ;;  %v4001_v26 = vpack.c.bf16 %v2060_v30, %v2004_v12 }
 0x377   :  { %2329 = vrot.lane.b32.xlu1 %v4996_v0, %s4316_s7  ;;  %4122 = vmatprep.subr.bf16.mxu1 %v4121_v53  ;;  %v4125_v22 = vpack.c.bf16 %v2066_v25, %v2008_v57  ;;  %v4127_v32 = vpack.c.bf16 %v2057_v23, %v2006_v37 }
 0x378   :  { %v2082_v34 = vpop.permute.xlu0 %2081  ;;  %4124 = vmatpush1.bf16.msra.mxu1 %v4123_v3  ;;  %4002 = vmatprep.subr.bf16.mxu0 %v4001_v26 }
 0x379   :  { %v2088_v56 = vpop.permute.xlu1 %2087  ;;  %4004 = vmatpush1.bf16.msra.mxu0 %v4003_v60  ;;  %4126 = vmatprep.subr.bf16.mxu1 %v4125_v22 }
 0x37a   :  { %v5979_v19 = vsel %vm508_vm11, %v2082_v34, %v2088_v56  ;;  %2333 = vrot.lane.b32.xlu0 %v5795_v18, %s4316_s7 }
 0x37b   :  { %v2129_v31 = vrot.slane %v5979_v19, 4  ;;  %2335 = vrot.lane.b32.xlu1 %v5002_v4, %s4316_s7 }
 0x37c   :  { %v2094_v29 = vpop.permute.xlu0 %2093  ;;  %4128 = vmatpush1.bf16.msra.mxu1 %v4127_v32 }
 0x37d   :  { %2161 = vst [vmem:[#allocation3 + $0x360] sm:$0xf0] %v2129_v31  ;;  %v5990_v36 = vsel %vm508_vm11, %v2088_v56, %v2094_v29  ;;  %v2100_v24 = vpop.permute.xlu1 %2099 }
 0x37e   :  { %v2130_v27 = vrot.slane %v5990_v36, 4  ;;  %v5995_v6 = vsel %vm508_vm11, %v2094_v29, %v2100_v24  ;;  %v5999_v49 = vsel %vm508_vm11, %v2100_v24, %v2082_v34  ;;  %2363 = vrot.lane.b32.xlu0 %v5808_v9, %s4318_s8 }
 0x37f   :  { %v2131_v28 = vrot.slane %v5995_v6, 4  ;;  %v2132_v13 = vrot.slane %v5999_v49, 4  ;;  %2365 = vrot.lane.b32.xlu1 %v4994_v63, %s4318_s8 }
 0x380   :  { %2162 = vst [vmem:[#allocation3 + $0x368] sm:$0xf0] %v2130_v27  ;;  %v2036_v16 = vpop.permute.xlu0 %2035 }
 0x381   :  { %2163 = vst [vmem:[#allocation3 + $0x370] sm:$0xf0] %v2131_v28  ;;  %2164 = vst [vmem:[#allocation3 + $0x378] sm:$0xf0] %v2132_v13  ;;  %v2038_v44 = vpop.permute.xlu1 %2037 }
 0x382   :  { %2369 = vrot.lane.b32.xlu0 %v5820_v39, %s4318_s8 }
 0x383   :  { %2371 = vrot.lane.b32.xlu1 %v5000_v2, %s4318_s8 }
 0x384   :  { %v2042_v1 = vpop.permute.xlu0 %2041 }
 0x385   :  { %v2064_v62 = vsel %vm463_vm10, %v2036_v16, %v2042_v1  ;;  %v2044_v12 = vpop.permute.xlu1 %2043 }
 0x386   :  { %v2065_v46 = vsel %vm463_vm10, %v2038_v44, %v2044_v12  ;;  %2375 = vrot.lane.b32.xlu0 %v5773_v33, %s4318_s8 }
 0x387   :  { %2077 = vst [vmem:[#allocation3 + $0x360] sm:$0xf] %v2065_v46  ;;  %2377 = vrot.lane.b32.xlu1 %v4996_v0, %s4318_s8 }
 0x388   :  { %v2048_v11 = vpop.permute.xlu0 %2047 }
 0x389   :  { %v2061_v41 = vsel %vm463_vm10, %v2042_v1, %v2048_v11  ;;  %v2050_v45 = vpop.permute.xlu1 %2049 }
 0x38a   :  { %v2062_v51 = vsel %vm463_vm10, %v2044_v12, %v2050_v45  ;;  %2381 = vrot.lane.b32.xlu0 %v5795_v18, %s4318_s8 }
 0x38b   :  { %2078 = vst [vmem:[#allocation3 + $0x368] sm:$0xf] %v2062_v51  ;;  %2383 = vrot.lane.b32.xlu1 %v5002_v4, %s4318_s8  ;;  %s7163_s8 = smov 60  }
 0x38c   :  { %v2054_v21 = vpop.permute.xlu0 %2053 }
 0x38d   :  { %v2058_v8 = vsel %vm463_vm10, %v2048_v11, %v2054_v21  ;;  %v2067_v43 = vsel %vm463_vm10, %v2054_v21, %v2036_v16  ;;  %v2056_v10 = vpop.permute.xlu1 %2055 }
 0x38e   :  { %v2059_v42 = vsel %vm463_vm10, %v2050_v45, %v2056_v10  ;;  %v2068_v35 = vsel %vm463_vm10, %v2056_v10, %v2038_v44  ;;  %2453 = vrot.lane.b32.xlu0 %v5804_v17, %s4319_s9  ;;  %v3197_v61 = vld [vmem:[#allocation3 + $0x360] sm:$0xff]  ;;  %vm7082_vm10 = vmmov %vm7081_vm9 }
 0x38f   :  { %2079 = vst [vmem:[#allocation3 + $0x370] sm:$0xf] %v2059_v42  ;;  %2080 = vst [vmem:[#allocation3 + $0x378] sm:$0xf] %v2068_v35  ;;  %2455 = vrot.lane.b32.xlu1 %v5808_v9, %s4319_s9  ;;  %v4007_v57 = vpack.c.bf16 %v3197_v61, %v2064_v62 }
 0x390   :  { %v2084_v52 = vpop.permute.xlu0 %2083 }
 0x391   :  { %v2086_v48 = vpop.permute.xlu1 %2085 }
 0x392   :  { %2459 = vrot.lane.b32.xlu0 %v5816_v20, %s4319_s9  ;;  %v3198_v47 = vld [vmem:[#allocation3 + $0x368] sm:$0xff] }
 0x393   :  { %2461 = vrot.lane.b32.xlu1 %v5820_v39, %s4319_s9  ;;  %v4005_v38 = vpack.c.bf16 %v3198_v47, %v2061_v41 }
 0x394   :  { %v2090_v37 = vpop.permute.xlu0 %2089 }
 0x395   :  { %v2112_v55 = vsel %vm508_vm11, %v2084_v52, %v2090_v37  ;;  %v2092_v40 = vpop.permute.xlu1 %2091  ;;  %4006 = vmatprep.subr.bf16.mxu0 %v4005_v38 }
 0x396   :  { %v2133_v58 = vrot.slane %v2112_v55, 4  ;;  %v2113_v54 = vsel %vm508_vm11, %v2086_v48, %v2092_v40  ;;  %2465 = vrot.lane.b32.xlu0 %v5768_v15, %s4319_s9  ;;  %4008 = vmatpush1.bf16.msra.mxu0 %v4007_v57  ;;  %v3200_v50 = vld [vmem:[#allocation3 + $0x378] sm:$0xff]  ;;  %v3199_v5 = vld [vmem:[#allocation3 + $0x370] sm:$0xff] }
 0x397   :  { %v2141_v30 = vrot.slane %v2113_v54, 4  ;;  %2467 = vrot.lane.b32.xlu1 %v5773_v33, %s4319_s9  ;;  %v4129_v7 = vpack.c.bf16 %v3200_v50, %v2067_v43  ;;  %v4131_v53 = vpack.c.bf16 %v3199_v5, %v2058_v8  ;;  %v3061_v50 = vld [vmem:[%s6954_s3] sm:$0xff] }
 0x398   :  { %v2134_v3 = vsel %vm1428_vm12, %v2129_v31, %v2133_v58  ;;  %v2096_v23 = vpop.permute.xlu0 %2095 }
 0x399   :  { %v2142_v25 = vsel %vm1428_vm12, %v2133_v58, %v2141_v30  ;;  %v2109_v26 = vsel %vm508_vm11, %v2090_v37, %v2096_v23  ;;  %v2098_v60 = vpop.permute.xlu1 %2097  ;;  %4130 = vmatprep.subr.bf16.mxu1 %v4129_v7 }
 0x39a   :  { %v2135_v22 = vrot.slane %v2109_v26, 4  ;;  %v2110_v34 = vsel %vm508_vm11, %v2092_v40, %v2098_v60  ;;  %2471 = vrot.lane.b32.xlu0 %v5790_v59, %s4319_s9  ;;  %4132 = vmatpush1.bf16.msra.mxu1 %v4131_v53  ;;  %v4011_v51 = vpack.c.bf16 %v2142_v25, %v2134_v3 }
 0x39b   :  { %v2143_v56 = vrot.slane %v2110_v34, 4  ;;  %2473 = vrot.lane.b32.xlu1 %v5795_v18, %s4319_s9 }
 0x39c   :  { %v2136_v19 = vsel %vm1428_vm12, %v2130_v27, %v2135_v22  ;;  %v2102_v32 = vpop.permute.xlu0 %2101 }
 0x39d   :  { %v2144_v31 = vsel %vm1428_vm12, %v2135_v22, %v2143_v56  ;;  %v2106_v29 = vsel %vm508_vm11, %v2096_v23, %v2102_v32  ;;  %v2115_v24 = vsel %vm508_vm11, %v2102_v32, %v2084_v52  ;;  %v2104_v16 = vpop.permute.xlu1 %2103 }
 0x39e   :  { %v2137_v44 = vrot.slane %v2106_v29, 4  ;;  %v2139_v1 = vrot.slane %v2115_v24, 4  ;;  %v2107_v62 = vsel %vm508_vm11, %v2098_v60, %v2104_v16  ;;  %v2116_v36 = vsel %vm508_vm11, %v2104_v16, %v2086_v48  ;;  %2501 = vrot.lane.b32.xlu0 %v5804_v17, %s4320_s10  ;;  %vm7083_vm11 = vmmov %vm7081_vm9 }
 0x39f   :  { %v2145_v27 = vrot.slane %v2107_v62, 4  ;;  %v2147_v12 = vrot.slane %v2116_v36, 4  ;;  %2503 = vrot.lane.b32.xlu1 %v5808_v9, %s4320_s10  ;;  %v4009_v46 = vpack.c.bf16 %v2144_v31, %v2136_v19 }
 0x3a0   :  { %v2138_v11 = vsel %vm1428_vm12, %v2131_v28, %v2137_v44  ;;  %v2140_v41 = vsel %vm1428_vm12, %v2132_v13, %v2139_v1  ;;  %v2174_v45 = vpop.permute.xlu0 %2173 }
 0x3a1   :  { %v2146_v21 = vsel %vm1428_vm12, %v2137_v44, %v2145_v27  ;;  %v2148_v8 = vsel %vm1428_vm12, %v2139_v1, %v2147_v12  ;;  %v2176_v43 = vpop.permute.xlu1 %2175  ;;  %4010 = vmatprep.subr.bf16.mxu0 %v4009_v46 }
 0x3a2   :  { %2507 = vrot.lane.b32.xlu0 %v5816_v20, %s4320_s10  ;;  %4012 = vmatpush1.bf16.msra.mxu0 %v4011_v51  ;;  %v4133_v10 = vpack.c.bf16 %v2148_v8, %v2140_v41  ;;  %v4135_v6 = vpack.c.bf16 %v2146_v21, %v2138_v11 }
 0x3a3   :  { %2509 = vrot.lane.b32.xlu1 %v5820_v39, %s4320_s10 }
 0x3a4   :  { %v2180_v49 = vpop.permute.xlu0 %2179  ;;  %4134 = vmatprep.subr.bf16.mxu1 %v4133_v10 }
 0x3a5   :  { %v2203_v28 = vsel %vm7073_vm1, %v2174_v45, %v2180_v49  ;;  %v2182_v13 = vpop.permute.xlu1 %2181  ;;  %4136 = vmatpush1.bf16.msra.mxu1 %v4135_v6  ;;  %vm7087_vm1 = vmmov %vm7086_vm0 }
 0x3a6   :  { %v2204_v42 = vsel %vm7074_vm2, %v2176_v43, %v2182_v13  ;;  %2513 = vrot.lane.b32.xlu0 %v5768_v15, %s4320_s10  ;;  %vm7088_vm2 = vmmov %vm7086_vm0 }
 0x3a7   :  { %2515 = vrot.lane.b32.xlu1 %v5773_v33, %s4320_s10  ;;  %v4015_v37 = vpack.c.bf16 %v2204_v42, %v2203_v28 }
 0x3a8   :  { %v2186_v35 = vpop.permute.xlu0 %2185 }
 0x3a9   :  { %v2200_v52 = vsel %vm7075_vm3, %v2180_v49, %v2186_v35  ;;  %v2188_v48 = vpop.permute.xlu1 %2187 }
 0x3aa   :  { %v2201_v61 = vsel %vm7076_vm4, %v2182_v13, %v2188_v48  ;;  %2519 = vrot.lane.b32.xlu0 %v5790_v59, %s4320_s10  ;;  %vm7089_vm4 = vmmov %vm7075_vm3 }
 0x3ab   :  { %2521 = vrot.lane.b32.xlu1 %v5795_v18, %s4320_s10  ;;  %v4013_v47 = vpack.c.bf16 %v2201_v61, %v2200_v52 }
 0x3ac   :  { %v2192_v38 = vpop.permute.xlu0 %2191 }
 0x3ad   :  { %v2197_v57 = vsel %vm7077_vm5, %v2186_v35, %v2192_v38  ;;  %v2206_v55 = vsel %vm7078_vm6, %v2192_v38, %v2174_v45  ;;  %v2194_v40 = vpop.permute.xlu1 %2193  ;;  %4014 = vmatprep.subr.bf16.mxu0 %v4013_v47  ;;  %vm7090_vm5 = vmmov %vm7075_vm3 }
 0x3ae   :  { %v2198_v58 = vsel %vm7079_vm7, %v2188_v48, %v2194_v40  ;;  %v2207_v54 = vsel %vm7080_vm8, %v2194_v40, %v2176_v43  ;;  %2457 = vrot.lane.b32.xlu0 %v4994_v63, %s4319_s9  ;;  %4016 = vmatpush1.bf16.msra.mxu0 %v4015_v37  ;;  %vm7091_vm6 = vmmov %vm7075_vm3 }
 0x3af   :  { %2463 = vrot.lane.b32.xlu1 %v5000_v2, %s4319_s9  ;;  %v4137_v5 = vpack.c.bf16 %v2207_v54, %v2206_v55  ;;  %v4139_v30 = vpack.c.bf16 %v2198_v58, %v2197_v57  ;;  %vm7092_vm7 = vmmov %vm7086_vm0 }
 0x3b0   :  { %v2222_v7 = vpop.permute.xlu0 %2221  ;;  %vm7093_vm8 = vmmov %vm7086_vm0 }
 0x3b1   :  { %v2224_v53 = vpop.permute.xlu1 %2223  ;;  %4138 = vmatprep.subr.bf16.mxu1 %v4137_v5  ;;  %3482 = vmatmul.mubr.f32.vlgmr.msra.gmra.mrb[6].mxu0 %v3061_v50 }
 0x3b2   :  { %2469 = vrot.lane.b32.xlu0 %v4996_v0, %s4319_s9  ;;  %4140 = vmatpush1.bf16.msra.mxu1 %v4139_v30 }
 0x3b3   :  { %2475 = vrot.lane.b32.xlu1 %v5002_v4, %s4319_s9 }
 0x3b4   :  { %v2228_v3 = vpop.permute.xlu0 %2227 }
 0x3b5   :  { %v2251_v23 = vsel %vm7081_vm9, %v2222_v7, %v2228_v3  ;;  %v2230_v25 = vpop.permute.xlu1 %2229  ;;  %3696 = vmatmul.mubr.f32.vlgmr.msra.gmra.mrb[6].mxu1 %v3061_v50  ;;  %vm7094_vm9 = vmmov %vm7086_vm0 }
 0x3b6   :  { %v2269_v26 = vrot.slane %v2251_v23, 4  ;;  %v2252_v60 = vsel %vm7082_vm10, %v2224_v53, %v2230_v25  ;;  %2505 = vrot.lane.b32.xlu0 %v4994_v63, %s4320_s10  ;;  %vm7095_vm10 = vmmov %vm7086_vm0 }
 0x3b7   :  { %v2273_v22 = vrot.slane %v2252_v60, 4  ;;  %2511 = vrot.lane.b32.xlu1 %v5000_v2, %s4320_s10 }
 0x3b8   :  { %2301 = vst [vmem:[#allocation3 + $0x400] sm:$0xf0] %v2269_v26  ;;  %v2234_v34 = vpop.permute.xlu0 %2233 }
 0x3b9   :  { %v6141_v56 = vsel %vm1428_vm12, %v2269_v26, %v2273_v22  ;;  %v2248_v19 = vsel %vm7083_vm11, %v2228_v3, %v2234_v34  ;;  %v2236_v32 = vpop.permute.xlu1 %2235  ;;  %vm7096_vm11 = vcmp.lt.s32.totalorder %v4499_v14, 92 }
 0x3ba   :  { %v2270_v31 = vrot.slane %v2248_v19, 4  ;;  %v6147_v29 = vsel %vm7084_vm13, %v2230_v25, %v2236_v32  ;;  %2517 = vrot.lane.b32.xlu0 %v4996_v0, %s4320_s10  ;;  %vm7097_vm13 = vmmov %vm7096_vm11 }
 0x3bb   :  { %v2275_v24 = vrot.slane %v6147_v29, 4  ;;  %2523 = vrot.lane.b32.xlu1 %v5002_v4, %s4320_s10 }
 0x3bc   :  { %2302 = vst [vmem:[#allocation3 + $0x408] sm:$0xf0] %v2270_v31  ;;  %v2240_v16 = vpop.permute.xlu0 %2239 }
 0x3bd   :  { %v2276_v44 = vsel %vm1428_vm12, %v2270_v31, %v2275_v24  ;;  %v2245_v1 = vsel %vm7085_vm14, %v2234_v34, %v2240_v16  ;;  %v2254_v62 = vsel %vm7086_vm0, %v2240_v16, %v2222_v7  ;;  %v2242_v36 = vpop.permute.xlu1 %2241  ;;  %vm7098_vm14 = vmmov %vm7096_vm11 }
 0x3be   :  { %v2271_v27 = vrot.slane %v2245_v1, 4  ;;  %v2272_v12 = vrot.slane %v2254_v62, 4  ;;  %v2246_v46 = vsel %vm7087_vm1, %v2236_v32, %v2242_v36  ;;  %v2255_v11 = vsel %vm7088_vm2, %v2242_v36, %v2224_v53  ;;  %2593 = vrot.lane.b32.xlu0 %v5804_v17, %s4321_s11  ;;  %vm7099_vm0 = vmmov %vm7096_vm11 }
 0x3bf   :  { %v2277_v41 = vrot.slane %v2246_v46, 4  ;;  %v2279_v45 = vrot.slane %v2255_v11, 4  ;;  %2599 = vrot.lane.b32.xlu1 %v5816_v20, %s4321_s11  ;;  %vm7100_vm1 = vcmp.lt.s32.totalorder %v4499_v14, 80 }
 0x3c0   :  { %2303 = vst [vmem:[#allocation3 + $0x410] sm:$0xf0] %v2271_v27  ;;  %2304 = vst [vmem:[#allocation3 + $0x418] sm:$0xf0] %v2272_v12  ;;  %v2178_v51 = vpop.permute.xlu0 %2177 }
 0x3c1   :  { %v2278_v21 = vsel %vm1428_vm12, %v2271_v27, %v2277_v41  ;;  %v2280_v8 = vsel %vm1428_vm12, %v2272_v12, %v2279_v45  ;;  %v2184_v43 = vpop.permute.xlu1 %2183  ;;  %vm7101_vm2 = vmmov %vm7100_vm1 }
 0x3c2   :  { %v2205_v10 = vsel %vm7075_vm3, %v2178_v51, %v2184_v43  ;;  %2605 = vrot.lane.b32.xlu0 %v5768_v15, %s4321_s11  ;;  %vm7102_vm3 = vmmov %vm7100_vm1 }
 0x3c3   :  { %2217 = vst [vmem:[#allocation3 + $0x400] sm:$0xf] %v2205_v10  ;;  %2611 = vrot.lane.b32.xlu1 %v5790_v59, %s4321_s11 }
 0x3c4   :  { %v2190_v6 = vpop.permute.xlu0 %2189 }
 0x3c5   :  { %v2202_v49 = vsel %vm7089_vm4, %v2184_v43, %v2190_v6  ;;  %v2196_v28 = vpop.permute.xlu1 %2195  ;;  %vm7103_vm4 = vmmov %vm7100_vm1 }
 0x3c6   :  { %2218 = vst [vmem:[#allocation3 + $0x408] sm:$0xf] %v2202_v49  ;;  %v2199_v13 = vsel %vm7090_vm5, %v2190_v6, %v2196_v28  ;;  %v2208_v42 = vsel %vm7091_vm6, %v2196_v28, %v2178_v51  ;;  %2641 = vrot.lane.b32.xlu0 %v5804_v17, %s4322_s12  ;;  %vm7104_vm5 = vmmov %vm7099_vm0  ;;  %v6266_v49 = vld [vmem:[#allocation3 + $0x30] sm:$0xff] }
 0x3c7   :  { %2219 = vst [vmem:[#allocation3 + $0x410] sm:$0xf] %v2199_v13  ;;  %2220 = vst [vmem:[#allocation3 + $0x418] sm:$0xf] %v2208_v42  ;;  %2647 = vrot.lane.b32.xlu1 %v5816_v20, %s4322_s12 }
 0x3c8   :  { %v2226_v35 = vpop.permute.xlu0 %2225  ;;  %vm7105_vm6 = vmmov %vm7099_vm0 }
 0x3c9   :  { %v2232_v52 = vpop.permute.xlu1 %2231 }
 0x3ca   :  { %v2253_v48 = vsel %vm7092_vm7, %v2226_v35, %v2232_v52  ;;  %2653 = vrot.lane.b32.xlu0 %v5768_v15, %s4322_s12  ;;  %v3217_v61 = vld [vmem:[#allocation3 + $0x400] sm:$0xff]  ;;  %vm7106_vm7 = vmmov %vm7099_vm0 }
 0x3cb   :  { %v2281_v47 = vrot.slane %v2253_v48, 4  ;;  %2659 = vrot.lane.b32.xlu1 %v5790_v59, %s4322_s12  ;;  %v4019_v55 = vpack.c.bf16 %v6141_v56, %v3217_v61 }
 0x3cc   :  { %v2238_v38 = vpop.permute.xlu0 %2237 }
 0x3cd   :  { %v2282_v17 = vsel %vm1428_vm12, %v2273_v22, %v2281_v47  ;;  %v2250_v37 = vsel %vm7093_vm8, %v2232_v52, %v2238_v38  ;;  %v2244_v20 = vpop.permute.xlu1 %2243  ;;  %v3218_v57 = vld [vmem:[#allocation3 + $0x408] sm:$0xff]  ;;  %vm7107_vm8 = vmmov %vm7099_vm0 }
 0x3ce   :  { %v2283_v40 = vrot.slane %v2250_v37, 4  ;;  %v2247_v58 = vsel %vm7094_vm9, %v2238_v38, %v2244_v20  ;;  %v2256_v15 = vsel %vm7095_vm10, %v2244_v20, %v2226_v35  ;;  %2595 = vrot.lane.b32.xlu0 %v5808_v9, %s4321_s11  ;;  %v4017_v59 = vpack.c.bf16 %v2276_v44, %v3218_v57  ;;  %v3220_v54 = vld [vmem:[#allocation3 + $0x418] sm:$0xff]  ;;  %v3219_v50 = vld [vmem:[#allocation3 + $0x410] sm:$0xff]  ;;  %vm7108_vm9 = vmmov %vm7099_vm0 }
 0x3cf   :  { %v2285_v5 = vrot.slane %v2247_v58, 4  ;;  %v2287_v30 = vrot.slane %v2256_v15, 4  ;;  %2597 = vrot.lane.b32.xlu1 %v4994_v63, %s4321_s11  ;;  %v4141_v7 = vpack.c.bf16 %v2280_v8, %v3220_v54  ;;  %v4143_v53 = vpack.c.bf16 %v2278_v21, %v3219_v50  ;;  %v6276_v35 = vld [vmem:[#allocation3 + $0x38] sm:$0xff]  ;;  %vm7109_vm10 = vmmov %vm7099_vm0  ;;  %v6290_v37 = vld [vmem:[#allocation3] sm:$0xff] }
 0x3d0   :  { %v2284_v3 = vsel %vm1428_vm12, %v2275_v24, %v2283_v40  ;;  %v2314_v23 = vpop.permute.xlu0 %2313  ;;  %4018 = vmatprep.subr.bf16.mxu0 %v4017_v59  ;;  %v6294_v20 = vld [vmem:[#allocation3 + $0x20] sm:$0xff]  ;;  %v6298_v58 = vld [vmem:[#allocation3 + $0x8] sm:$0xff] }
 0x3d1   :  { %v2286_v25 = vsel %vm1428_vm12, %v2277_v41, %v2285_v5  ;;  %v2288_v26 = vsel %vm1428_vm12, %v2279_v45, %v2287_v30  ;;  %v2320_v60 = vpop.permute.xlu1 %2319  ;;  %4020 = vmatpush1.bf16.msra.mxu0 %v4019_v55  ;;  %4142 = vmatprep.subr.bf16.mxu1 %v4141_v7  ;;  %v6302_v59 = vld [vmem:[#allocation3 + $0x28] sm:$0xff] }
 0x3d2   :  { %v2343_v22 = vsel %vm7096_vm11, %v2314_v23, %v2320_v60  ;;  %2601 = vrot.lane.b32.xlu0 %v5820_v39, %s4321_s11  ;;  %4144 = vmatpush1.bf16.msra.mxu1 %v4143_v53  ;;  %vm7110_vm11 = vmmov %vm7099_vm0 }
 0x3d3   :  { %2603 = vrot.lane.b32.xlu1 %v5000_v2, %s4321_s11  ;;  %v4023_v24 = vpack.c.bf16 %v2343_v22, %v2282_v17 }
 0x3d4   :  { %v2326_v34 = vpop.permute.xlu0 %2325 }
 0x3d5   :  { %v2340_v56 = vsel %vm7097_vm13, %v2320_v60, %v2326_v34  ;;  %v2332_v19 = vpop.permute.xlu1 %2331  ;;  %vm7111_vm13 = vmmov %vm7099_vm0 }
 0x3d6   :  { %v2337_v32 = vsel %vm7098_vm14, %v2326_v34, %v2332_v19  ;;  %v2346_v31 = vsel %vm7099_vm0, %v2332_v19, %v2314_v23  ;;  %2607 = vrot.lane.b32.xlu0 %v5773_v33, %s4321_s11  ;;  %v4021_v29 = vpack.c.bf16 %v2340_v56, %v2284_v3  ;;  %vm7112_vm14 = vmmov %vm7100_vm1  ;;  %v6310_v23 = vld [vmem:[#allocation3 + $0x10] sm:$0xff] }
 0x3d7   :  { %2609 = vrot.lane.b32.xlu1 %v4996_v0, %s4321_s11  ;;  %v4145_v16 = vpack.c.bf16 %v2346_v31, %v2288_v26  ;;  %v4147_v44 = vpack.c.bf16 %v2337_v32, %v2286_v25  ;;  %vm7113_vm0 = vmmov %vm7100_vm1 }
 0x3d8   :  { %v2362_v1 = vpop.permute.xlu0 %2361  ;;  %4022 = vmatprep.subr.bf16.mxu0 %v4021_v29 }
 0x3d9   :  { %v2368_v62 = vpop.permute.xlu1 %2367  ;;  %4024 = vmatpush1.bf16.msra.mxu0 %v4023_v24  ;;  %4146 = vmatprep.subr.bf16.mxu1 %v4145_v16 }
 0x3da   :  { %v6224_v36 = vsel %vm7100_vm1, %v2362_v1, %v2368_v62  ;;  %2613 = vrot.lane.b32.xlu0 %v5795_v18, %s4321_s11  ;;  %4148 = vmatpush1.bf16.msra.mxu1 %v4147_v44  ;;  %vm7114_vm1 = vmmov %vm7113_vm0  ;;  %v6324_v44 = vld [vmem:[#allocation3 + $0x18] sm:$0xff] }
 0x3db   :  { %v2409_v33 = vrot.slane %v6224_v36, 4  ;;  %2615 = vrot.lane.b32.xlu1 %v5002_v4, %s4321_s11 }
 0x3dc   :  { %v2374_v27 = vpop.permute.xlu0 %2373 }
 0x3dd   :  { %2441 = vst [vmem:[#allocation3 + $0x4a0] sm:$0xf0] %v2409_v33  ;;  %v6235_v12 = vsel %vm7101_vm2, %v2368_v62, %v2374_v27  ;;  %v2380_v46 = vpop.permute.xlu1 %2379  ;;  %vm7115_vm2 = vmmov %vm7113_vm0 }
 0x3de   :  { %v2410_v11 = vrot.slane %v6235_v12, 4  ;;  %v6240_v18 = vsel %vm7102_vm3, %v2374_v27, %v2380_v46  ;;  %v6244_v41 = vsel %vm7103_vm4, %v2380_v46, %v2362_v1  ;;  %2643 = vrot.lane.b32.xlu0 %v5808_v9, %s4322_s12  ;;  %vm7116_vm3 = vmmov %vm7113_vm0 }
 0x3df   :  { %v2411_v45 = vrot.slane %v6240_v18, 4  ;;  %v2412_v51 = vrot.slane %v6244_v41, 4  ;;  %2645 = vrot.lane.b32.xlu1 %v4994_v63, %s4322_s12  ;;  %vm7117_vm4 = vmmov %vm7113_vm0 }
 0x3e0   :  { %2442 = vst [vmem:[#allocation3 + $0x4a8] sm:$0xf0] %v2410_v11  ;;  %v2316_v21 = vpop.permute.xlu0 %2315 }
 0x3e1   :  { %2443 = vst [vmem:[#allocation3 + $0x4b0] sm:$0xf0] %v2411_v45  ;;  %2444 = vst [vmem:[#allocation3 + $0x4b8] sm:$0xf0] %v2412_v51  ;;  %v2318_v8 = vpop.permute.xlu1 %2317 }
 0x3e2   :  { %2649 = vrot.lane.b32.xlu0 %v5820_v39, %s4322_s12 }
 0x3e3   :  { %2651 = vrot.lane.b32.xlu1 %v5000_v2, %s4322_s12 }
 0x3e4   :  { %v2322_v9 = vpop.permute.xlu0 %2321 }
 0x3e5   :  { %v2344_v43 = vsel %vm7104_vm5, %v2316_v21, %v2322_v9  ;;  %v2324_v10 = vpop.permute.xlu1 %2323  ;;  %vm7118_vm5 = vmmov %vm7113_vm0 }
 0x3e6   :  { %v2345_v6 = vsel %vm7105_vm6, %v2318_v8, %v2324_v10  ;;  %2655 = vrot.lane.b32.xlu0 %v6266_v49, %s4322_s12  ;;  %vm7119_vm6 = vmmov %vm7113_vm0 }
 0x3e7   :  { %2357 = vst [vmem:[#allocation3 + $0x4a0] sm:$0xf] %v2345_v6  ;;  %2657 = vrot.lane.b32.xlu1 %v4996_v0, %s4322_s12 }
 0x3e8   :  { %v2328_v39 = vpop.permute.xlu0 %2327 }
 0x3e9   :  { %v2341_v28 = vsel %vm7106_vm7, %v2322_v9, %v2328_v39  ;;  %v2330_v13 = vpop.permute.xlu1 %2329  ;;  %vm7121_vm7 = vcmp.lt.s32.totalorder %v4499_v14, 79 }
 0x3ea   :  { %v2342_v42 = vsel %vm7107_vm8, %v2324_v10, %v2330_v13  ;;  %2661 = vrot.lane.b32.xlu0 %v6276_v35, %s4322_s12  ;;  %vm7122_vm8 = vmmov %vm7121_vm7 }
 0x3eb   :  { %2358 = vst [vmem:[#allocation3 + $0x4a8] sm:$0xf] %v2342_v42  ;;  %2663 = vrot.lane.b32.xlu1 %v5002_v4, %s4322_s12 }
 0x3ec   :  { %v2334_v52 = vpop.permute.xlu0 %2333 }
 0x3ed   :  { %v2338_v48 = vsel %vm7108_vm9, %v2328_v39, %v2334_v52  ;;  %v2347_v61 = vsel %vm7109_vm10, %v2334_v52, %v2316_v21  ;;  %v2336_v47 = vpop.permute.xlu1 %2335  ;;  %vm7123_vm9 = vmmov %vm7121_vm7 }
 0x3ee   :  { %v2339_v38 = vsel %vm7110_vm11, %v2330_v13, %v2336_v47  ;;  %v2348_v17 = vsel %vm7111_vm13, %v2336_v47, %v2318_v8  ;;  %2733 = vrot.lane.b32.xlu0 %v6290_v37, %s4323_s13  ;;  %v3237_v40 = vld [vmem:[#allocation3 + $0x4a0] sm:$0xff]  ;;  %vm7124_vm10 = vmmov %vm7121_vm7 }
 0x3ef   :  { %2359 = vst [vmem:[#allocation3 + $0x4b0] sm:$0xf] %v2339_v38  ;;  %2360 = vst [vmem:[#allocation3 + $0x4b8] sm:$0xf] %v2348_v17  ;;  %2735 = vrot.lane.b32.xlu1 %v6294_v20, %s4323_s13  ;;  %v4027_v5 = vpack.c.bf16 %v3237_v40, %v2344_v43 }
 0x3f0   :  { %v2364_v57 = vpop.permute.xlu0 %2363  ;;  %vm7125_vm11 = vmmov %vm7121_vm7 }
 0x3f1   :  { %v2366_v55 = vpop.permute.xlu1 %2365  ;;  %vm7126_vm13 = vmmov %vm7121_vm7 }
 0x3f2   :  { %2739 = vrot.lane.b32.xlu0 %v6298_v58, %s4323_s13  ;;  %v3238_v15 = vld [vmem:[#allocation3 + $0x4a8] sm:$0xff] }
 0x3f3   :  { %2741 = vrot.lane.b32.xlu1 %v6302_v59, %s4323_s13  ;;  %v4025_v54 = vpack.c.bf16 %v3238_v15, %v2341_v28 }
 0x3f4   :  { %v2370_v50 = vpop.permute.xlu0 %2369 }
 0x3f5   :  { %v2392_v30 = vsel %vm7112_vm14, %v2364_v57, %v2370_v50  ;;  %v2372_v7 = vpop.permute.xlu1 %2371  ;;  %4026 = vmatprep.subr.bf16.mxu0 %v4025_v54  ;;  %vm7127_vm14 = vmmov %vm7121_vm7 }
 0x3f6   :  { %v2413_v53 = vrot.slane %v2392_v30, 4  ;;  %v2393_v3 = vsel %vm7113_vm0, %v2366_v55, %v2372_v7  ;;  %2745 = vrot.lane.b32.xlu0 %v6310_v23, %s4323_s13  ;;  %4028 = vmatpush1.bf16.msra.mxu0 %v4027_v5  ;;  %v3240_v25 = vld [vmem:[#allocation3 + $0x4b8] sm:$0xff]  ;;  %v3239_v26 = vld [vmem:[#allocation3 + $0x4b0] sm:$0xff]  ;;  %vm7128_vm0 = vmmov %vm7121_vm7 }
 0x3f7   :  { %v2421_v60 = vrot.slane %v2393_v3, 4  ;;  %2747 = vrot.lane.b32.xlu1 %v6266_v49, %s4323_s13  ;;  %v4149_v22 = vpack.c.bf16 %v3240_v25, %v2347_v61  ;;  %v4151_v34 = vpack.c.bf16 %v3239_v26, %v2338_v48 }
 0x3f8   :  { %v2414_v56 = vsel %vm1428_vm12, %v2409_v33, %v2413_v53  ;;  %v2376_v19 = vpop.permute.xlu0 %2375 }
 0x3f9   :  { %v2422_v32 = vsel %vm1428_vm12, %v2413_v53, %v2421_v60  ;;  %v2389_v31 = vsel %vm7114_vm1, %v2370_v50, %v2376_v19  ;;  %v2378_v29 = vpop.permute.xlu1 %2377  ;;  %4150 = vmatprep.subr.bf16.mxu1 %v4149_v22  ;;  %vm7129_vm1 = vcmp.lt.s32.totalorder %v4499_v14, 78 }
 0x3fa   :  { %v2415_v24 = vrot.slane %v2389_v31, 4  ;;  %v2390_v16 = vsel %vm7115_vm2, %v2372_v7, %v2378_v29  ;;  %2751 = vrot.lane.b32.xlu0 %v6324_v44, %s4323_s13  ;;  %4152 = vmatpush1.bf16.msra.mxu1 %v4151_v34  ;;  %v4031_v42 = vpack.c.bf16 %v2422_v32, %v2414_v56  ;;  %vm7130_vm2 = vmmov %vm7129_vm1 }
 0x3fb   :  { %v2423_v1 = vrot.slane %v2390_v16, 4  ;;  %2753 = vrot.lane.b32.xlu1 %v6276_v35, %s4323_s13 }
 0x3fc   :  { %v2416_v62 = vsel %vm1428_vm12, %v2410_v11, %v2415_v24  ;;  %v2382_v36 = vpop.permute.xlu0 %2381 }
 0x3fd   :  { %v2424_v33 = vsel %vm1428_vm12, %v2415_v24, %v2423_v1  ;;  %v2386_v27 = vsel %vm7116_vm3, %v2376_v19, %v2382_v36  ;;  %v2395_v46 = vsel %vm7117_vm4, %v2382_v36, %v2364_v57  ;;  %v2384_v21 = vpop.permute.xlu1 %2383  ;;  %vm7131_vm3 = vmmov %vm7129_vm1 }
 0x3fe   :  { %v2417_v8 = vrot.slane %v2386_v27, 4  ;;  %v2419_v9 = vrot.slane %v2395_v46, 4  ;;  %v2387_v43 = vsel %vm7118_vm5, %v2378_v29, %v2384_v21  ;;  %v2396_v12 = vsel %vm7119_vm6, %v2384_v21, %v2366_v55  ;;  %2781 = vrot.lane.b32.xlu0 %v6290_v37, %s7120_s22  ;;  %vm7132_vm4 = vmmov %vm7129_vm1 }
 0x3ff   :  { %v2425_v11 = vrot.slane %v2387_v43, 4  ;;  %v2427_v10 = vrot.slane %v2396_v12, 4  ;;  %2783 = vrot.lane.b32.xlu1 %v6294_v20, %s7120_s22  ;;  %v4029_v6 = vpack.c.bf16 %v2424_v33, %v2416_v62  ;;  %vm7133_vm5 = vmmov %vm7129_vm1 }
 0x400   :  { %v2418_v39 = vsel %vm1428_vm12, %v2411_v45, %v2417_v8  ;;  %v2420_v28 = vsel %vm1428_vm12, %v2412_v51, %v2419_v9  ;;  %v2454_v13 = vpop.permute.xlu0 %2453  ;;  %vm7134_vm6 = vmmov %vm7129_vm1 }
 0x401   :  { %v2426_v52 = vsel %vm1428_vm12, %v2417_v8, %v2425_v11  ;;  %v2428_v48 = vsel %vm1428_vm12, %v2419_v9, %v2427_v10  ;;  %v2456_v61 = vpop.permute.xlu1 %2455  ;;  %4030 = vmatprep.subr.bf16.mxu0 %v4029_v6 }
 0x402   :  { %2787 = vrot.lane.b32.xlu0 %v6298_v58, %s7120_s22  ;;  %4032 = vmatpush1.bf16.msra.mxu0 %v4031_v42  ;;  %v4153_v47 = vpack.c.bf16 %v2428_v48, %v2420_v28  ;;  %v4155_v18 = vpack.c.bf16 %v2426_v52, %v2418_v39 }
 0x403   :  { %2789 = vrot.lane.b32.xlu1 %v6302_v59, %s7120_s22 }
 0x404   :  { %v2460_v41 = vpop.permute.xlu0 %2459  ;;  %4154 = vmatprep.subr.bf16.mxu1 %v4153_v47 }
 0x405   :  { %v2483_v45 = vsel %vm7121_vm7, %v2454_v13, %v2460_v41  ;;  %v2462_v51 = vpop.permute.xlu1 %2461  ;;  %4156 = vmatpush1.bf16.msra.mxu1 %v4155_v18  ;;  %vm7135_vm7 = vmmov %vm7129_vm1 }
 0x406   :  { %v2484_v38 = vsel %vm7122_vm8, %v2456_v61, %v2462_v51  ;;  %2793 = vrot.lane.b32.xlu0 %v6310_v23, %s7120_s22  ;;  %vm7136_vm8 = vmmov %vm7129_vm1 }
 0x407   :  { %2795 = vrot.lane.b32.xlu1 %v6266_v49, %s7120_s22  ;;  %v4035_v50 = vpack.c.bf16 %v2484_v38, %v2483_v45 }
 0x408   :  { %v2466_v17 = vpop.permute.xlu0 %2465 }
 0x409   :  { %v2480_v57 = vsel %vm7123_vm9, %v2460_v41, %v2466_v17  ;;  %v2468_v55 = vpop.permute.xlu1 %2467  ;;  %vm7138_vm9 = vmmov %vm7128_vm0 }
 0x40a   :  { %v2481_v40 = vsel %vm7124_vm10, %v2462_v51, %v2468_v55  ;;  %2799 = vrot.lane.b32.xlu0 %v6324_v44, %s7120_s22  ;;  %vm7139_vm10 = vmmov %vm7128_vm0 }
 0x40b   :  { %2801 = vrot.lane.b32.xlu1 %v6276_v35, %s7120_s22  ;;  %v4033_v15 = vpack.c.bf16 %v2481_v40, %v2480_v57 }
 0x40c   :  { %v2472_v54 = vpop.permute.xlu0 %2471 }
 0x40d   :  { %v2477_v5 = vsel %vm7125_vm11, %v2466_v17, %v2472_v54  ;;  %v2486_v30 = vsel %vm7126_vm13, %v2472_v54, %v2454_v13  ;;  %v2474_v7 = vpop.permute.xlu1 %2473  ;;  %4034 = vmatprep.subr.bf16.mxu0 %v4033_v15  ;;  %vm7140_vm11 = vmmov %vm7128_vm0 }
 0x40e   :  { %v2478_v53 = vsel %vm7127_vm14, %v2468_v55, %v2474_v7  ;;  %v2487_v3 = vsel %vm7128_vm0, %v2474_v7, %v2456_v61  ;;  %2737 = vrot.lane.b32.xlu0 %v4994_v63, %s4323_s13  ;;  %4036 = vmatpush1.bf16.msra.mxu0 %v4035_v50  ;;  %vm7141_vm13 = vmmov %vm7128_vm0 }
 0x40f   :  { %2743 = vrot.lane.b32.xlu1 %v5000_v2, %s4323_s13  ;;  %v4157_v25 = vpack.c.bf16 %v2487_v3, %v2486_v30  ;;  %v4159_v26 = vpack.c.bf16 %v2478_v53, %v2477_v5  ;;  %vm7143_vm14 = vmmov %vm7129_vm1 }
 0x410   :  { %v2502_v60 = vpop.permute.xlu0 %2501  ;;  %vm7144_vm0 = vmmov %vm7129_vm1 }
 0x411   :  { %v2504_v22 = vpop.permute.xlu1 %2503  ;;  %4158 = vmatprep.subr.bf16.mxu1 %v4157_v25 }
 0x412   :  { %2749 = vrot.lane.b32.xlu0 %v4996_v0, %s4323_s13  ;;  %4160 = vmatpush1.bf16.msra.mxu1 %v4159_v26 }
 0x413   :  { %2755 = vrot.lane.b32.xlu1 %v5002_v4, %s4323_s13 }
 0x414   :  { %v2508_v34 = vpop.permute.xlu0 %2507 }
 0x415   :  { %v2531_v56 = vsel %vm7129_vm1, %v2502_v60, %v2508_v34  ;;  %v2510_v19 = vpop.permute.xlu1 %2509  ;;  %vm7145_vm1 = vmmov %vm7144_vm0 }
 0x416   :  { %v2549_v32 = vrot.slane %v2531_v56, 4  ;;  %v2532_v31 = vsel %vm7130_vm2, %v2504_v22, %v2510_v19  ;;  %2785 = vrot.lane.b32.xlu0 %v4994_v63, %s7120_s22  ;;  %vm7146_vm2 = vmmov %vm7144_vm0 }
 0x417   :  { %v2553_v29 = vrot.slane %v2532_v31, 4  ;;  %2791 = vrot.lane.b32.xlu1 %v5000_v2, %s7120_s22 }
 0x418   :  { %2581 = vst [vmem:[#allocation3 + $0x540] sm:$0xf0] %v2549_v32  ;;  %v2514_v24 = vpop.permute.xlu0 %2513 }
 0x419   :  { %v6399_v16 = vsel %vm1428_vm12, %v2549_v32, %v2553_v29  ;;  %v2528_v1 = vsel %vm7131_vm3, %v2508_v34, %v2514_v24  ;;  %v2516_v62 = vpop.permute.xlu1 %2515  ;;  %vm7147_vm3 = vcmp.lt.s32.totalorder %v4499_v14, 77 }
 0x41a   :  { %v2550_v36 = vrot.slane %v2528_v1, 4  ;;  %v6405_v33 = vsel %vm7132_vm4, %v2510_v19, %v2516_v62  ;;  %2797 = vrot.lane.b32.xlu0 %v4996_v0, %s7120_s22  ;;  %vm7148_vm4 = vmmov %vm7147_vm3 }
 0x41b   :  { %v2555_v27 = vrot.slane %v6405_v33, 4  ;;  %2803 = vrot.lane.b32.xlu1 %v5002_v4, %s7120_s22 }
 0x41c   :  { %2582 = vst [vmem:[#allocation3 + $0x548] sm:$0xf0] %v2550_v36  ;;  %v2520_v46 = vpop.permute.xlu0 %2519 }
 0x41d   :  { %v2556_v21 = vsel %vm1428_vm12, %v2550_v36, %v2555_v27  ;;  %v2525_v8 = vsel %vm7133_vm5, %v2514_v24, %v2520_v46  ;;  %v2534_v9 = vsel %vm7134_vm6, %v2520_v46, %v2502_v60  ;;  %v2522_v43 = vpop.permute.xlu1 %2521  ;;  %vm7149_vm5 = vmmov %vm7147_vm3 }
 0x41e   :  { %v2551_v12 = vrot.slane %v2525_v8, 4  ;;  %v2552_v11 = vrot.slane %v2534_v9, 4  ;;  %v2526_v10 = vsel %vm7135_vm7, %v2516_v62, %v2522_v43  ;;  %v2535_v6 = vsel %vm7136_vm8, %v2522_v43, %v2504_v22  ;;  %2873 = vrot.lane.b32.xlu0 %v6290_v37, %s7137_s23  ;;  %vm7150_vm6 = vmmov %vm7147_vm3 }
 0x41f   :  { %v2557_v39 = vrot.slane %v2526_v10, 4  ;;  %v2559_v28 = vrot.slane %v2535_v6, 4  ;;  %2879 = vrot.lane.b32.xlu1 %v6298_v58, %s7137_s23  ;;  %vm7151_vm7 = vcmp.lt.s32.totalorder %v4499_v14, 76 }
 0x420   :  { %2583 = vst [vmem:[#allocation3 + $0x550] sm:$0xf0] %v2551_v12  ;;  %2584 = vst [vmem:[#allocation3 + $0x558] sm:$0xf0] %v2552_v11  ;;  %v2458_v13 = vpop.permute.xlu0 %2457 }
 0x421   :  { %v2558_v42 = vsel %vm1428_vm12, %v2551_v12, %v2557_v39  ;;  %v2560_v52 = vsel %vm1428_vm12, %v2552_v11, %v2559_v28  ;;  %v2464_v48 = vpop.permute.xlu1 %2463  ;;  %vm7152_vm8 = vmmov %vm7151_vm7 }
 0x422   :  { %v2485_v61 = vsel %vm7138_vm9, %v2458_v13, %v2464_v48  ;;  %2885 = vrot.lane.b32.xlu0 %v6310_v23, %s7137_s23  ;;  %vm7153_vm9 = vmmov %vm7151_vm7 }
 0x423   :  { %2497 = vst [vmem:[#allocation3 + $0x540] sm:$0xf] %v2485_v61  ;;  %2891 = vrot.lane.b32.xlu1 %v6324_v44, %s7137_s23 }
 0x424   :  { %v2470_v47 = vpop.permute.xlu0 %2469 }
 0x425   :  { %v2482_v18 = vsel %vm7139_vm10, %v2464_v48, %v2470_v47  ;;  %v2476_v41 = vpop.permute.xlu1 %2475  ;;  %vm7154_vm10 = vmmov %vm7151_vm7 }
 0x426   :  { %2498 = vst [vmem:[#allocation3 + $0x548] sm:$0xf] %v2482_v18  ;;  %v2479_v45 = vsel %vm7140_vm11, %v2470_v47, %v2476_v41  ;;  %v2488_v51 = vsel %vm7141_vm13, %v2476_v41, %v2458_v13  ;;  %2921 = vrot.lane.b32.xlu0 %v6290_v37, %s7142_s24  ;;  %vm7155_vm11 = vmmov %vm7147_vm3 }
 0x427   :  { %2499 = vst [vmem:[#allocation3 + $0x550] sm:$0xf] %v2479_v45  ;;  %2500 = vst [vmem:[#allocation3 + $0x558] sm:$0xf] %v2488_v51  ;;  %2927 = vrot.lane.b32.xlu1 %v6298_v58, %s7142_s24 }
 0x428   :  { %v2506_v38 = vpop.permute.xlu0 %2505  ;;  %vm7156_vm13 = vmmov %vm7147_vm3 }
 0x429   :  { %v2512_v17 = vpop.permute.xlu1 %2511 }
 0x42a   :  { %v2533_v57 = vsel %vm7143_vm14, %v2506_v38, %v2512_v17  ;;  %2933 = vrot.lane.b32.xlu0 %v6310_v23, %s7142_s24  ;;  %v3257_v55 = vld [vmem:[#allocation3 + $0x540] sm:$0xff]  ;;  %vm7157_vm14 = vmmov %vm7147_vm3 }
 0x42b   :  { %v2561_v40 = vrot.slane %v2533_v57, 4  ;;  %2939 = vrot.lane.b32.xlu1 %v6324_v44, %s7142_s24  ;;  %v4039_v7 = vpack.c.bf16 %v6399_v16, %v3257_v55  ;;  %v3066_v55 = vld [vmem:[%s6954_s3 + $0x28] sm:$0xff] }
 0x42c   :  { %v2518_v15 = vpop.permute.xlu0 %2517  ;;  %3487 = vmatprep.mubr.f32.mxu0 %v3066_v55  ;;  %3701 = vmatprep.mubr.f32.mxu1 %v3066_v55 }
 0x42d   :  { %v2562_v54 = vsel %vm1428_vm12, %v2553_v29, %v2561_v40  ;;  %v2530_v50 = vsel %vm7144_vm0, %v2512_v17, %v2518_v15  ;;  %v2524_v5 = vpop.permute.xlu1 %2523  ;;  %v3258_v30 = vld [vmem:[#allocation3 + $0x548] sm:$0xff]  ;;  %vm7158_vm0 = vmmov %vm7147_vm3 }
 0x42e   :  { %v2563_v53 = vrot.slane %v2530_v50, 4  ;;  %v2527_v3 = vsel %vm7145_vm1, %v2518_v15, %v2524_v5  ;;  %v2536_v25 = vsel %vm7146_vm2, %v2524_v5, %v2506_v38  ;;  %2875 = vrot.lane.b32.xlu0 %v6294_v20, %s7137_s23  ;;  %v4037_v26 = vpack.c.bf16 %v2556_v21, %v3258_v30  ;;  %v3260_v60 = vld [vmem:[#allocation3 + $0x558] sm:$0xff]  ;;  %v3259_v22 = vld [vmem:[#allocation3 + $0x550] sm:$0xff]  ;;  %v3065_v50 = vld [vmem:[%s6954_s3 + $0x20] sm:$0xff] }
 0x42f   :  { %v2565_v34 = vrot.slane %v2527_v3, 4  ;;  %v2567_v56 = vrot.slane %v2536_v25, 4  ;;  %2877 = vrot.lane.b32.xlu1 %v4994_v63, %s7137_s23  ;;  %v4161_v19 = vpack.c.bf16 %v2560_v52, %v3260_v60  ;;  %v4163_v32 = vpack.c.bf16 %v2558_v42, %v3259_v22  ;;  %3488 = vmatmul.mubr.f32.gmra.mrb[8].mxu0 %v3065_v50  ;;  %v3070_v30 = vld [vmem:[%s6954_s3 + $0x48] sm:$0xff]  ;;  %vm7159_vm1 = vmmov %vm7158_vm0 }
 0x430   :  { %v2564_v31 = vsel %vm1428_vm12, %v2555_v27, %v2563_v53  ;;  %v2594_v29 = vpop.permute.xlu0 %2593  ;;  %4038 = vmatprep.subr.bf16.mxu0 %v4037_v26  ;;  %3702 = vmatmul.mubr.f32.gmra.mrb[8].mxu1 %v3065_v50  ;;  %vm7160_vm2 = vmmov %vm7158_vm0  ;;  %v3069_v26 = vld [vmem:[%s6954_s3 + $0x40] sm:$0xff]  ;;  %v3064_v50 = vld [vmem:[%s6954_s3 + $0x18] sm:$0xff] }
 0x431   :  { %v2566_v24 = vsel %vm1428_vm12, %v2557_v39, %v2565_v34  ;;  %v2568_v16 = vsel %vm1428_vm12, %v2559_v28, %v2567_v56  ;;  %v2600_v1 = vpop.permute.xlu1 %2599  ;;  %4040 = vmatpush1.bf16.msra.mxu0 %v4039_v7  ;;  %4162 = vmatprep.subr.bf16.mxu1 %v4161_v19  ;;  %v3074_v34 = vld [vmem:[%s6954_s3 + $0x68] sm:$0xff]  ;;  %v3073_v19 = vld [vmem:[%s6954_s3 + $0x60] sm:$0xff] }
 0x432   :  { %v2623_v62 = vsel %vm7147_vm3, %v2594_v29, %v2600_v1  ;;  %2881 = vrot.lane.b32.xlu0 %v6302_v59, %s7137_s23  ;;  %4164 = vmatpush1.bf16.msra.mxu1 %v4163_v32  ;;  %vm7161_vm3 = vmmov %vm7158_vm0 }
 0x433   :  { %2883 = vrot.lane.b32.xlu1 %v5000_v2, %s7137_s23  ;;  %v4043_v9 = vpack.c.bf16 %v2623_v62, %v2562_v54  ;;  %3493 = vmatprep.mubr.f32.mxu0 %v3070_v30 }
 0x434   :  { %v2606_v36 = vpop.permute.xlu0 %2605  ;;  %3707 = vmatprep.mubr.f32.mxu1 %v3070_v30  ;;  %3494 = vmatmul.mubr.f32.gmra.mrb[10].mxu0 %v3069_v26 }
 0x435   :  { %v2620_v33 = vsel %vm7148_vm4, %v2600_v1, %v2606_v36  ;;  %v2612_v27 = vpop.permute.xlu1 %2611  ;;  %vm7162_vm4 = vmmov %vm7158_vm0  ;;  %3708 = vmatmul.mubr.f32.gmra.mrb[10].mxu1 %v3069_v26  ;;  %3499 = vmatprep.mubr.f32.mxu0 %v3074_v34 }
 0x436   :  { %v2617_v46 = vsel %vm7149_vm5, %v2606_v36, %v2612_v27  ;;  %v2626_v21 = vsel %vm7150_vm6, %v2612_v27, %v2594_v29  ;;  %2887 = vrot.lane.b32.xlu0 %v6266_v49, %s7137_s23  ;;  %v4041_v8 = vpack.c.bf16 %v2620_v33, %v2564_v31  ;;  %3713 = vmatprep.mubr.f32.mxu1 %v3074_v34  ;;  %v3078_v29 = vld [vmem:[%s6954_s3 + $0x88] sm:$0xff]  ;;  %vm7164_vm5 = vmmov %vm7151_vm7  ;;  %v3344_v34 = vld [vmem:[%s6955_s4 + $0x18] sm:$0xff] }
 0x437   :  { %2889 = vrot.lane.b32.xlu1 %v4996_v0, %s7137_s23  ;;  %v4165_v43 = vpack.c.bf16 %v2626_v21, %v2568_v16  ;;  %v4167_v12 = vpack.c.bf16 %v2617_v46, %v2566_v24  ;;  %vm7165_vm6 = vmmov %vm7164_vm5 }
 0x438   :  { %v2642_v11 = vpop.permute.xlu0 %2641  ;;  %4042 = vmatprep.subr.bf16.mxu0 %v4041_v8  ;;  %3500 = vmatmul.mubr.f32.gmra.mrb[12].mxu0 %v3073_v19 }
 0x439   :  { %v2648_v10 = vpop.permute.xlu1 %2647  ;;  %4044 = vmatpush1.bf16.msra.mxu0 %v4043_v9  ;;  %4166 = vmatprep.subr.bf16.mxu1 %v4165_v43  ;;  %v3082_v9 = vld [vmem:[%s6954_s3 + $0xa8] sm:$0xff] }
 0x43a   :  { %v6482_v6 = vsel %vm7151_vm7, %v2642_v11, %v2648_v10  ;;  %2893 = vrot.lane.b32.xlu0 %v6276_v35, %s7137_s23  ;;  %4168 = vmatpush1.bf16.msra.mxu1 %v4167_v12  ;;  %vm7166_vm7 = vmmov %vm7164_vm5 }
 0x43b   :  { %v2689_v39 = vrot.slane %v6482_v6, 4  ;;  %2895 = vrot.lane.b32.xlu1 %v5002_v4, %s7137_s23  ;;  %3714 = vmatmul.mubr.f32.gmra.mrb[12].mxu1 %v3073_v19  ;;  %v3086_v6 = vld [vmem:[%s6954_s3 + $0xc8] sm:$0x3] }
 0x43c   :  { %v2654_v28 = vpop.permute.xlu0 %2653  ;;  %3505 = vmatprep.mubr.f32.mxu0 %v3078_v29  ;;  %3719 = vmatprep.mubr.f32.mxu1 %v3078_v29  ;;  %v3346_v29 = vld [vmem:[%s6955_s4 + $0x28] sm:$0xff] }
 0x43d   :  { %2721 = vst [vmem:[#allocation3 + $0x5e0] sm:$0xf0] %v2689_v39  ;;  %v6493_v13 = vsel %vm7152_vm8, %v2648_v10, %v2654_v28  ;;  %v2660_v42 = vpop.permute.xlu1 %2659  ;;  %vm7167_vm8 = vmmov %vm7164_vm5 }
 0x43e   :  { %v2690_v52 = vrot.slane %v6493_v13, 4  ;;  %v6498_v48 = vsel %vm7153_vm9, %v2654_v28, %v2660_v42  ;;  %v6502_v61 = vsel %vm7154_vm10, %v2660_v42, %v2642_v11  ;;  %2923 = vrot.lane.b32.xlu0 %v6294_v20, %s7142_s24  ;;  %vm7168_vm9 = vmmov %vm7164_vm5 }
 0x43f   :  { %v2691_v47 = vrot.slane %v6498_v48, 4  ;;  %v2692_v18 = vrot.slane %v6502_v61, 4  ;;  %2925 = vrot.lane.b32.xlu1 %v4994_v63, %s7142_s24  ;;  %vm7169_vm10 = vmmov %vm7164_vm5 }
 0x440   :  { %2722 = vst [vmem:[#allocation3 + $0x5e8] sm:$0xf0] %v2690_v52  ;;  %v2596_v41 = vpop.permute.xlu0 %2595 }
 0x441   :  { %2723 = vst [vmem:[#allocation3 + $0x5f0] sm:$0xf0] %v2691_v47  ;;  %2724 = vst [vmem:[#allocation3 + $0x5f8] sm:$0xf0] %v2692_v18  ;;  %v2598_v45 = vpop.permute.xlu1 %2597 }
 0x442   :  { %2929 = vrot.lane.b32.xlu0 %v6302_v59, %s7142_s24 }
 0x443   :  { %2931 = vrot.lane.b32.xlu1 %v5000_v2, %s7142_s24 }
 0x444   :  { %v2602_v51 = vpop.permute.xlu0 %2601 }
 0x445   :  { %v2624_v38 = vsel %vm7155_vm11, %v2596_v41, %v2602_v51  ;;  %v2604_v17 = vpop.permute.xlu1 %2603  ;;  %vm7170_vm11 = vmmov %vm7164_vm5 }
 0x446   :  { %v2625_v57 = vsel %vm7156_vm13, %v2598_v45, %v2604_v17  ;;  %2935 = vrot.lane.b32.xlu0 %v6266_v49, %s7142_s24  ;;  %vm7171_vm13 = vmmov %vm7164_vm5 }
 0x447   :  { %2637 = vst [vmem:[#allocation3 + $0x5e0] sm:$0xf] %v2625_v57  ;;  %2937 = vrot.lane.b32.xlu1 %v4996_v0, %s7142_s24 }
 0x448   :  { %v2608_v40 = vpop.permute.xlu0 %2607 }
 0x449   :  { %v2621_v15 = vsel %vm7157_vm14, %v2602_v51, %v2608_v40  ;;  %v2610_v54 = vpop.permute.xlu1 %2609  ;;  %v3085_v51 = vld [vmem:[%s6954_s3 + $0xc0] sm:$0x3]  ;;  %vm3383_vm14 = vcmask 949248  }
 0x44a   :  { %v2622_v5 = vsel %vm7158_vm0, %v2604_v17, %v2610_v54  ;;  %2941 = vrot.lane.b32.xlu0 %v6276_v35, %s7142_s24  ;;  %vm7172_vm0 = vcmp.lt.s32.totalorder %v4499_v14, 64 }
 0x44b   :  { %2638 = vst [vmem:[#allocation3 + $0x5e8] sm:$0xf] %v2622_v5  ;;  %2943 = vrot.lane.b32.xlu1 %v5002_v4, %s7142_s24 }
 0x44c   :  { %v2614_v7 = vpop.permute.xlu0 %2613 }
 0x44d   :  { %v2618_v53 = vsel %vm7159_vm1, %v2608_v40, %v2614_v7  ;;  %v2627_v3 = vsel %vm7160_vm2, %v2614_v7, %v2596_v41  ;;  %v2616_v25 = vpop.permute.xlu1 %2615  ;;  %vm7173_vm1 = vmmov %vm7172_vm0 }
 0x44e   :  { %v2619_v60 = vsel %vm7161_vm3, %v2610_v54, %v2616_v25  ;;  %v2628_v22 = vsel %vm7162_vm4, %v2616_v25, %v2598_v45  ;;  %3013 = vrot.lane.b32.xlu0 %v6290_v37, %s7163_s8  ;;  %v3277_v37 = vld [vmem:[#allocation3 + $0x5e0] sm:$0xff]  ;;  %v3342_v25 = vld [vmem:[%s6955_s4 + $0x8] sm:$0xff]  ;;  %vm7174_vm2 = vmmov %vm7172_vm0 }
 0x44f   :  { %2639 = vst [vmem:[#allocation3 + $0x5f0] sm:$0xf] %v2619_v60  ;;  %2640 = vst [vmem:[#allocation3 + $0x5f8] sm:$0xf] %v2628_v22  ;;  %3015 = vrot.lane.b32.xlu1 %v6294_v20, %s7163_s8  ;;  %v4047_v16 = vpack.c.bf16 %v3277_v37, %v2624_v38  ;;  %v3345_v37 = vld [vmem:[%s6955_s4 + $0x20] sm:$0xff] }
 0x450   :  { %v2644_v56 = vpop.permute.xlu0 %2643  ;;  %vm7175_vm3 = vmmov %vm7172_vm0 }
 0x451   :  { %v2646_v32 = vpop.permute.xlu1 %2645  ;;  %vm7176_vm4 = vmmov %vm7172_vm0 }
 0x452   :  { %3019 = vrot.lane.b32.xlu0 %v6298_v58, %s7163_s8  ;;  %v3278_v31 = vld [vmem:[#allocation3 + $0x5e8] sm:$0xff]  ;;  %v3077_v58 = vld [vmem:[%s6954_s3 + $0x80] sm:$0xff] }
 0x453   :  { %3021 = vrot.lane.b32.xlu1 %v6302_v59, %s7163_s8  ;;  %v4045_v20 = vpack.c.bf16 %v3278_v31, %v2621_v15  ;;  %3506 = vmatmul.mubr.f32.gmra.mrb[14].mxu0 %v3077_v58 }
 0x454   :  { %v2650_v24 = vpop.permute.xlu0 %2649  ;;  %3720 = vmatmul.mubr.f32.gmra.mrb[14].mxu1 %v3077_v58  ;;  %3511 = vmatprep.mubr.f32.mxu0 %v3082_v9 }
 0x455   :  { %v2672_v1 = vsel %vm7164_vm5, %v2644_v56, %v2650_v24  ;;  %v2652_v62 = vpop.permute.xlu1 %2651  ;;  %4046 = vmatprep.subr.bf16.mxu0 %v4045_v20  ;;  %3725 = vmatprep.mubr.f32.mxu1 %v3082_v9  ;;  %vm7177_vm5 = vmmov %vm7172_vm0 }
 0x456   :  { %v2693_v59 = vrot.slane %v2672_v1, 4  ;;  %v2673_v36 = vsel %vm7165_vm6, %v2646_v32, %v2652_v62  ;;  %3025 = vrot.lane.b32.xlu0 %v6310_v23, %s7163_s8  ;;  %4048 = vmatpush1.bf16.msra.mxu0 %v4047_v16  ;;  %v3280_v33 = vld [vmem:[#allocation3 + $0x5f8] sm:$0xff]  ;;  %v3279_v27 = vld [vmem:[#allocation3 + $0x5f0] sm:$0xff]  ;;  %v3081_v23 = vld [vmem:[%s6954_s3 + $0xa0] sm:$0xff] }
 0x457   :  { %v2701_v46 = vrot.slane %v2673_v36, 4  ;;  %3027 = vrot.lane.b32.xlu1 %v6266_v49, %s7163_s8  ;;  %v4169_v21 = vpack.c.bf16 %v3280_v33, %v2627_v3  ;;  %v4171_v8 = vpack.c.bf16 %v3279_v27, %v2618_v53  ;;  %3512 = vmatmul.mubr.f32.gmra.mrb[16].mxu0 %v3081_v23  ;;  %vm7178_vm6 = vmmov %vm7172_vm0  ;;  %v3347_v36 = vld [vmem:[%s6955_s4 + $0x30] sm:$0x3] }
 0x458   :  { %v2694_v43 = vsel %vm1428_vm12, %v2689_v39, %v2693_v59  ;;  %v2656_v12 = vpop.permute.xlu0 %2655  ;;  %3726 = vmatmul.mubr.f32.gmra.mrb[16].mxu1 %v3081_v23  ;;  %3517 = vmatprep.mubr.f32.mxu0 %v3086_v6 }
 0x459   :  { %v2702_v49 = vsel %vm1428_vm12, %v2693_v59, %v2701_v46  ;;  %v2669_v11 = vsel %vm7166_vm7, %v2650_v24, %v2656_v12  ;;  %v2658_v10 = vpop.permute.xlu1 %2657  ;;  %4170 = vmatprep.subr.bf16.mxu1 %v4169_v21  ;;  %3731 = vmatprep.mubr.f32.mxu1 %v3086_v6  ;;  %vm7179_vm7 = vmmov %vm7172_vm0 }
 0x45a   :  { %v2695_v39 = vrot.slane %v2669_v11, 4  ;;  %v2670_v28 = vsel %vm7167_vm8, %v2652_v62, %v2658_v10  ;;  %3031 = vrot.lane.b32.xlu0 %v6324_v44, %s7163_s8  ;;  %4172 = vmatpush1.bf16.msra.mxu1 %v4171_v8  ;;  %v4051_v7 = vpack.c.bf16 %v2702_v49, %v2694_v43  ;;  %vm7180_vm8 = vcmp.lt.s32.totalorder %v4499_v14, 63 }
 0x45b   :  { %v2703_v42 = vrot.slane %v2670_v28, 4  ;;  %3033 = vrot.lane.b32.xlu1 %v6276_v35, %s7163_s8  ;;  %3518 = vmatmul.mubr.f32.gmra.mrb[18].mxu0 %v3085_v51 }
 0x45c   :  { %v2696_v41 = vsel %vm1428_vm12, %v2690_v52, %v2695_v39  ;;  %v2662_v45 = vpop.permute.xlu0 %2661  ;;  %3732 = vmatmul.mubr.f32.gmra.mrb[18].mxu1 %v3085_v51  ;;  %3917 = vmatprep.mubr.msk.f32.mxu0 %vm3383_vm14, %v3064_v50 }
 0x45d   :  { %v2704_v38 = vsel %vm1428_vm12, %v2695_v39, %v2703_v42  ;;  %v2666_v44 = vsel %vm7168_vm9, %v2656_v12, %v2662_v45  ;;  %v2675_v35 = vsel %vm7169_vm10, %v2662_v45, %v2644_v56  ;;  %v2664_v17 = vpop.permute.xlu1 %2663  ;;  %3926 = vmatprep.mubr.msk.f32.mxu1 %vm3383_vm14, %v3064_v50  ;;  %vm7181_vm9 = vmmov %vm7180_vm8 }
 0x45e   :  { %v2697_v13 = vrot.slane %v2666_v44, 4  ;;  %v2699_v57 = vrot.slane %v2675_v35, 4  ;;  %v2667_v52 = vsel %vm7170_vm11, %v2658_v10, %v2664_v17  ;;  %v2676_v55 = vsel %vm7171_vm13, %v2664_v17, %v2646_v32  ;;  %3017 = vrot.lane.b32.xlu0 %v4994_v63, %s7163_s8  ;;  %vm7182_vm10 = vmmov %vm7180_vm8 }
 0x45f   :  { %v2705_v40 = vrot.slane %v2667_v52, 4  ;;  %v2707_v15 = vrot.slane %v2676_v55, 4  ;;  %3023 = vrot.lane.b32.xlu1 %v5000_v2, %s7163_s8  ;;  %v4049_v54 = vpack.c.bf16 %v2704_v38, %v2696_v41  ;;  %vm7183_vm11 = vmmov %vm7180_vm8 }
 0x460   :  { %v2698_v5 = vsel %vm1428_vm12, %v2691_v47, %v2697_v13  ;;  %v2700_v63 = vsel %vm1428_vm12, %v2692_v18, %v2699_v57  ;;  %v2734_v30 = vpop.permute.xlu0 %2733  ;;  %v3341_v47 = vld [vmem:[%s6955_s4] sm:$0xff]  ;;  %vm7184_vm13 = vmmov %vm7180_vm8 }
 0x461   :  { %v2706_v2 = vsel %vm1428_vm12, %v2697_v13, %v2705_v40  ;;  %v2708_v53 = vsel %vm1428_vm12, %v2699_v57, %v2707_v15  ;;  %v2736_v3 = vpop.permute.xlu1 %2735  ;;  %4050 = vmatprep.subr.bf16.mxu0 %v4049_v54 }
 0x462   :  { %3029 = vrot.lane.b32.xlu0 %v4996_v0, %s7163_s8  ;;  %4052 = vmatpush1.bf16.msra.mxu0 %v4051_v7  ;;  %v4173_v48 = vpack.c.bf16 %v2708_v53, %v2700_v63  ;;  %v4175_v61 = vpack.c.bf16 %v2706_v2, %v2698_v5 }
 0x463   :  { %3035 = vrot.lane.b32.xlu1 %v5002_v4, %s7163_s8  ;;  %v3343_v4 = vld [vmem:[%s6955_s4 + $0x10] sm:$0xff] }
 0x464   :  { %v2740_v18 = vpop.permute.xlu0 %2739  ;;  %4174 = vmatprep.subr.bf16.mxu1 %v4173_v48 }
 0x465   :  { %v2763_v26 = vsel %vm7172_vm0, %v2734_v30, %v2740_v18  ;;  %v2742_v0 = vpop.permute.xlu1 %2741  ;;  %4176 = vmatpush1.bf16.msra.mxu1 %v4175_v61  ;;  %vm7185_vm0 = vmmov %vm7180_vm8 }
 0x466   :  { %v2764_v60 = vsel %vm7173_vm1, %v2736_v3, %v2742_v0  ;;  %3350 = vperm.xlu0 %4285, %v3341_v47   ;;  %vm7186_vm1 = vmmov %vm7185_vm0 }
 0x467   :  { %3355 = vperm.xlu1 %4286, %v3342_v25   ;;  %v4055_v24 = vpack.c.bf16 %v2764_v60, %v2763_v26 }
 0x468   :  { %v2746_v22 = vpop.permute.xlu0 %2745 }
 0x469   :  { %v2760_v56 = vsel %vm7174_vm2, %v2740_v18, %v2746_v22  ;;  %v2748_v19 = vpop.permute.xlu1 %2747  ;;  %vm7187_vm2 = vmmov %vm7185_vm0 }
 0x46a   :  { %v2761_v32 = vsel %vm7175_vm3, %v2742_v0, %v2748_v19  ;;  %3360 = vperm.xlu0 %4285, %v3343_v4  }
 0x46b   :  { %3365 = vperm.xlu1 %4286, %v3344_v34   ;;  %v4053_v31 = vpack.c.bf16 %v2761_v32, %v2760_v56 }
 0x46c   :  { %v2752_v20 = vpop.permute.xlu0 %2751 }
 0x46d   :  { %v2757_v16 = vsel %vm7176_vm4, %v2746_v22, %v2752_v20  ;;  %v2766_v1 = vsel %vm7177_vm5, %v2752_v20, %v2734_v30  ;;  %v2754_v62 = vpop.permute.xlu1 %2753  ;;  %4054 = vmatprep.subr.bf16.mxu0 %v4053_v31  ;;  %vm7188_vm4 = vmmov %vm7175_vm3 }
 0x46e   :  { %v2758_v58 = vsel %vm7178_vm6, %v2748_v19, %v2754_v62  ;;  %v2767_v59 = vsel %vm7179_vm7, %v2754_v62, %v2736_v3  ;;  %3370 = vperm.xlu0 %4285, %v3345_v37   ;;  %4056 = vmatpush1.bf16.msra.mxu0 %v4055_v24  ;;  %vm7189_vm5 = vmmov %vm7175_vm3 }
 0x46f   :  { %3375 = vperm.xlu1 %4286, %v3346_v29   ;;  %v4177_v33 = vpack.c.bf16 %v2767_v59, %v2766_v1  ;;  %v4179_v27 = vpack.c.bf16 %v2758_v58, %v2757_v16  ;;  %vm7190_vm6 = vmmov %vm7175_vm3 }
 0x470   :  { %v2782_v46 = vpop.permute.xlu0 %2781  ;;  %vm7191_vm7 = vmmov %vm7185_vm0 }
 0x471   :  { %v2784_v21 = vpop.permute.xlu1 %2783  ;;  %4178 = vmatprep.subr.bf16.mxu1 %v4177_v33 }
 0x472   :  { %3380 = vperm.xlu0 %4285, %v3347_v36   ;;  %4180 = vmatpush1.bf16.msra.mxu1 %v4179_v27 }
 0x474   :  { %v2788_v8 = vpop.permute.xlu0 %2787 }
 0x475   :  { %v2811_v9 = vsel %vm7180_vm8, %v2782_v46, %v2788_v8  ;;  %v2790_v43 = vpop.permute.xlu1 %2789  ;;  %vm7192_vm8 = vmmov %vm7185_vm0 }
 0x476   :  { %v2829_v12 = vrot.slane %v2811_v9, 4  ;;  %v2812_v23 = vsel %vm7181_vm9, %v2784_v21, %v2790_v43  ;;  %vm7193_vm9 = vmmov %vm7185_vm0 }
 0x477   :  { %v2833_v49 = vrot.slane %v2812_v23, 4 }
 0x478   :  { %2861 = vst [vmem:[#allocation3 + $0x680] sm:$0xf0] %v2829_v12  ;;  %v2794_v11 = vpop.permute.xlu0 %2793 }
 0x479   :  { %v2834_v10 = vsel %vm1428_vm12, %v2829_v12, %v2833_v49  ;;  %v2808_v6 = vsel %vm7182_vm10, %v2788_v8, %v2794_v11  ;;  %v2796_v39 = vpop.permute.xlu1 %2795  ;;  %vm7194_vm10 = vmmov %vm7185_vm0 }
 0x47a   :  { %v2830_v28 = vrot.slane %v2808_v6, 4  ;;  %v2809_v42 = vsel %vm7183_vm11, %v2790_v43, %v2796_v39  ;;  %vm7195_vm11 = vcmp.lt.s32.totalorder %v4499_v14, 62 }
 0x47b   :  { %v2835_v41 = vrot.slane %v2809_v42, 4 }
 0x47c   :  { %2862 = vst [vmem:[#allocation3 + $0x688] sm:$0xf0] %v2830_v28  ;;  %v2800_v45 = vpop.permute.xlu0 %2799 }
 0x47d   :  { %v2836_v51 = vsel %vm1428_vm12, %v2830_v28, %v2835_v41  ;;  %v2805_v38 = vsel %vm7184_vm13, %v2794_v11, %v2800_v45  ;;  %v2814_v44 = vsel %vm7185_vm0, %v2800_v45, %v2782_v46  ;;  %v2802_v35 = vpop.permute.xlu1 %2801  ;;  %vm7196_vm13 = vmmov %vm7195_vm11 }
 0x47e   :  { %v2831_v17 = vrot.slane %v2805_v38, 4  ;;  %v2832_v13 = vrot.slane %v2814_v44, 4  ;;  %v2806_v57 = vsel %vm7186_vm1, %v2796_v39, %v2802_v35  ;;  %v2815_v52 = vsel %vm7187_vm2, %v2802_v35, %v2784_v21  ;;  %vm7197_vm0 = vmmov %vm7195_vm11 }
 0x47f   :  { %v2837_v55 = vrot.slane %v2806_v57, 4  ;;  %v2839_v40 = vrot.slane %v2815_v52, 4  ;;  %vm7198_vm1 = vmmov %vm7197_vm0  ;;  %vm7199_vm2 = vcmp.lt.s32.totalorder %v4499_v14, 61  ;;  %v3067_v14 = vld [vmem:[%s6954_s3 + $0x30] sm:$0xff] }
 0x480   :  { %2863 = vst [vmem:[#allocation3 + $0x690] sm:$0xf0] %v2831_v17  ;;  %2864 = vst [vmem:[#allocation3 + $0x698] sm:$0xf0] %v2832_v13  ;;  %v2738_v15 = vpop.permute.xlu0 %2737 }
 0x481   :  { %v2838_v54 = vsel %vm1428_vm12, %v2831_v17, %v2837_v55  ;;  %v2840_v50 = vsel %vm1428_vm12, %v2832_v13, %v2839_v40  ;;  %v2744_v5 = vpop.permute.xlu1 %2743 }
 0x482   :  { %v2765_v63 = vsel %vm7175_vm3, %v2738_v15, %v2744_v5  ;;  %vm7200_vm3 = vmmov %vm7199_vm2 }
 0x483   :  { %2777 = vst [vmem:[#allocation3 + $0x680] sm:$0xf] %v2765_v63 }
 0x484   :  { %v2750_v30 = vpop.permute.xlu0 %2749 }
 0x485   :  { %v2762_v7 = vsel %vm7188_vm4, %v2744_v5, %v2750_v30  ;;  %v2756_v2 = vpop.permute.xlu1 %2755  ;;  %vm7201_vm4 = vmmov %vm7199_vm2 }
 0x486   :  { %2778 = vst [vmem:[#allocation3 + $0x688] sm:$0xf] %v2762_v7  ;;  %v2759_v53 = vsel %vm7189_vm5, %v2750_v30, %v2756_v2  ;;  %v2768_v3 = vsel %vm7190_vm6, %v2756_v2, %v2738_v15  ;;  %vm7202_vm5 = vmmov %vm7199_vm2 }
 0x487   :  { %2779 = vst [vmem:[#allocation3 + $0x690] sm:$0xf] %v2759_v53  ;;  %2780 = vst [vmem:[#allocation3 + $0x698] sm:$0xf] %v2768_v3 }
 0x488   :  { %v2786_v48 = vpop.permute.xlu0 %2785  ;;  %vm7203_vm6 = vmmov %vm7197_vm0 }
 0x489   :  { %v2792_v61 = vpop.permute.xlu1 %2791 }
 0x48a   :  { %v2813_v47 = vsel %vm7191_vm7, %v2786_v48, %v2792_v61  ;;  %v3297_v18 = vld [vmem:[#allocation3 + $0x680] sm:$0xff]  ;;  %vm7204_vm7 = vmmov %vm7197_vm0 }
 0x48b   :  { %v2841_v25 = vrot.slane %v2813_v47, 4  ;;  %v4059_v34 = vpack.c.bf16 %v2834_v10, %v3297_v18 }
 0x48c   :  { %v2798_v26 = vpop.permute.xlu0 %2797 }
 0x48d   :  { %v2842_v0 = vsel %vm1428_vm12, %v2833_v49, %v2841_v25  ;;  %v2810_v60 = vsel %vm7192_vm8, %v2792_v61, %v2798_v26  ;;  %v2804_v4 = vpop.permute.xlu1 %2803  ;;  %v3298_v22 = vld [vmem:[#allocation3 + $0x688] sm:$0xff]  ;;  %vm7205_vm8 = vmmov %vm7197_vm0 }
 0x48e   :  { %v2843_v56 = vrot.slane %v2810_v60, 4  ;;  %v2807_v19 = vsel %vm7193_vm9, %v2798_v26, %v2804_v4  ;;  %v2816_v32 = vsel %vm7194_vm10, %v2804_v4, %v2786_v48  ;;  %v4057_v37 = vpack.c.bf16 %v2836_v51, %v3298_v22  ;;  %v3300_v31 = vld [vmem:[#allocation3 + $0x698] sm:$0xff]  ;;  %v3299_v20 = vld [vmem:[#allocation3 + $0x690] sm:$0xff]  ;;  %vm7206_vm9 = vmmov %vm7197_vm0 }
 0x48f   :  { %v2845_v29 = vrot.slane %v2807_v19, 4  ;;  %v2847_v24 = vrot.slane %v2816_v32, 4  ;;  %v4181_v16 = vpack.c.bf16 %v2840_v50, %v3300_v31  ;;  %v4183_v1 = vpack.c.bf16 %v2838_v54, %v3299_v20  ;;  %vm7207_vm10 = vmmov %vm7197_vm0 }
 0x490   :  { %v2844_v62 = vsel %vm1428_vm12, %v2835_v41, %v2843_v56  ;;  %v2874_v58 = vpop.permute.xlu0 %2873  ;;  %4058 = vmatprep.subr.bf16.mxu0 %v4057_v37 }
 0x491   :  { %v2846_v59 = vsel %vm1428_vm12, %v2837_v55, %v2845_v29  ;;  %v2848_v36 = vsel %vm1428_vm12, %v2839_v40, %v2847_v24  ;;  %v2880_v33 = vpop.permute.xlu1 %2879  ;;  %4060 = vmatpush1.bf16.msra.mxu0 %v4059_v34  ;;  %4182 = vmatprep.subr.bf16.mxu1 %v4181_v16 }
 0x492   :  { %v2903_v27 = vsel %vm7195_vm11, %v2874_v58, %v2880_v33  ;;  %4184 = vmatpush1.bf16.msra.mxu1 %v4183_v1  ;;  %vm7208_vm11 = vmmov %vm7197_vm0 }
 0x493   :  { %v4063_v23 = vpack.c.bf16 %v2903_v27, %v2842_v0 }
 0x494   :  { %v2886_v46 = vpop.permute.xlu0 %2885 }
 0x495   :  { %v2900_v21 = vsel %vm7196_vm13, %v2880_v33, %v2886_v46  ;;  %v2892_v8 = vpop.permute.xlu1 %2891  ;;  %vm7209_vm13 = vmmov %vm7197_vm0 }
 0x496   :  { %v2897_v9 = vsel %vm7197_vm0, %v2886_v46, %v2892_v8  ;;  %v2906_v43 = vsel %vm7198_vm1, %v2892_v8, %v2874_v58  ;;  %v4061_v12 = vpack.c.bf16 %v2900_v21, %v2844_v62  ;;  %vm7210_vm1 = vmmov %vm7199_vm2 }
 0x497   :  { %v4185_v49 = vpack.c.bf16 %v2906_v43, %v2848_v36  ;;  %v4187_v11 = vpack.c.bf16 %v2897_v9, %v2846_v59 }
 0x498   :  { %v2922_v10 = vpop.permute.xlu0 %2921  ;;  %4062 = vmatprep.subr.bf16.mxu0 %v4061_v12 }
 0x499   :  { %v2928_v6 = vpop.permute.xlu1 %2927  ;;  %4064 = vmatpush1.bf16.msra.mxu0 %v4063_v23  ;;  %4186 = vmatprep.subr.bf16.mxu1 %v4185_v49 }
 0x49a   :  { %v2951_v39 = vsel %vm7199_vm2, %v2922_v10, %v2928_v6  ;;  %4188 = vmatpush1.bf16.msra.mxu1 %v4187_v11  ;;  %vm7211_vm2 = vmmov %vm7210_vm1 }
 0x49b   :  { %v2969_v28 = vrot.slane %v2951_v39, 4 }
 0x49c   :  { %v2934_v42 = vpop.permute.xlu0 %2933 }
 0x49d   :  { %3001 = vst [vmem:[#allocation3 + $0x720] sm:$0xf0] %v2969_v28  ;;  %v2948_v41 = vsel %vm7200_vm3, %v2928_v6, %v2934_v42  ;;  %v2940_v45 = vpop.permute.xlu1 %2939  ;;  %vm7212_vm3 = vmmov %vm7210_vm1 }
 0x49e   :  { %v2970_v51 = vrot.slane %v2948_v41, 4  ;;  %v6732_v38 = vsel %vm7201_vm4, %v2934_v42, %v2940_v45  ;;  %v6736_v44 = vsel %vm7202_vm5, %v2940_v45, %v2922_v10  ;;  %vm7213_vm4 = vmmov %vm7210_vm1 }
 0x49f   :  { %v2971_v35 = vrot.slane %v6732_v38, 4  ;;  %v2972_v17 = vrot.slane %v6736_v44, 4  ;;  %vm7214_vm5 = vmmov %vm7210_vm1 }
 0x4a0   :  { %3002 = vst [vmem:[#allocation3 + $0x728] sm:$0xf0] %v2970_v51  ;;  %v2876_v13 = vpop.permute.xlu0 %2875 }
 0x4a1   :  { %3003 = vst [vmem:[#allocation3 + $0x730] sm:$0xf0] %v2971_v35  ;;  %3004 = vst [vmem:[#allocation3 + $0x738] sm:$0xf0] %v2972_v17  ;;  %v2878_v57 = vpop.permute.xlu1 %2877 }
 0x4a4   :  { %v2882_v52 = vpop.permute.xlu0 %2881 }
 0x4a5   :  { %v2904_v55 = vsel %vm7203_vm6, %v2876_v13, %v2882_v52  ;;  %v2884_v40 = vpop.permute.xlu1 %2883  ;;  %vm7215_vm6 = vmmov %vm7210_vm1 }
 0x4a6   :  { %v2905_v15 = vsel %vm7204_vm7, %v2878_v57, %v2884_v40  ;;  %vm7216_vm7 = vmmov %vm7210_vm1 }
 0x4a7   :  { %2917 = vst [vmem:[#allocation3 + $0x720] sm:$0xf] %v2905_v15 }
 0x4a8   :  { %v2888_v54 = vpop.permute.xlu0 %2887 }
 0x4a9   :  { %v2901_v50 = vsel %vm7205_vm8, %v2882_v52, %v2888_v54  ;;  %v2890_v5 = vpop.permute.xlu1 %2889  ;;  %vm7217_vm8 = vmmov %vm7210_vm1 }
 0x4aa   :  { %v2902_v63 = vsel %vm7206_vm9, %v2884_v40, %v2890_v5 }
 0x4ab   :  { %2918 = vst [vmem:[#allocation3 + $0x728] sm:$0xf] %v2902_v63 }
 0x4ac   :  { %v2894_v30 = vpop.permute.xlu0 %2893 }
 0x4ad   :  { %v2898_v7 = vsel %vm7207_vm10, %v2888_v54, %v2894_v30  ;;  %v2907_v2 = vsel %vm7208_vm11, %v2894_v30, %v2876_v13  ;;  %v2896_v53 = vpop.permute.xlu1 %2895 }
 0x4ae   :  { %v2899_v3 = vsel %vm7209_vm13, %v2890_v5, %v2896_v53  ;;  %v2908_v48 = vsel %vm7197_vm0, %v2896_v53, %v2878_v57  ;;  %v3317_v18 = vld [vmem:[#allocation3 + $0x720] sm:$0xff] }
 0x4af   :  { %2919 = vst [vmem:[#allocation3 + $0x730] sm:$0xf] %v2899_v3  ;;  %2920 = vst [vmem:[#allocation3 + $0x738] sm:$0xf] %v2908_v48  ;;  %v4067_v60 = vpack.c.bf16 %v3317_v18, %v2904_v55 }
 0x4b0   :  { %v2924_v61 = vpop.permute.xlu0 %2923 }
 0x4b1   :  { %v2926_v47 = vpop.permute.xlu1 %2925 }
 0x4b2   :  { %v3318_v25 = vld [vmem:[#allocation3 + $0x728] sm:$0xff] }
 0x4b3   :  { %v4065_v26 = vpack.c.bf16 %v3318_v25, %v2901_v50 }
 0x4b4   :  { %v2930_v0 = vpop.permute.xlu0 %2929 }
 0x4b5   :  { %v2952_v4 = vsel %vm7210_vm1, %v2924_v61, %v2930_v0  ;;  %v2932_v22 = vpop.permute.xlu1 %2931  ;;  %4066 = vmatprep.subr.bf16.mxu0 %v4065_v26 }
 0x4b6   :  { %v2973_v34 = vrot.slane %v2952_v4, 4  ;;  %v2953_v56 = vsel %vm7211_vm2, %v2926_v47, %v2932_v22  ;;  %4068 = vmatpush1.bf16.msra.mxu0 %v4067_v60  ;;  %v3320_v19 = vld [vmem:[#allocation3 + $0x738] sm:$0xff]  ;;  %v3319_v32 = vld [vmem:[#allocation3 + $0x730] sm:$0xff] }
 0x4b7   :  { %v2981_v37 = vrot.slane %v2953_v56, 4  ;;  %v4189_v31 = vpack.c.bf16 %v3320_v19, %v2907_v2  ;;  %v4191_v20 = vpack.c.bf16 %v3319_v32, %v2898_v7  ;;  %v3063_v56 = vld [vmem:[%s6954_s3 + $0x10] sm:$0xff]  ;;  %v3068_v19 = vld [vmem:[%s6954_s3 + $0x38] sm:$0xff] }
 0x4b8   :  { %v2974_v29 = vsel %vm1428_vm12, %v2969_v28, %v2973_v34  ;;  %v2936_v24 = vpop.permute.xlu0 %2935 }
 0x4b9   :  { %v2982_v16 = vsel %vm1428_vm12, %v2973_v34, %v2981_v37  ;;  %v2949_v1 = vsel %vm7212_vm3, %v2930_v0, %v2936_v24  ;;  %v2938_v62 = vpop.permute.xlu1 %2937  ;;  %4190 = vmatprep.subr.bf16.mxu1 %v4189_v31 }
 0x4ba   :  { %v2975_v58 = vrot.slane %v2949_v1, 4  ;;  %v2950_v59 = vsel %vm7213_vm4, %v2932_v22, %v2938_v62  ;;  %4192 = vmatpush1.bf16.msra.mxu1 %v4191_v20  ;;  %v4071_v41 = vpack.c.bf16 %v2982_v16, %v2974_v29  ;;  %v3072_v20 = vld [vmem:[%s6954_s3 + $0x58] sm:$0xff]  ;;  %v3071_v29 = vld [vmem:[%s6954_s3 + $0x50] sm:$0xff] }
 0x4bb   :  { %v2983_v36 = vrot.slane %v2950_v59, 4  ;;  %v3075_v16 = vld [vmem:[%s6954_s3 + $0x70] sm:$0xff]  ;;  %v3080_v1 = vld [vmem:[%s6954_s3 + $0x98] sm:$0xff] }
 0x4bc   :  { %v2976_v33 = vsel %vm1428_vm12, %v2970_v51, %v2975_v58  ;;  %v2942_v27 = vpop.permute.xlu0 %2941  ;;  %v3083_v59 = vld [vmem:[%s6954_s3 + $0xb0] sm:$0xff] }
 0x4bd   :  { %v2984_v46 = vsel %vm1428_vm12, %v2975_v58, %v2983_v36  ;;  %v2946_v21 = vsel %vm7214_vm5, %v2936_v24, %v2942_v27  ;;  %v2955_v8 = vsel %vm7215_vm6, %v2942_v27, %v2924_v61  ;;  %v2944_v9 = vpop.permute.xlu1 %2943  ;;  %v3076_v24 = vld [vmem:[%s6954_s3 + $0x78] sm:$0xff] }
 0x4be   :  { %v2977_v43 = vrot.slane %v2946_v21, 4  ;;  %v2979_v12 = vrot.slane %v2955_v8, 4  ;;  %v2947_v23 = vsel %vm7216_vm7, %v2938_v62, %v2944_v9  ;;  %v2956_v49 = vsel %vm7217_vm8, %v2944_v9, %v2926_v47  ;;  %v3079_v62 = vld [vmem:[%s6954_s3 + $0x90] sm:$0xff]  ;;  %v3084_v58 = vld [vmem:[%s6954_s3 + $0xb8] sm:$0xff] }
 0x4bf   :  { %v2985_v11 = vrot.slane %v2947_v23, 4  ;;  %v2987_v10 = vrot.slane %v2956_v49, 4  ;;  %v4069_v6 = vpack.c.bf16 %v2984_v46, %v2976_v33  ;;  %v3088_v36 = vld [vmem:[%s6954_s3 + $0xd8] sm:$0x3]  ;;  %v3087_v33 = vld [vmem:[%s6954_s3 + $0xd0] sm:$0x3] }
 0x4c0   :  { %v2978_v39 = vsel %vm1428_vm12, %v2971_v35, %v2977_v43  ;;  %v2980_v28 = vsel %vm1428_vm12, %v2972_v17, %v2979_v12  ;;  %v3014_v42 = vpop.permute.xlu0 %3013 }
 0x4c1   :  { %v2986_v45 = vsel %vm1428_vm12, %v2977_v43, %v2985_v11  ;;  %v2988_v51 = vsel %vm1428_vm12, %v2979_v12, %v2987_v10  ;;  %v3016_v13 = vpop.permute.xlu1 %3015  ;;  %4070 = vmatprep.subr.bf16.mxu0 %v4069_v6 }
 0x4c2   :  { %4072 = vmatpush1.bf16.msra.mxu0 %v4071_v41  ;;  %v4193_v57 = vpack.c.bf16 %v2988_v51, %v2980_v28  ;;  %v4195_v52 = vpack.c.bf16 %v2986_v45, %v2978_v39 }
 0x4c4   :  { %v3020_v55 = vpop.permute.xlu0 %3019  ;;  %4194 = vmatprep.subr.bf16.mxu1 %v4193_v57 }
 0x4c5   :  { %v3043_v38 = vsel %vm1093_vm15, %v3014_v42, %v3020_v55  ;;  %v3022_v35 = vpop.permute.xlu1 %3021  ;;  %4196 = vmatpush1.bf16.msra.mxu1 %v4195_v52 }
 0x4c6   :  { %v3044_v44 = vsel %vm1093_vm15, %v3016_v13, %v3022_v35 }
 0x4c7   :  { %v4075_v63 = vpack.c.bf16 %v3044_v44, %v3043_v38 }
 0x4c8   :  { %v3026_v17 = vpop.permute.xlu0 %3025 }
 0x4c9   :  { %v3040_v40 = vsel %vm1093_vm15, %v3020_v55, %v3026_v17  ;;  %v3028_v15 = vpop.permute.xlu1 %3027 }
 0x4ca   :  { %v3041_v54 = vsel %vm1093_vm15, %v3022_v35, %v3028_v15 }
 0x4cb   :  { %v4073_v50 = vpack.c.bf16 %v3041_v54, %v3040_v40 }
 0x4cc   :  { %v3032_v5 = vpop.permute.xlu0 %3031 }
 0x4cd   :  { %v3037_v30 = vsel %vm1093_vm15, %v3026_v17, %v3032_v5  ;;  %v3046_v7 = vsel %vm1093_vm15, %v3032_v5, %v3014_v42  ;;  %v3034_v2 = vpop.permute.xlu1 %3033  ;;  %4074 = vmatprep.subr.bf16.mxu0 %v4073_v50 }
 0x4ce   :  { %v3038_v53 = vsel %vm1093_vm15, %v3028_v15, %v3034_v2  ;;  %v3047_v3 = vsel %vm1093_vm15, %v3034_v2, %v3016_v13  ;;  %4076 = vmatpush1.bf16.msra.mxu0 %v4075_v63 }
 0x4cf   :  { %v4197_v48 = vpack.c.bf16 %v3047_v3, %v3046_v7  ;;  %v4199_v61 = vpack.c.bf16 %v3038_v53, %v3037_v30 }
 0x4d0   :  { %v3018_v47 = vpop.permute.xlu0 %3017 }
 0x4d1   :  { %v3024_v18 = vpop.permute.xlu1 %3023  ;;  %4198 = vmatprep.subr.bf16.mxu1 %v4197_v48 }
 0x4d2   :  { %v3045_v25 = vsel %vm1093_vm15, %v3018_v47, %v3024_v18  ;;  %4200 = vmatpush1.bf16.msra.mxu1 %v4199_v61 }
 0x4d3   :  { %3057 = vst [vmem:[#allocation3 + $0x7c0] sm:$0xf] %v3045_v25 }
 0x4d4   :  { %v3030_v26 = vpop.permute.xlu0 %3029 }
 0x4d5   :  { %v3042_v0 = vsel %vm1093_vm15, %v3024_v18, %v3030_v26  ;;  %v3036_v60 = vpop.permute.xlu1 %3035 }
 0x4d6   :  { %3058 = vst [vmem:[#allocation3 + $0x7c8] sm:$0xf] %v3042_v0  ;;  %v3039_v4 = vsel %vm1093_vm15, %v3030_v26, %v3036_v60  ;;  %v3048_v22 = vsel %vm1093_vm15, %v3036_v60, %v3018_v47 }
 0x4d7   :  { %3059 = vst [vmem:[#allocation3 + $0x7d0] sm:$0xf] %v3039_v4  ;;  %3060 = vst [vmem:[#allocation3 + $0x7d8] sm:$0xf] %v3048_v22 }
 0x4da   :  { %v3337_v32 = vld [vmem:[#allocation3 + $0x7c0] sm:$0xf] }
 0x4dd   :  { %v3338_v34 = vld [vmem:[#allocation3 + $0x7c8] sm:$0xf] }
 0x4de   :  { %3915 = vmatprep.subr.msk.mxu0 %vm1428_vm12, %v3338_v34  ;;  %v3340_v37 = vld [vmem:[#allocation3 + $0x7d8] sm:$0xf]  ;;  %v3339_v31 = vld [vmem:[#allocation3 + $0x7d0] sm:$0xf] }
 0x4df   :  { %3916 = vmatpush1.msk.msra.mxu0 %vm1428_vm12, %v3337_v32  ;;  %3924 = vmatprep.subr.msk.mxu1 %vm1428_vm12, %v3340_v37 }
 0x4e0   :  { %3589 = vmatmul.mubr.f32.vlgmr.msra.gmra.mrb[6].mxu0 %v3063_v56  ;;  %3925 = vmatpush1.msk.msra.mxu1 %vm1428_vm12, %v3339_v31 }
 0x4e1   :  { %3803 = vmatmul.mubr.f32.vlgmr.msra.gmra.mrb[6].mxu1 %v3063_v56  ;;  %3918 = vmatprep.mubr.msk.f32.mxu0 %vm3383_vm14, %v3068_v19 }
 0x4e2   :  { %3927 = vmatprep.mubr.msk.f32.mxu1 %vm3383_vm14, %v3068_v19 }
 0x4e4   :  { %3595 = vmatmul.mubr.f32.gmra.mrb[8].mxu0 %v3067_v14 }
 0x4e5   :  { %3809 = vmatmul.mubr.f32.gmra.mrb[8].mxu1 %v3067_v14  ;;  %3919 = vmatprep.mubr.msk.f32.mxu0 %vm3383_vm14, %v3072_v20  ;;  %v3351_v27 = vpop.permute.xlu0 %3350 }
 0x4e6   :  { %3928 = vmatprep.mubr.msk.f32.mxu1 %vm3383_vm14, %v3072_v20  ;;  %v3356_v10 = vpop.permute.xlu1 %3355 }
 0x4e8   :  { %3601 = vmatmul.mubr.f32.gmra.mrb[10].mxu0 %v3071_v29 }
 0x4e9   :  { %3815 = vmatmul.mubr.f32.gmra.mrb[10].mxu1 %v3071_v29  ;;  %3920 = vmatprep.mubr.msk.f32.mxu0 %vm3383_vm14, %v3076_v24  ;;  %v3361_v35 = vpop.permute.xlu0 %3360 }
 0x4ea   :  { %3929 = vmatprep.mubr.msk.f32.mxu1 %vm3383_vm14, %v3076_v24  ;;  %v3366_v3 = vpop.permute.xlu1 %3365 }
 0x4ec   :  { %3607 = vmatmul.mubr.f32.gmra.mrb[12].mxu0 %v3075_v16 }
 0x4ed   :  { %3821 = vmatmul.mubr.f32.gmra.mrb[12].mxu1 %v3075_v16  ;;  %3921 = vmatprep.mubr.msk.f32.mxu0 %vm3383_vm14, %v3080_v1  ;;  %v3371_v19 = vpop.permute.xlu0 %3370 }
 0x4ee   :  { %3930 = vmatprep.mubr.msk.f32.mxu1 %vm3383_vm14, %v3080_v1 }
 0x4f0   :  { %3613 = vmatmul.mubr.f32.gmra.mrb[14].mxu0 %v3079_v62 }
 0x4f1   :  { %3827 = vmatmul.mubr.f32.gmra.mrb[14].mxu1 %v3079_v62  ;;  %3922 = vmatprep.mubr.msk.f32.mxu0 %vm3383_vm14, %v3084_v58 }
 0x4f2   :  { %3931 = vmatprep.mubr.msk.f32.mxu1 %vm3383_vm14, %v3084_v58 }
 0x4f4   :  { %3619 = vmatmul.mubr.f32.gmra.mrb[16].mxu0 %v3083_v59 }
 0x4f5   :  { %3833 = vmatmul.mubr.f32.gmra.mrb[16].mxu1 %v3083_v59  ;;  %3923 = vmatprep.mubr.msk.f32.mxu0 %vm3383_vm14, %v3088_v36 }
 0x4f6   :  { %3932 = vmatprep.mubr.msk.f32.mxu1 %vm3383_vm14, %v3088_v36  ;;  %v3376_v36 = vpop.permute.xlu1 %3375 }
 0x4f8   :  { %3625 = vmatmul.mubr.f32.gmra.mrb[18].mxu0 %v3087_v33 }
 0x4f9   :  { %3839 = vmatmul.mubr.f32.gmra.mrb[18].mxu1 %v3087_v33 }
 0x5b3   :  { %v3590_v46 = vpop.f32.mrb[6].mxu0 }
 0x5b4   :  { %v4201_v21 = vadd.f32 %v3590_v46, %v3351_v27  ;;  %v3592_v8 = vpop.f32.mrb[7].mxu0  ;;  %v3804_v9 = vpop.f32.mrb[6].mxu1 }
 0x5b5   :  { %v4202_v43 = vadd.f32 %v3592_v8, %v3351_v27  ;;  %v4215_v12 = vadd.f32 %v3804_v9, %v3351_v27  ;;  %v3806_v23 = vpop.f32.mrb[7].mxu1 }
 0x5b6   :  { %v3845_v49 = vmax.f32 %v4201_v21, 0.0  ;;  %v4216_v11 = vadd.f32 %v3806_v23, %v3351_v27 }
 0x5b7   :  { %v3846_v6 = vmax.f32 %v4202_v43, 0.0  ;;  %v3847_v39 = vmax.f32 %v4215_v12, 0.0  ;;  %v3596_v28 = vpop.f32.mrb[8].mxu0 }
 0x5b8   :  { %3873 = vst [vmem:[%s6956_s5] sm:$0xff] %v3845_v49  ;;  %v3848_v42 = vmax.f32 %v4216_v11, 0.0  ;;  %v4203_v41 = vadd.f32 %v3596_v28, %v3356_v10  ;;  %v3598_v45 = vpop.f32.mrb[9].mxu0  ;;  %v3810_v51 = vpop.f32.mrb[8].mxu1 }
 0x5b9   :  { %3874 = vst [vmem:[%s6956_s5 + $0x8] sm:$0xff] %v3846_v6  ;;  %3875 = vst [vmem:[%s6956_s5 + $0x10] sm:$0xff] %v3847_v39  ;;  %v4204_v13 = vadd.f32 %v3598_v45, %v3356_v10  ;;  %v4217_v57 = vadd.f32 %v3810_v51, %v3356_v10  ;;  %v3812_v52 = vpop.f32.mrb[9].mxu1  ;;  %v3381_v6 = vpop.permute.xlu0 %3380 }
 0x5ba   :  { %3876 = vst [vmem:[%s6956_s5 + $0x18] sm:$0xff] %v3848_v42  ;;  %v3849_v55 = vmax.f32 %v4203_v41, 0.0  ;;  %v4218_v38 = vadd.f32 %v3812_v52, %v3356_v10 }
 0x5bb   :  { %v3850_v44 = vmax.f32 %v4204_v13, 0.0  ;;  %v3851_v17 = vmax.f32 %v4217_v57, 0.0  ;;  %v3602_v40 = vpop.f32.mrb[10].mxu0 }
 0x5bc   :  { %3877 = vst [vmem:[%s6956_s5 + $0x20] sm:$0xff] %v3849_v55  ;;  %v3852_v15 = vmax.f32 %v4218_v38, 0.0  ;;  %v4205_v54 = vadd.f32 %v3602_v40, %v3361_v35  ;;  %v3604_v50 = vpop.f32.mrb[11].mxu0  ;;  %v3816_v5 = vpop.f32.mrb[10].mxu1 }
 0x5bd   :  { %3878 = vst [vmem:[%s6956_s5 + $0x28] sm:$0xff] %v3850_v44  ;;  %3879 = vst [vmem:[%s6956_s5 + $0x30] sm:$0xff] %v3851_v17  ;;  %v4206_v63 = vadd.f32 %v3604_v50, %v3361_v35  ;;  %v4219_v30 = vadd.f32 %v3816_v5, %v3361_v35  ;;  %v3818_v7 = vpop.f32.mrb[11].mxu1 }
 0x5be   :  { %3880 = vst [vmem:[%s6956_s5 + $0x38] sm:$0xff] %v3852_v15  ;;  %v3853_v2 = vmax.f32 %v4205_v54, 0.0  ;;  %v4220_v53 = vadd.f32 %v3818_v7, %v3361_v35 }
 0x5bf   :  { %v3854_v48 = vmax.f32 %v4206_v63, 0.0  ;;  %v3855_v61 = vmax.f32 %v4219_v30, 0.0  ;;  %v3608_v47 = vpop.f32.mrb[12].mxu0 }
 0x5c0   :  { %3881 = vst [vmem:[%s6956_s5 + $0x40] sm:$0xff] %v3853_v2  ;;  %v3856_v18 = vmax.f32 %v4220_v53, 0.0  ;;  %v4207_v25 = vadd.f32 %v3608_v47, %v3366_v3  ;;  %v3610_v26 = vpop.f32.mrb[13].mxu0  ;;  %v3822_v0 = vpop.f32.mrb[12].mxu1 }
 0x5c1   :  { %3882 = vst [vmem:[%s6956_s5 + $0x48] sm:$0xff] %v3854_v48  ;;  %3883 = vst [vmem:[%s6956_s5 + $0x50] sm:$0xff] %v3855_v61  ;;  %v4208_v60 = vadd.f32 %v3610_v26, %v3366_v3  ;;  %v4221_v4 = vadd.f32 %v3822_v0, %v3366_v3  ;;  %v3824_v22 = vpop.f32.mrb[13].mxu1 }
 0x5c2   :  { %3884 = vst [vmem:[%s6956_s5 + $0x58] sm:$0xff] %v3856_v18  ;;  %v3857_v34 = vmax.f32 %v4207_v25, 0.0  ;;  %v4222_v56 = vadd.f32 %v3824_v22, %v3366_v3 }
 0x5c3   :  { %v3858_v32 = vmax.f32 %v4208_v60, 0.0  ;;  %v3859_v37 = vmax.f32 %v4221_v4, 0.0  ;;  %v3614_v31 = vpop.f32.mrb[14].mxu0 }
 0x5c4   :  { %3885 = vst [vmem:[%s6956_s5 + $0x60] sm:$0xff] %v3857_v34  ;;  %v3860_v14 = vmax.f32 %v4222_v56, 0.0  ;;  %v4209_v20 = vadd.f32 %v3614_v31, %v3371_v19  ;;  %v3616_v29 = vpop.f32.mrb[15].mxu0  ;;  %v3828_v24 = vpop.f32.mrb[14].mxu1 }
 0x5c5   :  { %3886 = vst [vmem:[%s6956_s5 + $0x68] sm:$0xff] %v3858_v32  ;;  %3887 = vst [vmem:[%s6956_s5 + $0x70] sm:$0xff] %v3859_v37  ;;  %v4210_v16 = vadd.f32 %v3616_v29, %v3371_v19  ;;  %v4223_v1 = vadd.f32 %v3828_v24, %v3371_v19  ;;  %v3830_v62 = vpop.f32.mrb[15].mxu1 }
 0x5c6   :  { %3888 = vst [vmem:[%s6956_s5 + $0x78] sm:$0xff] %v3860_v14  ;;  %v3861_v58 = vmax.f32 %v4209_v20, 0.0  ;;  %v4224_v59 = vadd.f32 %v3830_v62, %v3371_v19 }
 0x5c7   :  { %v3862_v33 = vmax.f32 %v4210_v16, 0.0  ;;  %v3863_v27 = vmax.f32 %v4223_v1, 0.0  ;;  %v3620_v46 = vpop.f32.mrb[16].mxu0 }
 0x5c8   :  { %3889 = vst [vmem:[%s6956_s5 + $0x80] sm:$0xff] %v3861_v58  ;;  %v3864_v21 = vmax.f32 %v4224_v59, 0.0  ;;  %v4211_v8 = vadd.f32 %v3620_v46, %v3376_v36  ;;  %v3622_v9 = vpop.f32.mrb[17].mxu0  ;;  %v3834_v43 = vpop.f32.mrb[16].mxu1 }
 0x5c9   :  { %3890 = vst [vmem:[%s6956_s5 + $0x88] sm:$0xff] %v3862_v33  ;;  %3891 = vst [vmem:[%s6956_s5 + $0x90] sm:$0xff] %v3863_v27  ;;  %v4212_v12 = vadd.f32 %v3622_v9, %v3376_v36  ;;  %v4225_v23 = vadd.f32 %v3834_v43, %v3376_v36  ;;  %v3836_v49 = vpop.f32.mrb[17].mxu1 }
 0x5ca   :  { %3892 = vst [vmem:[%s6956_s5 + $0x98] sm:$0xff] %v3864_v21  ;;  %v3865_v11 = vmax.f32 %v4211_v8, 0.0  ;;  %v4226_v10 = vadd.f32 %v3836_v49, %v3376_v36 }
 0x5cb   :  { %v3866_v39 = vmax.f32 %v4212_v12, 0.0  ;;  %v3867_v28 = vmax.f32 %v4225_v23, 0.0  ;;  %v3626_v42 = vpop.f32.mrb[18].mxu0 }
 0x5cc   :  { %3893 = vst [vmem:[%s6956_s5 + $0xa0] sm:$0xff] %v3865_v11  ;;  %v3868_v41 = vmax.f32 %v4226_v10, 0.0  ;;  %v4213_v45 = vadd.f32 %v3626_v42, %v3381_v6  ;;  %v3628_v51 = vpop.f32.mrb[19].mxu0  ;;  %v3840_v13 = vpop.f32.mrb[18].mxu1 }
 0x5cd   :  { %3894 = vst [vmem:[%s6956_s5 + $0xa8] sm:$0xff] %v3866_v39  ;;  %3895 = vst [vmem:[%s6956_s5 + $0xb0] sm:$0xff] %v3867_v28  ;;  %v4214_v57 = vadd.f32 %v3628_v51, %v3381_v6  ;;  %v4227_v52 = vadd.f32 %v3840_v13, %v3381_v6  ;;  %v3842_v55 = vpop.f32.mrb[19].mxu1 }
 0x5ce   :  { %3896 = vst [vmem:[%s6956_s5 + $0xb8] sm:$0xff] %v3868_v41  ;;  %v3869_v38 = vmax.f32 %v4213_v45, 0.0  ;;  %v4228_v35 = vadd.f32 %v3842_v55, %v3381_v6 }
 0x5cf   :  { %v3870_v44 = vmax.f32 %v4214_v57, 0.0  ;;  %v3871_v17 = vmax.f32 %v4227_v52, 0.0 }
 0x5d0   :  { %3897 = vst [vmem:[%s6956_s5 + $0xc0] sm:$0x3] %v3869_v38  ;;  %v3872_v40 = vmax.f32 %v4228_v35, 0.0 }
 0x5d1   :  { %3898 = vst [vmem:[%s6956_s5 + $0xc8] sm:$0x3] %v3870_v44  ;;  %3899 = vst [vmem:[%s6956_s5 + $0xd0] sm:$0x3] %v3871_v17 }
 0x5d2   :  { %3900 = vst [vmem:[%s6956_s5 + $0xd8] sm:$0x3] %v3872_v40 }

</bundles_post_ra>
